<compile_context>
chip_gen: v7x
topology: tpu7x:2x2x1
jax: 0.10.0
libtpu: 0.0.40
codegen_flags: <defaults>
</compile_context>

<pallas_src>
import math

import numpy as np
import jax
import jax.numpy as jnp
from jax.experimental import pallas as pl
from jax.experimental.pallas import tpu as pltpu  # noqa: F401  (TPU backend import)

jax.config.update("jax_default_matmul_precision", "highest")

# ------------------------- small model hyper-parameters -------------------------
DIM = 64
N_HEADS = 4
N_KV_HEADS = 2
HEAD_DIM = DIM // N_HEADS            # 16
HALF = HEAD_DIM // 2                 # 8
N_REP = N_HEADS // N_KV_HEADS        # 2  (GQA repeat_interleave factor)
HIDDEN = 128                         # ModelArgs.hidden_dim set explicitly
VOCAB = 128
N_LAYERS = 2
MAX_SEQ = 16
SEQ = 8
BATCH = 2
N_TOK = BATCH * SEQ                  # 16 rows, batch folded into sublanes
N_ROW = N_HEADS * N_TOK              # 64 head-major attention rows
EPS = 1e-5                           # ModelArgs.norm_eps
ROPE_BASE = 10000.0
NEG_INF = -1e30

# fused QKV weight column layout:  [ q | q_rot | k | k_rot | v | pad ]
Q_W = N_HEADS * HEAD_DIM             # 64
KV_W = N_KV_HEADS * HEAD_DIM         # 32
OFF_QR = Q_W                         # 64
OFF_K = 2 * Q_W                      # 128
OFF_KR = OFF_K + KV_W                # 160
OFF_V = OFF_KR + KV_W                # 192
QKV_W = 256                          # padded to a lane-dense 256-wide matmul output

# interleaved (even/odd pairs) -> half-split layout within each head
ROPE_PERM = np.concatenate([np.arange(0, HEAD_DIM, 2), np.arange(1, HEAD_DIM, 2)])
# rotate-half permutation within a (half-split) head
ROT_HALF = np.concatenate([np.arange(HALF, HEAD_DIM), np.arange(0, HALF)])


# ------------------------------- Pallas kernel ---------------------------------
def _rmsnorm(x, w):
    # x: (R, D), w: (1, D)
    ms = jnp.mean(x * x, axis=-1, keepdims=True)
    return (x * jax.lax.rsqrt(ms + EPS)) * w


def fused_forward_kernel(x_ref, cosq_ref, sinq_ref, cosk_ref, sink_ref, bias_ref,
                         an_ref, fn_ref,
                         wqkv_ref, wo_ref, w13_ref, w2_ref,
                         fw_ref, wout_ref,
                         o_ref):
    h = x_ref[...]                       # (N_TOK, DIM)
    cos_q = cosq_ref[...]                # (N_TOK, Q_W)   per-head tiled cos
    sin_q = sinq_ref[...]                # rotate-half sign already folded in
    cos_k = cosk_ref[...]                # (N_TOK, KV_W)
    sin_k = sink_ref[...]
    bias = bias_ref[...]                 # (N_ROW, N_ROW) head/batch/causal mask bias

    # ---- static layer loop: everything stays in VMEM/vregs ----
    for l in range(N_LAYERS):
        x = h
        xn = _rmsnorm(x, an_ref[l])                                   # (N_TOK, DIM)

        # one fused QKV matmul; weight carries q, rot(q), k, rot(k), v column blocks,
        # 1/sqrt(HD) folded into the q columns.
        qkv = jnp.dot(xn, wqkv_ref[l],
                      preferred_element_type=jnp.float32)             # (N_TOK, QKV_W)

        # RoPE as pure elementwise multiply-adds (rotation folded into the weight).
        q = qkv[:, 0:Q_W] * cos_q + qkv[:, OFF_QR:OFF_QR + Q_W] * sin_q        # (16, 64)
        k = qkv[:, OFF_K:OFF_K + KV_W] + 0.0
        k = qkv[:, OFF_K:OFF_K + KV_W] * cos_k + qkv[:, OFF_KR:OFF_KR + KV_W] * sin_k  # (16, 32)
        v = qkv[:, OFF_V:OFF_V + KV_W]                                          # (16, 32)

        # fold heads into sublane rows (head-major) for single block-diag attention matmuls;
        # GQA handled by selecting kv head hh//N_REP for each query head hh.
        q_big = jnp.concatenate(
            [q[:, hh * HEAD_DIM:(hh + 1) * HEAD_DIM] for hh in range(N_HEADS)], axis=0)  # (64,16)
        k_big = jnp.concatenate(
            [k[:, (hh // N_REP) * HEAD_DIM:(hh // N_REP + 1) * HEAD_DIM]
             for hh in range(N_HEADS)], axis=0)                                           # (64,16)
        v_big = jnp.concatenate(
            [v[:, (hh // N_REP) * HEAD_DIM:(hh // N_REP + 1) * HEAD_DIM]
             for hh in range(N_HEADS)], axis=0)                                           # (64,16)

        s = jnp.einsum('qd,kd->qk', q_big, k_big,
                       preferred_element_type=jnp.float32) + bias       # (64, 64)
        s = s - jnp.max(s, axis=-1, keepdims=True)
        p = jnp.exp(s)
        p = p / jnp.sum(p, axis=-1, keepdims=True)                       # exact softmax
        o_att = jnp.dot(p, v_big, preferred_element_type=jnp.float32)    # (64, 16)

        # reassemble (token, head*head_dim) and apply wo as one matmul
        attn = jnp.concatenate(
            [o_att[hh * N_TOK:(hh + 1) * N_TOK, :] for hh in range(N_HEADS)], axis=-1)  # (16,64)
        h1 = x + jnp.dot(attn, wo_ref[l], preferred_element_type=jnp.float32)

        # ---- SwiGLU feed-forward with fused w1|w3 ----
        hn = _rmsnorm(h1, fn_ref[l])
        gu = jnp.dot(hn, w13_ref[l], preferred_element_type=jnp.float32)  # (16, 2*HIDDEN)
        g = gu[:, :HIDDEN]
        u = gu[:, HIDDEN:]
        act = (g / (1.0 + jnp.exp(-g))) * u                               # exact silu(g) * u
        h = h1 + jnp.dot(act, w2_ref[l], preferred_element_type=jnp.float32)

    # ---- final norm + output head, lane-dense for all rows (last-token select in wrapper) ----
    hn = _rmsnorm(h, fw_ref[...])
    o_ref[...] = jnp.dot(hn, wout_ref[...], preferred_element_type=jnp.float32)  # (16, VOCAB)


# ----------------------------- Pallas wrapper -----------------------------------
def transformer_forward_pallas(tokens, fused):
    x = fused['emb'][tokens].reshape(N_TOK, DIM)     # embedding gather (glue)
    logits_all = pl.pallas_call(
        fused_forward_kernel,
        out_shape=jax.ShapeDtypeStruct((N_TOK, VOCAB), jnp.float32),
    )(x, fused['cos_q'], fused['sin_q'], fused['cos_k'], fused['sin_k'], fused['bias'],
      fused['attn_norm'], fused['ffn_norm'],
      fused['wqkv'], fused['wo'], fused['w13'], fused['w2'],
      fused['final_norm'], fused['wout'])
    # generate_full_logits=False: keep only the last token of each sequence
    return logits_all[SEQ - 1::SEQ, :]               # (BATCH, VOCAB)


# ------------------------------ glue / parameters --------------------------------
def precompute_freqs(head_dim, end, base):
    inv = 1.0 / (base ** (np.arange(0, head_dim, 2)[: head_dim // 2] / head_dim))
    t = np.arange(end)
    freqs = np.outer(t, inv)
    return (jnp.asarray(np.cos(freqs), jnp.float32),
            jnp.asarray(np.sin(freqs), jnp.float32))          # (end, HD/2) each


def init_params(key):
    def nxt():
        nonlocal key
        key, sub = jax.random.split(key)
        return sub

    def linear(in_f, out_f):
        return (jax.random.normal(nxt(), (in_f, out_f), jnp.float32)
                / np.sqrt(in_f)).astype(jnp.float32)

    def norm_w():
        return (1.0 + 0.05 * jax.random.normal(nxt(), (1, DIM))).astype(jnp.float32)

    params = {
        'emb': (0.1 * jax.random.normal(nxt(), (VOCAB, DIM))).astype(jnp.float32),
        'layers': [],
        'final_norm': norm_w(),
        'wout': linear(DIM, VOCAB),
    }
    for _ in range(N_LAYERS):
        params['layers'].append({
            'attn_norm': norm_w(),
            'ffn_norm': norm_w(),
            'wq': linear(DIM, N_HEADS * HEAD_DIM),
            'wk': linear(DIM, N_KV_HEADS * HEAD_DIM),
            'wv': linear(DIM, N_KV_HEADS * HEAD_DIM),
            'wo': linear(N_HEADS * HEAD_DIM, DIM),
            'w1': linear(DIM, HIDDEN),
            'w3': linear(DIM, HIDDEN),
            'w2': linear(HIDDEN, DIM),
        })
    return params


def prepare_fused_params(params, cos_half, sin_half):
    """One-time parameter transforms: fused QKV weight (with scale, half-split RoPE
    column layout and rotate-half copies folded in), fused w1|w3, layer stacking,
    cos/sin tiling and the head/batch/causal mask bias."""
    scale = 1.0 / math.sqrt(HEAD_DIM)

    def fused_qkv(wq, wk, wv):
        qs, qrs, ks, krs = [], [], [], []
        for hh in range(N_HEADS):
            wqh = wq[:, hh * HEAD_DIM:(hh + 1) * HEAD_DIM][:, ROPE_PERM] * scale
            qs.append(wqh)
            qrs.append(wqh[:, ROT_HALF])
        for g in range(N_KV_HEADS):
            wkh = wk[:, g * HEAD_DIM:(g + 1) * HEAD_DIM][:, ROPE_PERM]
            ks.append(wkh)
            krs.append(wkh[:, ROT_HALF])
        w = jnp.concatenate(qs + qrs + ks + krs + [wv], axis=1)          # (DIM, 224)
        pad = jnp.zeros((DIM, QKV_W - w.shape[1]), jnp.float32)
        return jnp.concatenate([w, pad], axis=1)                         # (DIM, 256)

    layers = params['layers']
    fused = {
        'emb': params['emb'],
        'attn_norm': jnp.stack([l['attn_norm'] for l in layers]),        # (L, 1, D)
        'ffn_norm': jnp.stack([l['ffn_norm'] for l in layers]),
        'wqkv': jnp.stack([fused_qkv(l['wq'], l['wk'], l['wv']) for l in layers]),  # (L, D, 256)
        'wo': jnp.stack([l['wo'] for l in layers]),                      # (L, D, D)
        'w13': jnp.stack([jnp.concatenate([l['w1'], l['w3']], axis=1)
                          for l in layers]),                             # (L, D, 2*HID)
        'w2': jnp.stack([l['w2'] for l in layers]),                      # (L, HID, D)
        'final_norm': params['final_norm'],                              # (1, D)
        'wout': params['wout'],                                          # (D, VOCAB)
    }

    # RoPE tables in half-split layout (rotate sign folded into sin), tiled over the
    # folded batch rows and over heads along lanes.
    cos_full = jnp.concatenate([cos_half, cos_half], axis=-1)            # (SEQ, HD)
    sin_signed = jnp.concatenate([-sin_half, sin_half], axis=-1)
    cos_tok = jnp.tile(cos_full, (BATCH, 1))                             # (N_TOK, HD)
    sin_tok = jnp.tile(sin_signed, (BATCH, 1))
    fused['cos_q'] = jnp.tile(cos_tok, (1, N_HEADS))                     # (N_TOK, Q_W)
    fused['sin_q'] = jnp.tile(sin_tok, (1, N_HEADS))
    fused['cos_k'] = jnp.tile(cos_tok, (1, N_KV_HEADS))                  # (N_TOK, KV_W)
    fused['sin_k'] = jnp.tile(sin_tok, (1, N_KV_HEADS))

    # Block-diagonal mask bias over head-major folded rows: same head, same batch, causal.
    r = np.arange(N_ROW)
    head = r // N_TOK
    b = (r % N_TOK) // SEQ
    pos = r % SEQ
    ok = ((head[:, None] == head[None, :]) &
          (b[:, None] == b[None, :]) &
          (pos[None, :] <= pos[:, None]))
    fused['bias'] = jnp.asarray(np.where(ok, 0.0, NEG_INF), jnp.float32)  # (N_ROW, N_ROW)
    return fused


# --------------------------- pure-JAX reference (torch semantics) ----------------
def _rmsnorm_ref(x, w):
    ms = jnp.mean(x * x, axis=-1, keepdims=True)
    return x * jax.lax.rsqrt(ms + EPS) * w


def _rope_ref(x, cos, sin):
    # x: (B, S, H, HD), cos/sin: (S, HD/2) — interleaved pairs like the torch model
    xr = x[..., 0::2]
    xi = x[..., 1::2]
    c = cos[None, :, None, :]
    s = sin[None, :, None, :]
    out_r = xr * c - xi * s
    out_i = xr * s + xi * c
    return jnp.stack([out_r, out_i], axis=-1).reshape(x.shape)


def reference_forward(tokens, params, cos_half, sin_half):
    h = params['emb'][tokens]
    mask = np.tril(np.ones((SEQ, SEQ), dtype=bool))
    for layer in params['layers']:
        x = h
        xn = _rmsnorm_ref(x, layer['attn_norm'][0])
        q = (xn @ layer['wq']).reshape(BATCH, SEQ, N_HEADS, HEAD_DIM)
        k = (xn @ layer['wk']).reshape(BATCH, SEQ, N_KV_HEADS, HEAD_DIM)
        v = (xn @ layer['wv']).reshape(BATCH, SEQ, N_KV_HEADS, HEAD_DIM)
        q = _rope_ref(q, cos_half, sin_half).transpose(0, 2, 1, 3)
        k = jnp.repeat(_rope_ref(k, cos_half, sin_half).transpose(0, 2, 1, 3), N_REP, axis=1)
        v = jnp.repeat(v.transpose(0, 2, 1, 3), N_REP, axis=1)
        s = jnp.einsum('bhqd,bhkd->bhqk', q, k) / math.sqrt(HEAD_DIM)
        s = jnp.where(mask[None, None], s, -jnp.inf)
        p = jax.nn.softmax(s, axis=-1)
        o = jnp.einsum('bhqk,bhkd->bhqd', p, v).transpose(0, 2, 1, 3)
        o = o.reshape(BATCH, SEQ, N_HEADS * HEAD_DIM)
        h1 = x + o @ layer['wo']
        hn = _rmsnorm_ref(h1, layer['ffn_norm'][0])
        h = h1 + (jax.nn.silu(hn @ layer['w1']) * (hn @ layer['w3'])) @ layer['w2']
    hl = h[:, -1, :]
    hn = _rmsnorm_ref(hl, params['final_norm'][0])
    return hn @ params['wout']


# --------------------------------------- main -------------------------------------
if __name__ == "__main__":
    key = jax.random.PRNGKey(0)
    k_tok, k_params = jax.random.split(key)
    params = init_params(k_params)
    tokens = jax.random.randint(k_tok, (BATCH, SEQ), 0, VOCAB)

    cos_all, sin_all = precompute_freqs(HEAD_DIM, MAX_SEQ, ROPE_BASE)
    cos_half, sin_half = cos_all[:SEQ], sin_all[:SEQ]

    # One-time setup (not part of the per-forward path).
    fused = prepare_fused_params(params, cos_half, sin_half)
    fused = jax.tree_util.tree_map(jax.block_until_ready, fused)

    logits = transformer_forward_pallas(tokens, fused)
    logits = jax.block_until_ready(logits)

    ref = jax.block_until_ready(reference_forward(tokens, params, cos_half, sin_half))
    assert logits.shape == (BATCH, VOCAB)
    np.testing.assert_allclose(np.asarray(logits), np.asarray(ref), rtol=5e-3, atol=5e-3)

    print("KERNEL_OK")
</pallas_src>

<mosaic_0001>
module attributes {stable_mosaic.version = 11 : i64} {
  func.func @fused_forward_kernel(%arg0: memref<16x64xf32, #tpu.memory_space<vmem>>, %arg1: memref<16x64xf32, #tpu.memory_space<vmem>>, %arg2: memref<16x64xf32, #tpu.memory_space<vmem>>, %arg3: memref<16x32xf32, #tpu.memory_space<vmem>>, %arg4: memref<16x32xf32, #tpu.memory_space<vmem>>, %arg5: memref<64x64xf32, #tpu.memory_space<vmem>>, %arg6: memref<2x1x64xf32, #tpu.memory_space<vmem>>, %arg7: memref<2x1x64xf32, #tpu.memory_space<vmem>>, %arg8: memref<2x64x256xf32, #tpu.memory_space<vmem>>, %arg9: memref<2x64x64xf32, #tpu.memory_space<vmem>>, %arg10: memref<2x64x256xf32, #tpu.memory_space<vmem>>, %arg11: memref<2x128x64xf32, #tpu.memory_space<vmem>>, %arg12: memref<1x64xf32, #tpu.memory_space<vmem>>, %arg13: memref<64x128xf32, #tpu.memory_space<vmem>>, %arg14: memref<16x128xf32, #tpu.memory_space<vmem>>) attributes {dimension_semantics = [], scalar_prefetch = 0 : i64, scratch_operands = 0 : i64, tpu.core_type = #tpu.core_type<tc>} {
    %c0 = arith.constant 0 : index
    %c0_0 = arith.constant 0 : index
    %0 = vector.load %arg0[%c0, %c0_0] : memref<16x64xf32, #tpu.memory_space<vmem>>, vector<16x64xf32>
    %c0_1 = arith.constant 0 : index
    %c0_2 = arith.constant 0 : index
    %1 = vector.load %arg1[%c0_1, %c0_2] : memref<16x64xf32, #tpu.memory_space<vmem>>, vector<16x64xf32>
    %c0_3 = arith.constant 0 : index
    %c0_4 = arith.constant 0 : index
    %2 = vector.load %arg2[%c0_3, %c0_4] : memref<16x64xf32, #tpu.memory_space<vmem>>, vector<16x64xf32>
    %c0_5 = arith.constant 0 : index
    %c0_6 = arith.constant 0 : index
    %3 = vector.load %arg3[%c0_5, %c0_6] : memref<16x32xf32, #tpu.memory_space<vmem>>, vector<16x32xf32>
    %c0_7 = arith.constant 0 : index
    %c0_8 = arith.constant 0 : index
    %4 = vector.load %arg4[%c0_7, %c0_8] : memref<16x32xf32, #tpu.memory_space<vmem>>, vector<16x32xf32>
    %c0_9 = arith.constant 0 : index
    %c0_10 = arith.constant 0 : index
    %5 = vector.load %arg5[%c0_9, %c0_10] : memref<64x64xf32, #tpu.memory_space<vmem>>, vector<64x64xf32>
    %c0_11 = arith.constant 0 : index
    %c0_12 = arith.constant 0 : index
    %c0_13 = arith.constant 0 : index
    %6 = vector.load %arg6[%c0_11, %c0_12, %c0_13] : memref<2x1x64xf32, #tpu.memory_space<vmem>>, vector<1x1x64xf32>
    %7 = vector.shape_cast %6 : vector<1x1x64xf32> to vector<1x64xf32>
    %8 = arith.mulf %0, %0 : vector<16x64xf32>
    %cst = arith.constant dense<0.000000e+00> : vector<16xf32>
    %9 = vector.multi_reduction <add>, %8, %cst [1] : vector<16x64xf32> to vector<16xf32>
    %10 = vector.shape_cast %9 : vector<16xf32> to vector<16x1xf32>
    %cst_14 = arith.constant 6.400000e+01 : f32
    %11 = vector.broadcast %cst_14 : f32 to vector<16x1xf32>
    %12 = arith.divf %10, %11 : vector<16x1xf32>
    %cst_15 = arith.constant 9.99999974E-6 : f32
    %13 = vector.broadcast %cst_15 : f32 to vector<16x1xf32>
    %14 = arith.addf %12, %13 : vector<16x1xf32>
    %15 = math.rsqrt %14 : vector<16x1xf32>
    %16 = vector.broadcast %15 : vector<16x1xf32> to vector<16x64xf32>
    %17 = arith.mulf %0, %16 : vector<16x64xf32>
    %18 = vector.broadcast %7 : vector<1x64xf32> to vector<16x64xf32>
    %19 = arith.mulf %17, %18 : vector<16x64xf32>
    %c0_16 = arith.constant 0 : index
    %c0_17 = arith.constant 0 : index
    %c0_18 = arith.constant 0 : index
    %20 = vector.load %arg8[%c0_16, %c0_17, %c0_18] : memref<2x64x256xf32, #tpu.memory_space<vmem>>, vector<1x64x256xf32>
    %21 = vector.shape_cast %20 : vector<1x64x256xf32> to vector<64x256xf32>
    %cst_19 = arith.constant dense<0.000000e+00> : vector<16x256xf32>
    %22 = tpu.matmul %19, %21, %cst_19 {dimension_numbers = #tpu.dot_dimension_numbers<[1], [0], [0], [1], [0, 0, 1, 1], [], []>, precision = #tpu.contract_precision<fp32>} : vector<16x64xf32>, vector<64x256xf32>, vector<16x256xf32> -> vector<16x256xf32>
    %23 = vector.extract_strided_slice %22 {offsets = [0, 0], sizes = [16, 64], strides = [1, 1]} : vector<16x256xf32> to vector<16x64xf32>
    %24 = arith.mulf %23, %1 : vector<16x64xf32>
    %25 = vector.extract_strided_slice %22 {offsets = [0, 64], sizes = [16, 64], strides = [1, 1]} : vector<16x256xf32> to vector<16x64xf32>
    %26 = arith.mulf %25, %2 : vector<16x64xf32>
    %27 = arith.addf %24, %26 : vector<16x64xf32>
    %28 = vector.extract_strided_slice %22 {offsets = [0, 128], sizes = [16, 32], strides = [1, 1]} : vector<16x256xf32> to vector<16x32xf32>
    %29 = arith.mulf %28, %3 : vector<16x32xf32>
    %30 = vector.extract_strided_slice %22 {offsets = [0, 160], sizes = [16, 32], strides = [1, 1]} : vector<16x256xf32> to vector<16x32xf32>
    %31 = arith.mulf %30, %4 : vector<16x32xf32>
    %32 = arith.addf %29, %31 : vector<16x32xf32>
    %33 = vector.extract_strided_slice %22 {offsets = [0, 192], sizes = [16, 32], strides = [1, 1]} : vector<16x256xf32> to vector<16x32xf32>
    %34 = vector.extract_strided_slice %27 {offsets = [0, 0], sizes = [16, 16], strides = [1, 1]} : vector<16x64xf32> to vector<16x16xf32>
    %35 = vector.extract_strided_slice %27 {offsets = [0, 16], sizes = [16, 16], strides = [1, 1]} : vector<16x64xf32> to vector<16x16xf32>
    %36 = vector.extract_strided_slice %27 {offsets = [0, 32], sizes = [16, 16], strides = [1, 1]} : vector<16x64xf32> to vector<16x16xf32>
    %37 = vector.extract_strided_slice %27 {offsets = [0, 48], sizes = [16, 16], strides = [1, 1]} : vector<16x64xf32> to vector<16x16xf32>
    %38 = tpu.concatenate %34, %35, %36, %37 in 0 : vector<16x16xf32>, vector<16x16xf32>, vector<16x16xf32>, vector<16x16xf32> -> vector<64x16xf32>
    %39 = vector.extract_strided_slice %32 {offsets = [0, 0], sizes = [16, 16], strides = [1, 1]} : vector<16x32xf32> to vector<16x16xf32>
    %40 = vector.extract_strided_slice %32 {offsets = [0, 0], sizes = [16, 16], strides = [1, 1]} : vector<16x32xf32> to vector<16x16xf32>
    %41 = vector.extract_strided_slice %32 {offsets = [0, 16], sizes = [16, 16], strides = [1, 1]} : vector<16x32xf32> to vector<16x16xf32>
    %42 = vector.extract_strided_slice %32 {offsets = [0, 16], sizes = [16, 16], strides = [1, 1]} : vector<16x32xf32> to vector<16x16xf32>
    %43 = tpu.concatenate %39, %40, %41, %42 in 0 : vector<16x16xf32>, vector<16x16xf32>, vector<16x16xf32>, vector<16x16xf32> -> vector<64x16xf32>
    %44 = vector.extract_strided_slice %33 {offsets = [0, 0], sizes = [16, 16], strides = [1, 1]} : vector<16x32xf32> to vector<16x16xf32>
    %45 = vector.extract_strided_slice %33 {offsets = [0, 0], sizes = [16, 16], strides = [1, 1]} : vector<16x32xf32> to vector<16x16xf32>
    %46 = vector.extract_strided_slice %33 {offsets = [0, 16], sizes = [16, 16], strides = [1, 1]} : vector<16x32xf32> to vector<16x16xf32>
    %47 = vector.extract_strided_slice %33 {offsets = [0, 16], sizes = [16, 16], strides = [1, 1]} : vector<16x32xf32> to vector<16x16xf32>
    %48 = tpu.concatenate %44, %45, %46, %47 in 0 : vector<16x16xf32>, vector<16x16xf32>, vector<16x16xf32>, vector<16x16xf32> -> vector<64x16xf32>
    "tpu.trace_start"() <{level = 10 : i32, message = "qd,kd->qk"}> : () -> ()
    %cst_20 = arith.constant dense<0.000000e+00> : vector<64x64xf32>
    %49 = tpu.matmul %38, %43, %cst_20 {dimension_numbers = #tpu.dot_dimension_numbers<[1], [1], [0], [0], [0, 0, 1, 0], [], []>, precision = #tpu.contract_precision<fp32>} : vector<64x16xf32>, vector<64x16xf32>, vector<64x64xf32> -> vector<64x64xf32>
    "tpu.trace_stop"() : () -> ()
    %50 = arith.addf %49, %5 : vector<64x64xf32>
    %cst_21 = arith.constant dense<0xFF800000> : vector<64xf32>
    %51 = vector.multi_reduction <maximumf>, %50, %cst_21 [1] : vector<64x64xf32> to vector<64xf32>
    %52 = vector.shape_cast %51 : vector<64xf32> to vector<64x1xf32>
    %53 = vector.broadcast %52 : vector<64x1xf32> to vector<64x64xf32>
    %54 = arith.subf %50, %53 : vector<64x64xf32>
    %55 = math.exp %54 : vector<64x64xf32>
    %cst_22 = arith.constant dense<0.000000e+00> : vector<64xf32>
    %56 = vector.multi_reduction <add>, %55, %cst_22 [1] : vector<64x64xf32> to vector<64xf32>
    %57 = vector.shape_cast %56 : vector<64xf32> to vector<64x1xf32>
    %58 = vector.broadcast %57 : vector<64x1xf32> to vector<64x64xf32>
    %59 = arith.divf %55, %58 : vector<64x64xf32>
    %cst_23 = arith.constant dense<0.000000e+00> : vector<64x16xf32>
    %60 = tpu.matmul %59, %48, %cst_23 {dimension_numbers = #tpu.dot_dimension_numbers<[1], [0], [0], [1], [0, 0, 1, 1], [], []>, precision = #tpu.contract_precision<fp32>} : vector<64x64xf32>, vector<64x16xf32>, vector<64x16xf32> -> vector<64x16xf32>
    %61 = vector.extract_strided_slice %60 {offsets = [0, 0], sizes = [16, 16], strides = [1, 1]} : vector<64x16xf32> to vector<16x16xf32>
    %62 = vector.extract_strided_slice %60 {offsets = [16, 0], sizes = [16, 16], strides = [1, 1]} : vector<64x16xf32> to vector<16x16xf32>
    %63 = vector.extract_strided_slice %60 {offsets = [32, 0], sizes = [16, 16], strides = [1, 1]} : vector<64x16xf32> to vector<16x16xf32>
    %64 = vector.extract_strided_slice %60 {offsets = [48, 0], sizes = [16, 16], strides = [1, 1]} : vector<64x16xf32> to vector<16x16xf32>
    %65 = tpu.concatenate %61, %62, %63, %64 in 1 : vector<16x16xf32>, vector<16x16xf32>, vector<16x16xf32>, vector<16x16xf32> -> vector<16x64xf32>
    %c0_24 = arith.constant 0 : index
    %c0_25 = arith.constant 0 : index
    %c0_26 = arith.constant 0 : index
    %66 = vector.load %arg9[%c0_24, %c0_25, %c0_26] : memref<2x64x64xf32, #tpu.memory_space<vmem>>, vector<1x64x64xf32>
    %67 = vector.shape_cast %66 : vector<1x64x64xf32> to vector<64x64xf32>
    %cst_27 = arith.constant dense<0.000000e+00> : vector<16x64xf32>
    %68 = tpu.matmul %65, %67, %cst_27 {dimension_numbers = #tpu.dot_dimension_numbers<[1], [0], [0], [1], [0, 0, 1, 1], [], []>, precision = #tpu.contract_precision<fp32>} : vector<16x64xf32>, vector<64x64xf32>, vector<16x64xf32> -> vector<16x64xf32>
    %69 = arith.addf %0, %68 : vector<16x64xf32>
    %c0_28 = arith.constant 0 : index
    %c0_29 = arith.constant 0 : index
    %c0_30 = arith.constant 0 : index
    %70 = vector.load %arg7[%c0_28, %c0_29, %c0_30] : memref<2x1x64xf32, #tpu.memory_space<vmem>>, vector<1x1x64xf32>
    %71 = vector.shape_cast %70 : vector<1x1x64xf32> to vector<1x64xf32>
    %72 = arith.mulf %69, %69 : vector<16x64xf32>
    %cst_31 = arith.constant dense<0.000000e+00> : vector<16xf32>
    %73 = vector.multi_reduction <add>, %72, %cst_31 [1] : vector<16x64xf32> to vector<16xf32>
    %74 = vector.shape_cast %73 : vector<16xf32> to vector<16x1xf32>
    %cst_32 = arith.constant 6.400000e+01 : f32
    %75 = vector.broadcast %cst_32 : f32 to vector<16x1xf32>
    %76 = arith.divf %74, %75 : vector<16x1xf32>
    %cst_33 = arith.constant 9.99999974E-6 : f32
    %77 = vector.broadcast %cst_33 : f32 to vector<16x1xf32>
    %78 = arith.addf %76, %77 : vector<16x1xf32>
    %79 = math.rsqrt %78 : vector<16x1xf32>
    %80 = vector.broadcast %79 : vector<16x1xf32> to vector<16x64xf32>
    %81 = arith.mulf %69, %80 : vector<16x64xf32>
    %82 = vector.broadcast %71 : vector<1x64xf32> to vector<16x64xf32>
    %83 = arith.mulf %81, %82 : vector<16x64xf32>
    %c0_34 = arith.constant 0 : index
    %c0_35 = arith.constant 0 : index
    %c0_36 = arith.constant 0 : index
    %84 = vector.load %arg10[%c0_34, %c0_35, %c0_36] : memref<2x64x256xf32, #tpu.memory_space<vmem>>, vector<1x64x256xf32>
    %85 = vector.shape_cast %84 : vector<1x64x256xf32> to vector<64x256xf32>
    %cst_37 = arith.constant dense<0.000000e+00> : vector<16x256xf32>
    %86 = tpu.matmul %83, %85, %cst_37 {dimension_numbers = #tpu.dot_dimension_numbers<[1], [0], [0], [1], [0, 0, 1, 1], [], []>, precision = #tpu.contract_precision<fp32>} : vector<16x64xf32>, vector<64x256xf32>, vector<16x256xf32> -> vector<16x256xf32>
    %87 = vector.extract_strided_slice %86 {offsets = [0, 0], sizes = [16, 128], strides = [1, 1]} : vector<16x256xf32> to vector<16x128xf32>
    %88 = vector.extract_strided_slice %86 {offsets = [0, 128], sizes = [16, 128], strides = [1, 1]} : vector<16x256xf32> to vector<16x128xf32>
    %cst_38 = arith.constant 0.000000e+00 : f32
    %89 = vector.broadcast %cst_38 : f32 to vector<16x128xf32>
    %90 = arith.subf %89, %87 : vector<16x128xf32>
    %91 = math.exp %90 : vector<16x128xf32>
    %cst_39 = arith.constant 1.000000e+00 : f32
    %92 = vector.broadcast %cst_39 : f32 to vector<16x128xf32>
    %93 = arith.addf %92, %91 : vector<16x128xf32>
    %94 = arith.divf %87, %93 : vector<16x128xf32>
    %95 = arith.mulf %94, %88 : vector<16x128xf32>
    %c0_40 = arith.constant 0 : index
    %c0_41 = arith.constant 0 : index
    %c0_42 = arith.constant 0 : index
    %96 = vector.load %arg11[%c0_40, %c0_41, %c0_42] : memref<2x128x64xf32, #tpu.memory_space<vmem>>, vector<1x128x64xf32>
    %97 = vector.shape_cast %96 : vector<1x128x64xf32> to vector<128x64xf32>
    %cst_43 = arith.constant dense<0.000000e+00> : vector<16x64xf32>
    %98 = tpu.matmul %95, %97, %cst_43 {dimension_numbers = #tpu.dot_dimension_numbers<[1], [0], [0], [1], [0, 0, 1, 1], [], []>, precision = #tpu.contract_precision<fp32>} : vector<16x128xf32>, vector<128x64xf32>, vector<16x64xf32> -> vector<16x64xf32>
    %99 = arith.addf %69, %98 : vector<16x64xf32>
    %c1 = arith.constant 1 : index
    %c0_44 = arith.constant 0 : index
    %c0_45 = arith.constant 0 : index
    %100 = vector.load %arg6[%c1, %c0_44, %c0_45] : memref<2x1x64xf32, #tpu.memory_space<vmem>>, vector<1x1x64xf32>
    %101 = vector.shape_cast %100 : vector<1x1x64xf32> to vector<1x64xf32>
    %102 = arith.mulf %99, %99 : vector<16x64xf32>
    %cst_46 = arith.constant dense<0.000000e+00> : vector<16xf32>
    %103 = vector.multi_reduction <add>, %102, %cst_46 [1] : vector<16x64xf32> to vector<16xf32>
    %104 = vector.shape_cast %103 : vector<16xf32> to vector<16x1xf32>
    %cst_47 = arith.constant 6.400000e+01 : f32
    %105 = vector.broadcast %cst_47 : f32 to vector<16x1xf32>
    %106 = arith.divf %104, %105 : vector<16x1xf32>
    %cst_48 = arith.constant 9.99999974E-6 : f32
    %107 = vector.broadcast %cst_48 : f32 to vector<16x1xf32>
    %108 = arith.addf %106, %107 : vector<16x1xf32>
    %109 = math.rsqrt %108 : vector<16x1xf32>
    %110 = vector.broadcast %109 : vector<16x1xf32> to vector<16x64xf32>
    %111 = arith.mulf %99, %110 : vector<16x64xf32>
    %112 = vector.broadcast %101 : vector<1x64xf32> to vector<16x64xf32>
    %113 = arith.mulf %111, %112 : vector<16x64xf32>
    %c1_49 = arith.constant 1 : index
    %c0_50 = arith.constant 0 : index
    %c0_51 = arith.constant 0 : index
    %114 = vector.load %arg8[%c1_49, %c0_50, %c0_51] : memref<2x64x256xf32, #tpu.memory_space<vmem>>, vector<1x64x256xf32>
    %115 = vector.shape_cast %114 : vector<1x64x256xf32> to vector<64x256xf32>
    %cst_52 = arith.constant dense<0.000000e+00> : vector<16x256xf32>
    %116 = tpu.matmul %113, %115, %cst_52 {dimension_numbers = #tpu.dot_dimension_numbers<[1], [0], [0], [1], [0, 0, 1, 1], [], []>, precision = #tpu.contract_precision<fp32>} : vector<16x64xf32>, vector<64x256xf32>, vector<16x256xf32> -> vector<16x256xf32>
    %117 = vector.extract_strided_slice %116 {offsets = [0, 0], sizes = [16, 64], strides = [1, 1]} : vector<16x256xf32> to vector<16x64xf32>
    %118 = arith.mulf %117, %1 : vector<16x64xf32>
    %119 = vector.extract_strided_slice %116 {offsets = [0, 64], sizes = [16, 64], strides = [1, 1]} : vector<16x256xf32> to vector<16x64xf32>
    %120 = arith.mulf %119, %2 : vector<16x64xf32>
    %121 = arith.addf %118, %120 : vector<16x64xf32>
    %122 = vector.extract_strided_slice %116 {offsets = [0, 128], sizes = [16, 32], strides = [1, 1]} : vector<16x256xf32> to vector<16x32xf32>
    %123 = arith.mulf %122, %3 : vector<16x32xf32>
    %124 = vector.extract_strided_slice %116 {offsets = [0, 160], sizes = [16, 32], strides = [1, 1]} : vector<16x256xf32> to vector<16x32xf32>
    %125 = arith.mulf %124, %4 : vector<16x32xf32>
    %126 = arith.addf %123, %125 : vector<16x32xf32>
    %127 = vector.extract_strided_slice %116 {offsets = [0, 192], sizes = [16, 32], strides = [1, 1]} : vector<16x256xf32> to vector<16x32xf32>
    %128 = vector.extract_strided_slice %121 {offsets = [0, 0], sizes = [16, 16], strides = [1, 1]} : vector<16x64xf32> to vector<16x16xf32>
    %129 = vector.extract_strided_slice %121 {offsets = [0, 16], sizes = [16, 16], strides = [1, 1]} : vector<16x64xf32> to vector<16x16xf32>
    %130 = vector.extract_strided_slice %121 {offsets = [0, 32], sizes = [16, 16], strides = [1, 1]} : vector<16x64xf32> to vector<16x16xf32>
    %131 = vector.extract_strided_slice %121 {offsets = [0, 48], sizes = [16, 16], strides = [1, 1]} : vector<16x64xf32> to vector<16x16xf32>
    %132 = tpu.concatenate %128, %129, %130, %131 in 0 : vector<16x16xf32>, vector<16x16xf32>, vector<16x16xf32>, vector<16x16xf32> -> vector<64x16xf32>
    %133 = vector.extract_strided_slice %126 {offsets = [0, 0], sizes = [16, 16], strides = [1, 1]} : vector<16x32xf32> to vector<16x16xf32>
    %134 = vector.extract_strided_slice %126 {offsets = [0, 0], sizes = [16, 16], strides = [1, 1]} : vector<16x32xf32> to vector<16x16xf32>
    %135 = vector.extract_strided_slice %126 {offsets = [0, 16], sizes = [16, 16], strides = [1, 1]} : vector<16x32xf32> to vector<16x16xf32>
    %136 = vector.extract_strided_slice %126 {offsets = [0, 16], sizes = [16, 16], strides = [1, 1]} : vector<16x32xf32> to vector<16x16xf32>
    %137 = tpu.concatenate %133, %134, %135, %136 in 0 : vector<16x16xf32>, vector<16x16xf32>, vector<16x16xf32>, vector<16x16xf32> -> vector<64x16xf32>
    %138 = vector.extract_strided_slice %127 {offsets = [0, 0], sizes = [16, 16], strides = [1, 1]} : vector<16x32xf32> to vector<16x16xf32>
    %139 = vector.extract_strided_slice %127 {offsets = [0, 0], sizes = [16, 16], strides = [1, 1]} : vector<16x32xf32> to vector<16x16xf32>
    %140 = vector.extract_strided_slice %127 {offsets = [0, 16], sizes = [16, 16], strides = [1, 1]} : vector<16x32xf32> to vector<16x16xf32>
    %141 = vector.extract_strided_slice %127 {offsets = [0, 16], sizes = [16, 16], strides = [1, 1]} : vector<16x32xf32> to vector<16x16xf32>
    %142 = tpu.concatenate %138, %139, %140, %141 in 0 : vector<16x16xf32>, vector<16x16xf32>, vector<16x16xf32>, vector<16x16xf32> -> vector<64x16xf32>
    "tpu.trace_start"() <{level = 10 : i32, message = "qd,kd->qk"}> : () -> ()
    %cst_53 = arith.constant dense<0.000000e+00> : vector<64x64xf32>
    %143 = tpu.matmul %132, %137, %cst_53 {dimension_numbers = #tpu.dot_dimension_numbers<[1], [1], [0], [0], [0, 0, 1, 0], [], []>, precision = #tpu.contract_precision<fp32>} : vector<64x16xf32>, vector<64x16xf32>, vector<64x64xf32> -> vector<64x64xf32>
    "tpu.trace_stop"() : () -> ()
    %144 = arith.addf %143, %5 : vector<64x64xf32>
    %cst_54 = arith.constant dense<0xFF800000> : vector<64xf32>
    %145 = vector.multi_reduction <maximumf>, %144, %cst_54 [1] : vector<64x64xf32> to vector<64xf32>
    %146 = vector.shape_cast %145 : vector<64xf32> to vector<64x1xf32>
    %147 = vector.broadcast %146 : vector<64x1xf32> to vector<64x64xf32>
    %148 = arith.subf %144, %147 : vector<64x64xf32>
    %149 = math.exp %148 : vector<64x64xf32>
    %cst_55 = arith.constant dense<0.000000e+00> : vector<64xf32>
    %150 = vector.multi_reduction <add>, %149, %cst_55 [1] : vector<64x64xf32> to vector<64xf32>
    %151 = vector.shape_cast %150 : vector<64xf32> to vector<64x1xf32>
    %152 = vector.broadcast %151 : vector<64x1xf32> to vector<64x64xf32>
    %153 = arith.divf %149, %152 : vector<64x64xf32>
    %cst_56 = arith.constant dense<0.000000e+00> : vector<64x16xf32>
    %154 = tpu.matmul %153, %142, %cst_56 {dimension_numbers = #tpu.dot_dimension_numbers<[1], [0], [0], [1], [0, 0, 1, 1], [], []>, precision = #tpu.contract_precision<fp32>} : vector<64x64xf32>, vector<64x16xf32>, vector<64x16xf32> -> vector<64x16xf32>
    %155 = vector.extract_strided_slice %154 {offsets = [0, 0], sizes = [16, 16], strides = [1, 1]} : vector<64x16xf32> to vector<16x16xf32>
    %156 = vector.extract_strided_slice %154 {offsets = [16, 0], sizes = [16, 16], strides = [1, 1]} : vector<64x16xf32> to vector<16x16xf32>
    %157 = vector.extract_strided_slice %154 {offsets = [32, 0], sizes = [16, 16], strides = [1, 1]} : vector<64x16xf32> to vector<16x16xf32>
    %158 = vector.extract_strided_slice %154 {offsets = [48, 0], sizes = [16, 16], strides = [1, 1]} : vector<64x16xf32> to vector<16x16xf32>
    %159 = tpu.concatenate %155, %156, %157, %158 in 1 : vector<16x16xf32>, vector<16x16xf32>, vector<16x16xf32>, vector<16x16xf32> -> vector<16x64xf32>
    %c1_57 = arith.constant 1 : index
    %c0_58 = arith.constant 0 : index
    %c0_59 = arith.constant 0 : index
    %160 = vector.load %arg9[%c1_57, %c0_58, %c0_59] : memref<2x64x64xf32, #tpu.memory_space<vmem>>, vector<1x64x64xf32>
    %161 = vector.shape_cast %160 : vector<1x64x64xf32> to vector<64x64xf32>
    %cst_60 = arith.constant dense<0.000000e+00> : vector<16x64xf32>
    %162 = tpu.matmul %159, %161, %cst_60 {dimension_numbers = #tpu.dot_dimension_numbers<[1], [0], [0], [1], [0, 0, 1, 1], [], []>, precision = #tpu.contract_precision<fp32>} : vector<16x64xf32>, vector<64x64xf32>, vector<16x64xf32> -> vector<16x64xf32>
    %163 = arith.addf %99, %162 : vector<16x64xf32>
    %c1_61 = arith.constant 1 : index
    %c0_62 = arith.constant 0 : index
    %c0_63 = arith.constant 0 : index
    %164 = vector.load %arg7[%c1_61, %c0_62, %c0_63] : memref<2x1x64xf32, #tpu.memory_space<vmem>>, vector<1x1x64xf32>
    %165 = vector.shape_cast %164 : vector<1x1x64xf32> to vector<1x64xf32>
    %166 = arith.mulf %163, %163 : vector<16x64xf32>
    %cst_64 = arith.constant dense<0.000000e+00> : vector<16xf32>
    %167 = vector.multi_reduction <add>, %166, %cst_64 [1] : vector<16x64xf32> to vector<16xf32>
    %168 = vector.shape_cast %167 : vector<16xf32> to vector<16x1xf32>
    %cst_65 = arith.constant 6.400000e+01 : f32
    %169 = vector.broadcast %cst_65 : f32 to vector<16x1xf32>
    %170 = arith.divf %168, %169 : vector<16x1xf32>
    %cst_66 = arith.constant 9.99999974E-6 : f32
    %171 = vector.broadcast %cst_66 : f32 to vector<16x1xf32>
    %172 = arith.addf %170, %171 : vector<16x1xf32>
    %173 = math.rsqrt %172 : vector<16x1xf32>
    %174 = vector.broadcast %173 : vector<16x1xf32> to vector<16x64xf32>
    %175 = arith.mulf %163, %174 : vector<16x64xf32>
    %176 = vector.broadcast %165 : vector<1x64xf32> to vector<16x64xf32>
    %177 = arith.mulf %175, %176 : vector<16x64xf32>
    %c1_67 = arith.constant 1 : index
    %c0_68 = arith.constant 0 : index
    %c0_69 = arith.constant 0 : index
    %178 = vector.load %arg10[%c1_67, %c0_68, %c0_69] : memref<2x64x256xf32, #tpu.memory_space<vmem>>, vector<1x64x256xf32>
    %179 = vector.shape_cast %178 : vector<1x64x256xf32> to vector<64x256xf32>
    %cst_70 = arith.constant dense<0.000000e+00> : vector<16x256xf32>
    %180 = tpu.matmul %177, %179, %cst_70 {dimension_numbers = #tpu.dot_dimension_numbers<[1], [0], [0], [1], [0, 0, 1, 1], [], []>, precision = #tpu.contract_precision<fp32>} : vector<16x64xf32>, vector<64x256xf32>, vector<16x256xf32> -> vector<16x256xf32>
    %181 = vector.extract_strided_slice %180 {offsets = [0, 0], sizes = [16, 128], strides = [1, 1]} : vector<16x256xf32> to vector<16x128xf32>
    %182 = vector.extract_strided_slice %180 {offsets = [0, 128], sizes = [16, 128], strides = [1, 1]} : vector<16x256xf32> to vector<16x128xf32>
    %cst_71 = arith.constant 0.000000e+00 : f32
    %183 = vector.broadcast %cst_71 : f32 to vector<16x128xf32>
    %184 = arith.subf %183, %181 : vector<16x128xf32>
    %185 = math.exp %184 : vector<16x128xf32>
    %cst_72 = arith.constant 1.000000e+00 : f32
    %186 = vector.broadcast %cst_72 : f32 to vector<16x128xf32>
    %187 = arith.addf %186, %185 : vector<16x128xf32>
    %188 = arith.divf %181, %187 : vector<16x128xf32>
    %189 = arith.mulf %188, %182 : vector<16x128xf32>
    %c1_73 = arith.constant 1 : index
    %c0_74 = arith.constant 0 : index
    %c0_75 = arith.constant 0 : index
    %190 = vector.load %arg11[%c1_73, %c0_74, %c0_75] : memref<2x128x64xf32, #tpu.memory_space<vmem>>, vector<1x128x64xf32>
    %191 = vector.shape_cast %190 : vector<1x128x64xf32> to vector<128x64xf32>
    %cst_76 = arith.constant dense<0.000000e+00> : vector<16x64xf32>
    %192 = tpu.matmul %189, %191, %cst_76 {dimension_numbers = #tpu.dot_dimension_numbers<[1], [0], [0], [1], [0, 0, 1, 1], [], []>, precision = #tpu.contract_precision<fp32>} : vector<16x128xf32>, vector<128x64xf32>, vector<16x64xf32> -> vector<16x64xf32>
    %193 = arith.addf %163, %192 : vector<16x64xf32>
    %c0_77 = arith.constant 0 : index
    %c0_78 = arith.constant 0 : index
    %194 = vector.load %arg12[%c0_77, %c0_78] : memref<1x64xf32, #tpu.memory_space<vmem>>, vector<1x64xf32>
    %195 = arith.mulf %193, %193 : vector<16x64xf32>
    %cst_79 = arith.constant dense<0.000000e+00> : vector<16xf32>
    %196 = vector.multi_reduction <add>, %195, %cst_79 [1] : vector<16x64xf32> to vector<16xf32>
    %197 = vector.shape_cast %196 : vector<16xf32> to vector<16x1xf32>
    %cst_80 = arith.constant 6.400000e+01 : f32
    %198 = vector.broadcast %cst_80 : f32 to vector<16x1xf32>
    %199 = arith.divf %197, %198 : vector<16x1xf32>
    %cst_81 = arith.constant 9.99999974E-6 : f32
    %200 = vector.broadcast %cst_81 : f32 to vector<16x1xf32>
    %201 = arith.addf %199, %200 : vector<16x1xf32>
    %202 = math.rsqrt %201 : vector<16x1xf32>
    %203 = vector.broadcast %202 : vector<16x1xf32> to vector<16x64xf32>
    %204 = arith.mulf %193, %203 : vector<16x64xf32>
    %205 = vector.broadcast %194 : vector<1x64xf32> to vector<16x64xf32>
    %206 = arith.mulf %204, %205 : vector<16x64xf32>
    %c0_82 = arith.constant 0 : index
    %c0_83 = arith.constant 0 : index
    %207 = vector.load %arg13[%c0_82, %c0_83] : memref<64x128xf32, #tpu.memory_space<vmem>>, vector<64x128xf32>
    %cst_84 = arith.constant dense<0.000000e+00> : vector<16x128xf32>
    %208 = tpu.matmul %206, %207, %cst_84 {dimension_numbers = #tpu.dot_dimension_numbers<[1], [0], [0], [1], [0, 0, 1, 1], [], []>, precision = #tpu.contract_precision<fp32>} : vector<16x64xf32>, vector<64x128xf32>, vector<16x128xf32> -> vector<16x128xf32>
    %c0_85 = arith.constant 0 : index
    %c0_86 = arith.constant 0 : index
    %209 = vector.load %arg14[%c0_85, %c0_86] : memref<16x128xf32, #tpu.memory_space<vmem>>, vector<16x128xf32>
    tpu.vector_store %arg14[%c0_85, %c0_86], %208 {strides = array<i32>} : memref<16x128xf32, #tpu.memory_space<vmem>>, vector<16x128xf32>,
    return
  }
}

</mosaic_0001>

<bundles_post_ra>
// kernel: tpu_custom_call.1
= control target key start
LH: loop header
LB: loop body
LE: loop exit
PB: predicated region body
PF: predicated region fallthrough
CT: control target
= control target key end

     0   :  { %19 = vsyncpa [#allocation3], 0  ;;  %s17744_s0 = inlined_call_operand.vmem [shape: f32[16,64], index: 0, kind: input, shape index: {}]   ;;  %s17745_s1 = inlined_call_operand.hbm [shape: f32[16,64], index: 1, kind: input, shape index: {}]   ;;  %s17746_s2 = inlined_call_operand.hbm [shape: f32[16,64], index: 2, kind: input, shape index: {}]   ;;  %s17747_s3 = inlined_call_operand.hbm [shape: f32[16,32], index: 3, kind: input, shape index: {}]   ;;  %s17748_s4 = inlined_call_operand.hbm [shape: f32[16,32], index: 4, kind: input, shape index: {}]   ;;  %s17749_s5 = inlined_call_operand.hbm [shape: f32[64,64], index: 5, kind: input, shape index: {}]   ;;  %s17750_s6 = inlined_call_operand.vmem [shape: f32[2,1,64], index: 6, kind: input, shape index: {}]   ;;  %s17751_s7 = inlined_call_operand.vmem [shape: f32[2,1,64], index: 7, kind: input, shape index: {}]   ;;  %s17752_s8 = inlined_call_operand.vmem [shape: f32[2,64,256], index: 8, kind: input, shape index: {}]   ;;  %s17753_s9 = inlined_call_operand.vmem [shape: f32[2,64,64], index: 9, kind: input, shape index: {}]   ;;  %s17754_s10 = inlined_call_operand.hbm [shape: f32[2,64,256], index: 10, kind: input, shape index: {}]   ;;  %s17755_s11 = inlined_call_operand.vmem [shape: f32[2,128,64], index: 11, kind: input, shape index: {}]   ;;  %s17756_s12 = inlined_call_operand.vmem [shape: f32[1,64], index: 12, kind: input, shape index: {}]   ;;  %s17757_s13 = inlined_call_operand.hbm [shape: f32[64,128], index: 13, kind: input, shape index: {}]   ;;  %s17758_s14 = inlined_call_operand.hbm [shape: f32[16,128], index: 14, kind: output, shape index: {}]  }
   0x1   :  { %20 = vsyncpa [#allocation6], 0 }
   0x2   :  { %21 = vsyncpa [#allocation9], 0 }
   0x3   :  { %22 = vsyncpa [#allocation12], 0 }
   0x4   :  { %23 = vsyncpa [#allocation4], 0  ;;  %s14567_s29 = smov [#allocation5]   ;;  %s14568_s15 = smov [#allocation8]  }
   0x5   :  { %s43_s30 = sshll.u32 %s14567_s29, 4  ;;  %s67_s16 = sshll.u32 %s14568_s15, 4  ;;  %s44_s30 = int_to_ptr.vmem [resolvable:$true] %s43_s30  ;;  %s14661_s16 = int_to_ptr.vmem [resolvable:$true] %s67_s16 }
   0x6   :  { %s14381_s19 = scalar_lea.hbm %s17746_s2, 256 }
   0x7   :  { %p14382_p0 = scmp.ne.s32.totalorder %s17746_s2, %s14381_s19  ;;  %p14385_p1 = scmp.lt.u32.totalorder %s14381_s19, %s17746_s2 }
   0x9   :  { %p14387_p2 = pnand %p14385_p1, %p14382_p0 }
   0xb   :  { %14390 = shalt.err (!%p14387_p2)
}
   0xc   :  { %s14391_s24 = scalar_lea.vmem %s44_s30, 256  ;;  %p14396_p4 = scmp.lt.s32.totalorder %s44_s30, %s44_s30 }
   0xd   :  { %p14392_p3 = scmp.ne.s32.totalorder %s44_s30, %s14391_s24  ;;  %p14397_p5 = scmp.lt.s32.totalorder %s14391_s24, %s14391_s24 }
   0xf   :  { %p14398_p6 = por %p14397_p5, %p14396_p4 }
  0x11   :  { %p14399_p7 = pnand %p14398_p6, %p14392_p3 }
  0x13   :  { %14402 = shalt.err (!%p14399_p7)
}
  0x14   :  { %s14569_s25 = smov 128   ;;  %s14570_s26 = smov 8  }
  0x15   :  { %49 = dma.hbm_to_vmem [thread:$0]  %s17746_s2, 256, %s44_s30, [#allocation6], %s14569_s25, %s14569_s25, %s14570_s26  }
  0x16   :  { %s14403_s17 = scalar_lea.hbm %s17748_s4, 256 }
  0x17   :  { %p14404_p8 = scmp.ne.s32.totalorder %s17748_s4, %s14403_s17  ;;  %p14407_p9 = scmp.lt.u32.totalorder %s14403_s17, %s17748_s4 }
  0x19   :  { %p14409_p10 = pnand %p14407_p9, %p14404_p8 }
  0x1b   :  { %14412 = shalt.err (!%p14409_p10)
}
  0x1c   :  { %s14413_s22 = scalar_lea.vmem %s14661_s16, 256  ;;  %p14418_p12 = scmp.lt.s32.totalorder %s14661_s16, %s14661_s16 }
  0x1d   :  { %p14414_p11 = scmp.ne.s32.totalorder %s14661_s16, %s14413_s22  ;;  %p14419_p13 = scmp.lt.s32.totalorder %s14413_s22, %s14413_s22 }
  0x1f   :  { %p14420_p0 = por %p14419_p13, %p14418_p12 }
  0x21   :  { %p14421_p1 = pnand %p14420_p0, %p14414_p11 }
  0x23   :  { %14424 = shalt.err (!%p14421_p1)
}
  0x24   :  { %73 = dma.hbm_to_vmem [thread:$0]  %s17748_s4, 256, %s14661_s16, [#allocation9], %s14569_s25, %s14569_s25, %s14570_s26  }
  0x25   :  { %s14571_s23 = smov [#allocation11]   ;;  %s14425_s29 = scalar_lea.hbm %s17754_s10, 4096 }
  0x26   :  { %s99_s24 = sshll.u32 %s14571_s23, 4  ;;  %p14426_p2 = scmp.ne.s32.totalorder %s17754_s10, %s14425_s29  ;;  %s100_s24 = int_to_ptr.vmem [resolvable:$true] %s99_s24 }
  0x27   :  { %p14429_p3 = scmp.lt.u32.totalorder %s14425_s29, %s17754_s10 }
  0x29   :  { %p14431_p4 = pnand %p14429_p3, %p14426_p2 }
  0x2b   :  { %14434 = shalt.err (!%p14431_p4)
}
  0x2c   :  { %s14435_s20 = scalar_lea.vmem %s100_s24, 4096  ;;  %p14440_p6 = scmp.lt.s32.totalorder %s100_s24, %s100_s24 }
  0x2d   :  { %p14436_p5 = scmp.ne.s32.totalorder %s100_s24, %s14435_s20  ;;  %p14441_p7 = scmp.lt.s32.totalorder %s14435_s20, %s14435_s20 }
  0x2f   :  { %p14442_p8 = por %p14441_p7, %p14440_p6 }
  0x31   :  { %p14443_p9 = pnand %p14442_p8, %p14436_p5 }
  0x33   :  { %14446 = shalt.err (!%p14443_p9)
}
  0x34   :  { %s14572_s4 = smov 256   ;;  %s14573_s16 = smov 16  }
  0x35   :  { %105 = dma.hbm_to_vmem [thread:$0]  %s17754_s10, 4096, %s100_s24, [#allocation12], %s14572_s4, %s14572_s4, %s14573_s16  }
  0x36   :  { %s14574_s2 = smov [#allocation2]   ;;  %s14575_s23 = smov [#allocation7]  }
  0x37   :  { %s31_s30 = sshll.u32 %s14574_s2, 4  ;;  %s55_s27 = sshll.u32 %s14575_s23, 4  ;;  %s32_s30 = int_to_ptr.vmem [resolvable:$true] %s31_s30  ;;  %s56_s27 = int_to_ptr.vmem [resolvable:$true] %s55_s27 }
  0x38   :  { %s14447_s15 = scalar_lea.hbm %s17745_s1, 256 }
  0x39   :  { %p14448_p10 = scmp.ne.s32.totalorder %s17745_s1, %s14447_s15  ;;  %p14451_p11 = scmp.lt.u32.totalorder %s14447_s15, %s17745_s1 }
  0x3b   :  { %p14453_p12 = pnand %p14451_p11, %p14448_p10 }
  0x3d   :  { %14456 = shalt.err (!%p14453_p12)
}
  0x3e   :  { %s14457_s10 = scalar_lea.vmem %s32_s30, 256  ;;  %p14462_p0 = scmp.lt.s32.totalorder %s32_s30, %s32_s30 }
  0x3f   :  { %p14458_p13 = scmp.ne.s32.totalorder %s32_s30, %s14457_s10  ;;  %p14463_p1 = scmp.lt.s32.totalorder %s14457_s10, %s14457_s10 }
  0x41   :  { %p14464_p2 = por %p14463_p1, %p14462_p0 }
  0x43   :  { %p14465_p3 = pnand %p14464_p2, %p14458_p13 }
  0x45   :  { %14468 = shalt.err (!%p14465_p3)
}
  0x46   :  { %37 = dma.hbm_to_vmem [thread:$0]  %s17745_s1, 256, %s32_s30, [#allocation3], %s14569_s25, %s14569_s25, %s14570_s26  }
  0x47   :  { %s14469_s2 = scalar_lea.hbm %s17747_s3, 256 }
  0x48   :  { %p14470_p4 = scmp.ne.s32.totalorder %s17747_s3, %s14469_s2  ;;  %p14473_p5 = scmp.lt.u32.totalorder %s14469_s2, %s17747_s3 }
  0x4a   :  { %p14475_p6 = pnand %p14473_p5, %p14470_p4 }
  0x4c   :  { %14478 = shalt.err (!%p14475_p6)
}
  0x4d   :  { %s14479_s17 = scalar_lea.vmem %s56_s27, 256  ;;  %p14484_p8 = scmp.lt.s32.totalorder %s56_s27, %s56_s27 }
  0x4e   :  { %p14480_p7 = scmp.ne.s32.totalorder %s56_s27, %s14479_s17  ;;  %p14485_p9 = scmp.lt.s32.totalorder %s14479_s17, %s14479_s17 }
  0x50   :  { %p14486_p10 = por %p14485_p9, %p14484_p8 }
  0x52   :  { %p14487_p11 = pnand %p14486_p10, %p14480_p7 }
  0x54   :  { %14490 = shalt.err (!%p14487_p11)
}
  0x55   :  { %61 = dma.hbm_to_vmem [thread:$0]  %s17747_s3, 256, %s56_s27, [#allocation6], %s14569_s25, %s14569_s25, %s14570_s26  }
  0x56   :  { %s14576_s18 = smov [#allocation10]   ;;  %s14577_s20 = smov [#allocation13]  }
  0x57   :  { %s79_s19 = sshll.u32 %s14576_s18, 4  ;;  %s115_s10 = sshll.u32 %s14577_s20, 4  ;;  %s80_s19 = int_to_ptr.vmem [resolvable:$true] %s79_s19  ;;  %s116_s10 = int_to_ptr.vmem [resolvable:$true] %s115_s10 }
  0x58   :  { %s14491_s21 = scalar_lea.hbm %s17749_s5, 1024 }
  0x59   :  { %p14492_p12 = scmp.ne.s32.totalorder %s17749_s5, %s14491_s21  ;;  %p14495_p13 = scmp.lt.u32.totalorder %s14491_s21, %s17749_s5 }
  0x5b   :  { %p14497_p0 = pnand %p14495_p13, %p14492_p12 }
  0x5d   :  { %14500 = shalt.err (!%p14497_p0)
}
  0x5e   :  { %s14501_s3 = scalar_lea.vmem %s80_s19, 1024  ;;  %p14506_p2 = scmp.lt.s32.totalorder %s80_s19, %s80_s19 }
  0x5f   :  { %p14502_p1 = scmp.ne.s32.totalorder %s80_s19, %s14501_s3  ;;  %p14507_p3 = scmp.lt.s32.totalorder %s14501_s3, %s14501_s3 }
  0x61   :  { %p14508_p4 = por %p14507_p3, %p14506_p2 }
  0x63   :  { %p14509_p5 = pnand %p14508_p4, %p14502_p1 }
  0x65   :  { %14512 = shalt.err (!%p14509_p5)
}
  0x66   :  { %85 = dma.hbm_to_vmem [thread:$0]  %s17749_s5, 1024, %s80_s19, [#allocation9], %s14569_s25, %s14569_s25, %s14570_s26  }
  0x67   :  { %s14513_s1 = scalar_lea.hbm %s17757_s13, 1024 }
  0x68   :  { %p14514_p6 = scmp.ne.s32.totalorder %s17757_s13, %s14513_s1  ;;  %p14517_p7 = scmp.lt.u32.totalorder %s14513_s1, %s17757_s13 }
  0x6a   :  { %p14519_p8 = pnand %p14517_p7, %p14514_p6 }
  0x6c   :  { %14522 = shalt.err (!%p14519_p8)
}
  0x6d   :  { %s14523_s4 = scalar_lea.vmem %s116_s10, 1024  ;;  %p14528_p10 = scmp.lt.s32.totalorder %s116_s10, %s116_s10 }
  0x6e   :  { %p14524_p9 = scmp.ne.s32.totalorder %s116_s10, %s14523_s4  ;;  %p14529_p11 = scmp.lt.s32.totalorder %s14523_s4, %s14523_s4 }
  0x70   :  { %p14530_p12 = por %p14529_p11, %p14528_p10 }
  0x72   :  { %p14531_p13 = pnand %p14530_p12, %p14524_p9 }
  0x74   :  { %14534 = shalt.err (!%p14531_p13)
}
  0x75   :  { %121 = dma.hbm_to_vmem [thread:$0]  %s17757_s13, 1024, %s116_s10, [#allocation12], %s14569_s25, %s14569_s25, %s14570_s26  }
  0x76   :  { %14557 = dma.done.wait [#allocation3], 256  }
  0x77   :  { %14558 = vsyncadd [#allocation3], 4294967040 }
  0x78   :  { %14559 = dma.done.wait [#allocation6], 512  }
  0x79   :  { %14560 = vsyncadd [#allocation6], 4294966784 }
  0x7a   :  { %14561 = dma.done.wait [#allocation9], 1280  }
  0x7b   :  { %14562 = vsyncadd [#allocation9], 4294966016 }
  0x7c   :  { %14563 = dma.done.wait [#allocation12], 5120  }
  0x7d   :  { %14564 = vsyncadd [#allocation12], 4294962176  ;;  %v14774_v0 = vld [vmem:[%s17744_s0] sm:$0xff]  ;;  %vm164_vm0 = vcmask 523264   ;;  %v14779_v1 = vld [vmem:[%s17744_s0 + $0x8] sm:$0xff]  ;;  %s14579_s24 = smov 32  }
  0x7e   :  { %v162_v2 = vmul.f32 %v14774_v0, %v14774_v0  ;;  %v163_v3 = vmul.f32 %v14779_v1, %v14779_v1  ;;  %v14790_v6 = vld [vmem:[%s17752_s8 + $0x8] sm:$0xff]  ;;  %v14795_v7 = vld [vmem:[%s17752_s8 + $0x18] sm:$0xff]  ;;  %v14802_v10 = vld [vmem:[%s17752_s8] sm:$0xff]  ;;  %s14580_s4 = smov 64   ;;  %s14581_s21 = smov 96   ;;  %vm976_vm1 = vcmask 130048  }
  0x7f   :  { %v210_v8 = vand.u32 4294901760, %v14790_v6  ;;  %v214_v9 = vand.u32 4294901760, %v14795_v7  ;;  %v14807_v11 = vld [vmem:[%s17752_s8 + $0x10] sm:$0xff]  ;;  %v212_v12 = vand.u32 4294901760, %v14802_v10  ;;  %v14834_v18 = vld [vmem:[%s17752_s8 + $0x28] sm:$0xff]  ;;  %v14839_v19 = vld [vmem:[%s17752_s8 + $0x38] sm:$0xff] }
  0x80   :  { %v165_v4 = vsel %vm164_vm0, %v162_v2, 0.0  ;;  %v168_v5 = vsel %vm164_vm0, %v163_v3, 0.0  ;;  %v216_v13 = vand.u32 4294901760, %v14807_v11  ;;  %v218_v22 = vand.u32 4294901760, %v14834_v18  ;;  %v14848_v24 = vld [vmem:[%s17752_s8 + $0x20] sm:$0xff]  ;;  %v14853_v25 = vld [vmem:[%s17752_s8 + $0x30] sm:$0xff] }
  0x81   :  { %166 = vadd.xlane.f32.xlu0 %v165_v4  ;;  %v14814_v14 = vsub.f32 %v14790_v6, %v210_v8  ;;  %v14819_v15 = vsub.f32 %v14795_v7, %v214_v9  ;;  %v14824_v16 = vsub.f32 %v14802_v10, %v212_v12  ;;  %v222_v23 = vand.u32 4294901760, %v14839_v19  ;;  %v14894_v38 = vld [vmem:[%s17752_s8 + $0x48] sm:$0xff]  ;;  %v14901_v43 = vld [vmem:[%s17752_s8 + $0x58] sm:$0xff]  ;;  %v14908_v48 = vld [vmem:[%s17752_s8 + $0x40] sm:$0xff]  ;;  %s14582_s22 = smov 112   ;;  %s14583_s2 = smov 80  }
  0x82   :  { %v14829_v17 = vsub.f32 %v14807_v11, %v216_v13  ;;  %v220_v28 = vand.u32 4294901760, %v14848_v24  ;;  %v224_v29 = vand.u32 4294901760, %v14853_v25  ;;  %v14868_v32 = vsub.f32 %v14834_v18, %v218_v22  ;;  %v14920_v53 = vld [vmem:[%s17752_s8 + $0x50] sm:$0xff]  ;;  %v14932_v58 = vld [vmem:[%s17752_s8 + $0x68] sm:$0xff]  ;;  %s14584_s13 = smov 48  }
  0x83   :  { %v315_v20 = vand.u32 4294901760, %v14814_v14  ;;  %v327_v21 = vand.u32 4294901760, %v14819_v15  ;;  %v321_v26 = vand.u32 4294901760, %v14824_v16  ;;  %v14873_v33 = vsub.f32 %v14839_v19, %v222_v23 }
  0x84   :  { %v333_v27 = vand.u32 4294901760, %v14829_v17  ;;  %v14884_v36 = vsub.f32 %v14848_v24, %v220_v28  ;;  %v14889_v37 = vsub.f32 %v14853_v25, %v224_v29  ;;  %v339_v41 = vand.u32 4294901760, %v14868_v32 }
  0x85   :  { %169 = vadd.xlane.f32.xlu0 %v168_v5  ;;  %v316_v30 = vsub.f32 %v14814_v14, %v315_v20  ;;  %v328_v31 = vsub.f32 %v14819_v15, %v327_v21  ;;  %v322_v34 = vsub.f32 %v14824_v16, %v321_v26  ;;  %v351_v42 = vand.u32 4294901760, %v14873_v33  ;;  %v14947_v5 = vld [vmem:[%s17752_s8 + $0x78] sm:$0xff] }
  0x86   :  { %v334_v35 = vsub.f32 %v14829_v17, %v333_v27  ;;  %v345_v46 = vand.u32 4294901760, %v14884_v36  ;;  %v357_v47 = vand.u32 4294901760, %v14889_v37  ;;  %v340_v50 = vsub.f32 %v14868_v32, %v339_v41 }
  0x87   :  { %v317_v39 = vand.u32 4294901760, %v316_v30  ;;  %v329_v40 = vand.u32 4294901760, %v328_v31  ;;  %v323_v44 = vand.u32 4294901760, %v322_v34  ;;  %v352_v51 = vsub.f32 %v14873_v33, %v351_v42 }
  0x88   :  { %v335_v45 = vand.u32 4294901760, %v334_v35  ;;  %v226_v52 = vand.u32 4294901760, %v14894_v38  ;;  %v346_v55 = vsub.f32 %v14884_v36, %v345_v46  ;;  %v358_v56 = vsub.f32 %v14889_v37, %v357_v47 }
  0x89   :  { %v12518_v49 = vpack.c.bf16 %v329_v40, %v317_v39  ;;  %v230_v57 = vand.u32 4294901760, %v14901_v43  ;;  %v341_v59 = vand.u32 4294901760, %v340_v50  ;;  %v353_v60 = vand.u32 4294901760, %v352_v51 }
  0x8a   :  { %v12520_v54 = vpack.c.bf16 %v335_v45, %v323_v44  ;;  %v14937_v61 = vsub.f32 %v14894_v38, %v226_v52  ;;  %v228_v62 = vand.u32 4294901760, %v14908_v48  ;;  %v347_v63 = vand.u32 4294901760, %v346_v55  ;;  %v14971_v45 = vld [vmem:[%s17752_s8 + $0x60] sm:$0xff] }
  0x8b   :  { %12519 = vmatprep.subr.bf16.mxu0 %v12518_v49  ;;  %v359_v2 = vand.u32 4294901760, %v358_v56  ;;  %v14941_v3 = vsub.f32 %v14901_v43, %v230_v57  ;;  %v232_v4 = vand.u32 4294901760, %v14920_v53  ;;  %v12522_v30 = vpack.c.bf16 %v353_v60, %v341_v59 }
  0x8c   :  { %12521 = vmatpush1.bf16.msra.mxu0 %v12520_v54  ;;  %v363_v31 = vand.u32 4294901760, %v14937_v61  ;;  %v14953_v34 = vsub.f32 %v14908_v48, %v228_v62  ;;  %v234_v35 = vand.u32 4294901760, %v14932_v58  ;;  %v14961_v43 = vpack.c.bf16 %v214_v9, %v210_v8  ;;  %v202_v9 = vld [vmem:[%s17752_s8 + $0x70] sm:$0xff] }
  0x8d   :  { %v12524_v39 = vpack.c.bf16 %v359_v2, %v347_v63  ;;  %v375_v40 = vand.u32 4294901760, %v14941_v3  ;;  %v14966_v44 = vsub.f32 %v14920_v53, %v232_v4  ;;  %12523 = vmatprep.subr.bf16.mxu0 %v12522_v30  ;;  %v14981_v7 = vpack.c.bf16 %v216_v13, %v212_v12 }
  0x8e   :  { %v364_v49 = vsub.f32 %v14937_v61, %v363_v31  ;;  %v369_v6 = vand.u32 4294901760, %v14953_v34  ;;  %v238_v8 = vand.u32 4294901760, %v14947_v5  ;;  %12503 = vmatprep.subr.bf16.mxu1 %v14961_v43  ;;  %v14995_v10 = vsub.f32 %v14932_v58, %v234_v35 }
  0x8f   :  { %v376_v50 = vsub.f32 %v14941_v3, %v375_v40  ;;  %v381_v51 = vand.u32 4294901760, %v14966_v44  ;;  %v15001_v11 = vpack.c.bf16 %v222_v23, %v218_v22  ;;  %12505 = vmatpush1.bf16.msra.mxu1 %v14981_v7  ;;  %v236_v55 = vand.u32 4294901760, %v14971_v45 }
  0x90   :  { %12525 = vmatpush1.bf16.msra.mxu0 %v12524_v39  ;;  %v365_v12 = vand.u32 4294901760, %v364_v49  ;;  %v370_v13 = vsub.f32 %v14953_v34, %v369_v6  ;;  %v15008_v54 = vsub.f32 %v14947_v5, %v238_v8  ;;  %v387_v19 = vand.u32 4294901760, %v14995_v10 }
  0x91   :  { %v377_v56 = vand.u32 4294901760, %v376_v50  ;;  %v382_v18 = vsub.f32 %v14966_v44, %v381_v51  ;;  %12507 = vmatprep.subr.bf16.mxu1 %v15001_v11  ;;  %v240_v22 = vand.u32 4294901760, %v202_v9  ;;  %v15018_v60 = vsub.f32 %v14971_v45, %v236_v55 }
  0x92   :  { %v371_v23 = vand.u32 4294901760, %v370_v13  ;;  %v399_v59 = vand.u32 4294901760, %v15008_v54  ;;  %v15024_v63 = vpack.c.bf16 %v224_v29, %v220_v28  ;;  %v388_v30 = vsub.f32 %v14995_v10, %v387_v19 }
  0x93   :  { %v12526_v2 = vpack.c.bf16 %v377_v56, %v365_v12  ;;  %v383_v5 = vand.u32 4294901760, %v382_v18  ;;  %v15027_v39 = vsub.f32 %v202_v9, %v240_v22  ;;  %v393_v50 = vand.u32 4294901760, %v15018_v60 }
  0x94   :  { %v400_v49 = vsub.f32 %v15008_v54, %v399_v59  ;;  %12509 = vmatpush1.bf16.msra.mxu1 %v15024_v63  ;;  %v389_v13 = vand.u32 4294901760, %v388_v30  ;;  %v17759_v25 = vmov 0.0   ;;  %v15036_v28 = vpack.c.bf16 %v230_v57, %v226_v52 }
  0x95   :  { %12527 = vmatprep.subr.bf16.mxu0 %v12526_v2  ;;  %v12528_v45 = vpack.c.bf16 %v383_v5, %v371_v23  ;;  %v405_v24 = vand.u32 4294901760, %v15027_v39  ;;  %457 = vmatprep.mubr.f32.mxu0 %v17759_v25  ;;  %v394_v9 = vsub.f32 %v15018_v60, %v393_v50  ;;  %v12536_v2 = vpack.c.bf16 %v14829_v17, %v14824_v16 }
  0x96   :  { %v401_v29 = vand.u32 4294901760, %v400_v49  ;;  %290 = vmatprep.mubr.f32.mxu1 %v17759_v25  ;;  %12511 = vmatprep.subr.bf16.mxu1 %v15036_v28  ;;  %v12534_v38 = vpack.c.bf16 %v14819_v15, %v14814_v14  ;;  %v15050_v57 = vpack.c.bf16 %v232_v4, %v228_v62  ;;  %v12538_v5 = vpack.c.bf16 %v14873_v33, %v14868_v32  ;;  %v148_v32 = vld [vmem:[#allocation5 + $0x8] sm:$0xff] }
  0x97   :  { %12529 = vmatpush1.bf16.msra.mxu0 %v12528_v45  ;;  %v406_v12 = vsub.f32 %v15027_v39, %v405_v24  ;;  %v395_v18 = vand.u32 4294901760, %v394_v9  ;;  %v15057_v30 = vpack.c.bf16 %v238_v8, %v234_v35  ;;  %v12540_v49 = vpack.c.bf16 %v14889_v37, %v14884_v36 }
  0x98   :  { %v12530_v56 = vpack.c.bf16 %v401_v29, %v389_v13  ;;  %12513 = vmatpush1.bf16.msra.mxu1 %v15050_v57  ;;  %v15062_v48 = vpack.c.bf16 %v240_v22, %v236_v55  ;;  %v12542_v53 = vpack.c.bf16 %v14941_v3, %v14937_v61  ;;  %v12544_v62 = vpack.c.bf16 %v14966_v44, %v14953_v34  ;;  %v10241_v61 = vld [vmem:[%s17750_s6] ss:$0 sm:$0xff] }
  0x99   :  { %v407_v23 = vand.u32 4294901760, %v406_v12  ;;  %12515 = vmatprep.subr.bf16.mxu1 %v15057_v30  ;;  %v12546_v58 = vpack.c.bf16 %v15008_v54, %v14995_v10  ;;  %v12548_v4 = vpack.c.bf16 %v15027_v39, %v15018_v60  ;;  %v15077_v35 = vpack.c.bf16 %v327_v21, %v315_v20  ;;  %v151_v21 = vld [vmem:[#allocation8] sm:$0xff] }
  0x9a   :  { %12531 = vmatprep.subr.bf16.mxu0 %v12530_v56  ;;  %v15083_v8 = vpack.c.bf16 %v333_v27, %v321_v26  ;;  %v15089_v10 = vpack.c.bf16 %v351_v42, %v339_v41  ;;  %v15095_v14 = vpack.c.bf16 %v357_v47, %v345_v46  ;;  %v15101_v15 = vpack.c.bf16 %v375_v40, %v363_v31  ;;  %v147_v26 = vld [vmem:[#allocation5] sm:$0xff]  ;;  %v152_v27 = vld [vmem:[#allocation8 + $0x8] sm:$0xff] }
  0x9b   :  { %v12532_v52 = vpack.c.bf16 %v407_v23, %v395_v18  ;;  %v15107_v16 = vpack.c.bf16 %v381_v51, %v369_v6  ;;  %v15109_v17 = vpack.c.bf16 %v399_v59, %v387_v19  ;;  %v15111_v20 = vpack.c.bf16 %v405_v24, %v393_v50  ;;  %932 = vrot.lane.b32.xlu1 %v151_v21, %s14579_s24 }
  0x9c   :  { %12517 = vmatpush1.bf16.msra.mxu1 %v15062_v48  ;;  %910 = vrot.lane.b32.xlu0 %v147_v26, %s14580_s4  ;;  %vm2827_vm2 = vcmask 261120   ;;  %vm2830_vm3 = vcmask 392192  }
  0x9d   :  { %12533 = vmatpush1.bf16.msra.mxu0 %v12532_v52 }
  0x9e   :  { %12535 = vmatprep.subr.bf16.mxu0 %v12534_v38 }
  0x9f   :  { %934 = vrot.lane.b32.xlu1 %v152_v27, %s14579_s24 }
  0xa3   :  { %912 = vrot.lane.b32.xlu1 %v148_v32, %s14580_s4  ;;  %v146_v32 = vld [vmem:[#allocation2 + $0x8] sm:$0xff] }
 0x10e   :  { %v167_v33 = vpop.xlane.xlu0 %166 }
 0x10f   :  { %v172_v36 = vmul.f32 0.015625, %v167_v33 }
 0x111   :  { %v174_v37 = vadd.f32 1e-05, %v172_v36 }
 0x112   :  { %v170_v41 = vpop.xlane.xlu0 %169 }
 0x113   :  { %14267 = vrsqrt.f32 %v174_v37  ;;  %v173_v42 = vmul.f32 0.015625, %v170_v41 }
 0x115   :  { %v175_v46 = vadd.f32 1e-05, %v173_v42 }
 0x116   :  { %v15171_v52 = vpop.permute.xlu0 %910 }
 0x117   :  { %14269 = vrsqrt.f32 %v175_v46  ;;  %17792 = vst [vmem:[#allocation20_spill] sm:$0xff] %v15171_v52 }
 0x11d   :  { %v14268_v47 = vpop.eup %14267 }
 0x11e   :  { %v178_v3 = vmul.f32 %v14268_v47, %v14774_v0 }
 0x120   :  { %v186_v31 = vmul.f32 %v10241_v61, %v178_v3 }
 0x121   :  { %v14270_v34 = vpop.eup %14269 }
 0x122   :  { %v205_v40 = vsel %vm164_vm0, %v186_v31, 0  ;;  %v179_v44 = vmul.f32 %v14270_v34, %v14779_v1 }
 0x123   :  { %v291_v6 = vand.u32 4294901760, %v205_v40 }
 0x124   :  { %v187_v51 = vmul.f32 %v10241_v61, %v179_v44 }
 0x125   :  { %459 = vmatmul.mubr.f32.vlgmr.msra.gmra.mrb[0].mxu0 %v291_v6  ;;  %v292_v54 = vsub.f32 %v205_v40, %v291_v6 }
 0x126   :  { %12537 = vmatpush1.bf16.msra.mxu0 %v12536_v2  ;;  %464 = vmatprep.mubr.f32.mxu0 %v17759_v25  ;;  %v208_v55 = vsel %vm164_vm0, %v187_v51, 0 }
 0x127   :  { %12539 = vmatprep.subr.bf16.mxu0 %v12538_v5  ;;  %v293_v19 = vand.u32 4294901760, %v292_v54  ;;  %v302_v22 = vand.u32 4294901760, %v208_v55 }
 0x129   :  { %v294_v59 = vsub.f32 %v292_v54, %v293_v19  ;;  %466 = vmatmul.mubr.f32.gmra.mrb[2].mxu0 %v302_v22  ;;  %v303_v0 = vsub.f32 %v208_v55, %v302_v22 }
 0x12a   :  { %12541 = vmatpush1.bf16.msra.mxu0 %v12540_v49  ;;  %568 = vmatprep.mubr.f32.mxu0 %v17759_v25  ;;  %v149_v49 = vld [vmem:[#allocation7] sm:$0xff] }
 0x12b   :  { %12543 = vmatprep.subr.bf16.mxu0 %v12542_v53  ;;  %v295_v1 = vand.u32 4294901760, %v294_v59  ;;  %v304_v60 = vand.u32 4294901760, %v303_v0 }
 0x12d   :  { %296 = vmatmul.mubr.f32.vlgmr.msra.gmra.mrb[0].mxu1 %v295_v1  ;;  %v305_v39 = vsub.f32 %v303_v0, %v304_v60 }
 0x12e   :  { %12545 = vmatpush1.bf16.msra.mxu0 %v12544_v62  ;;  %301 = vmatprep.mubr.f32.mxu1 %v17759_v25  ;;  %v150_v62 = vld [vmem:[#allocation7 + $0x8] sm:$0xff] }
 0x12f   :  { %12547 = vmatprep.subr.bf16.mxu0 %v12546_v58  ;;  %v306_v50 = vand.u32 4294901760, %v305_v39 }
 0x131   :  { %307 = vmatmul.mubr.f32.gmra.mrb[2].mxu1 %v306_v50 }
 0x132   :  { %12549 = vmatpush1.bf16.msra.mxu0 %v12548_v4 }
 0x133   :  { %12551 = vmatprep.subr.bf16.mxu0 %v14961_v43 }
 0x135   :  { %571 = vmatmul.mubr.f32.vlgmr.msra.gmra.mrb[0].mxu0 %v292_v54 }
 0x136   :  { %12553 = vmatpush1.bf16.msra.mxu0 %v14981_v7  ;;  %576 = vmatprep.mubr.f32.mxu0 %v17759_v25 }
 0x137   :  { %12555 = vmatprep.subr.bf16.mxu0 %v15001_v11 }
 0x139   :  { %579 = vmatmul.mubr.f32.gmra.mrb[2].mxu0 %v303_v0 }
 0x13a   :  { %12557 = vmatpush1.bf16.msra.mxu0 %v15024_v63  ;;  %665 = vmatprep.mubr.f32.mxu0 %v17759_v25 }
 0x13b   :  { %12559 = vmatprep.subr.bf16.mxu0 %v15036_v28 }
 0x13e   :  { %12561 = vmatpush1.bf16.msra.mxu0 %v15050_v57 }
 0x13f   :  { %12563 = vmatprep.subr.bf16.mxu0 %v15057_v30 }
 0x142   :  { %12565 = vmatpush1.bf16.msra.mxu0 %v15062_v48 }
 0x143   :  { %12567 = vmatprep.subr.bf16.mxu0 %v15077_v35 }
 0x145   :  { %669 = vmatmul.mubr.f32.vlgmr.msra.gmra.mrb[0].mxu0 %v293_v19 }
 0x146   :  { %12569 = vmatpush1.bf16.msra.mxu0 %v15083_v8  ;;  %674 = vmatprep.mubr.f32.mxu0 %v17759_v25 }
 0x147   :  { %12571 = vmatprep.subr.bf16.mxu0 %v15089_v10 }
 0x149   :  { %678 = vmatmul.mubr.f32.gmra.mrb[2].mxu0 %v304_v60 }
 0x14a   :  { %12573 = vmatpush1.bf16.msra.mxu0 %v15095_v14  ;;  %796 = vmatprep.mubr.f32.mxu0 %v17759_v25  ;;  %v145_v14 = vld [vmem:[#allocation2] sm:$0xff] }
 0x14b   :  { %12575 = vmatprep.subr.bf16.mxu0 %v15101_v15 }
 0x14e   :  { %12577 = vmatpush1.bf16.msra.mxu0 %v15107_v16 }
 0x14f   :  { %12579 = vmatprep.subr.bf16.mxu0 %v15109_v17 }
 0x152   :  { %12581 = vmatpush1.bf16.msra.mxu0 %v15111_v20 }
 0x153   :  { %12583 = vmatprep.subr.bf16.mxu0 %v14961_v43 }
 0x155   :  { %798 = vmatmul.mubr.f32.vlgmr.msra.gmra.mrb[0].mxu0 %v291_v6 }
 0x156   :  { %12585 = vmatpush1.bf16.msra.mxu0 %v14981_v7  ;;  %803 = vmatprep.mubr.f32.mxu0 %v17759_v25 }
 0x157   :  { %12587 = vmatprep.subr.bf16.mxu0 %v15001_v11 }
 0x159   :  { %805 = vmatmul.mubr.f32.gmra.mrb[2].mxu0 %v302_v22 }
 0x15a   :  { %12589 = vmatpush1.bf16.msra.mxu0 %v15024_v63  ;;  %891 = vmatprep.mubr.f32.mxu0 %v17759_v25  ;;  %v15158_v63 = vpop.permute.xlu1 %932 }
 0x15b   :  { %12591 = vmatprep.subr.bf16.mxu0 %v15036_v28 }
 0x15e   :  { %12593 = vmatpush1.bf16.msra.mxu0 %v15050_v57  ;;  %v15167_v2 = vpop.permute.xlu1 %934 }
 0x15f   :  { %12595 = vmatprep.subr.bf16.mxu0 %v15057_v30 }
 0x162   :  { %12597 = vmatpush1.bf16.msra.mxu0 %v15062_v48  ;;  %v15175_v5 = vpop.permute.xlu1 %912 }
 0x165   :  { %893 = vmatmul.mubr.f32.vlgmr.msra.gmra.mrb[0].mxu0 %v291_v6 }
 0x166   :  { %898 = vmatprep.mubr.f32.mxu0 %v17759_v25 }
 0x169   :  { %900 = vmatmul.mubr.f32.gmra.mrb[2].mxu0 %v302_v22 }
 0x200   :  { %v297_v43 = vpop.f32.mrb[0].mxu1 }
 0x201   :  { %v299_v7 = vpop.f32.mrb[1].mxu1 }
 0x204   :  { %v308_v11 = vpop.f32.mrb[2].mxu1 }
 0x205   :  { %v310_v45 = vpop.f32.mrb[3].mxu1 }
 0x238   :  { %v894_v13 = vpop.f32.mrb[0].mxu0 }
 0x239   :  { %v13942_v24 = vadd.f32 %v894_v13, %v297_v43  ;;  %v896_v29 = vpop.f32.mrb[1].mxu0 }
 0x23a   :  { %v15160_v28 = vadd.f32 %v896_v29, %v299_v7 }
 0x23b   :  { %v916_v57 = vmul.f32 %v13942_v24, %v15171_v52  ;;  %v906_v20 = vmul.f32 %v13942_v24, %v145_v14 }
 0x23c   :  { %v901_v9 = vpop.f32.mrb[2].mxu0  ;;  %v938_v12 = vmul.f32 %v15160_v28, %v15158_v63  ;;  %v928_v48 = vmul.f32 %v15160_v28, %v149_v49 }
 0x23d   :  { %v13944_v56 = vadd.f32 %v901_v9, %v308_v11  ;;  %v903_v18 = vpop.f32.mrb[3].mxu0 }
 0x23e   :  { %v15164_v23 = vadd.f32 %v903_v18, %v310_v45  ;;  %942 = vrot.lane.b32.xlu1 %v938_v12, %s14581_s21 }
 0x23f   :  { %v917_v30 = vmul.f32 %v13944_v56, %v15175_v5  ;;  %v907_v42 = vmul.f32 %v13944_v56, %v146_v32 }
 0x240   :  { %v939_v38 = vmul.f32 %v15164_v23, %v15167_v2  ;;  %v929_v35 = vmul.f32 %v15164_v23, %v150_v62 }
 0x242   :  { %944 = vrot.lane.b32.xlu1 %v939_v38, %s14581_s21 }
 0x246   :  { %920 = vrot.lane.b32.xlu1 %v916_v57, %s14580_s4 }
 0x24a   :  { %922 = vrot.lane.b32.xlu1 %v917_v30, %s14580_s4 }
 0x2b0   :  { %v943_v53 = vpop.permute.xlu1 %942 }
 0x2b1   :  { %v948_v58 = vadd.f32 %v943_v53, %v928_v48 }
 0x2b3   :  { %v993_v4 = vsel %vm976_vm1, %v948_v58, 0  ;;  %966 = vrot.lane.b32.xlu1 %v948_v58, %s14582_s22 }
 0x2b4   :  { %v1002_v8 = vand.u32 4294901760, %v993_v4  ;;  %v945_v10 = vpop.permute.xlu1 %944 }
 0x2b5   :  { %v949_v15 = vadd.f32 %v945_v10, %v929_v35 }
 0x2b6   :  { %v1156_v16 = vsub.f32 %v993_v4, %v1002_v8 }
 0x2b7   :  { %v995_v17 = vsel %vm976_vm1, %v949_v15, 0  ;;  %968 = vrot.lane.b32.xlu0 %v949_v15, %s14582_s22 }
 0x2b8   :  { %v1157_v21 = vand.u32 4294901760, %v1156_v16  ;;  %v1005_v26 = vand.u32 4294901760, %v995_v17  ;;  %v921_v27 = vpop.permute.xlu1 %920 }
 0x2b9   :  { %v926_v33 = vadd.f32 %v921_v27, %v906_v20 }
 0x2ba   :  { %v15186_v36 = vpack.c.bf16 %v1005_v26, %v1002_v8  ;;  %v1163_v37 = vsub.f32 %v995_v17, %v1005_v26  ;;  %v1158_v46 = vsub.f32 %v1156_v16, %v1157_v21 }
 0x2bb   :  { %v977_v41 = vsel %vm976_vm1, %v926_v33, 0  ;;  %952 = vrot.lane.b32.xlu1 %v926_v33, %s14582_s22 }
 0x2bc   :  { %v1164_v47 = vand.u32 4294901760, %v1163_v37  ;;  %v15190_v61 = vand.u32 4294901760, %v977_v41  ;;  %12599 = vmatprep.subr.bf16.mxu1 %v15186_v36  ;;  %v923_v3 = vpop.permute.xlu1 %922  ;;  %v15193_v31 = vpack.c.bf16 %v1163_v37, %v1156_v16  ;;  %v1159_v51 = vand.u32 4294901760, %v1158_v46 }
 0x2bd   :  { %v927_v34 = vadd.f32 %v923_v3, %v907_v42  ;;  %12601 = vmatpush3.bf16.xpose.msra.mxu1 %v15186_v36 }
 0x2be   :  { %v1165_v40 = vsub.f32 %v1163_v37, %v1164_v47  ;;  %12603 = vmatprep.subr.bf16.mxu1 %v15186_v36  ;;  %v15198_v44 = vsub.f32 %v977_v41, %v15190_v61  ;;  %v15200_v6 = vpack.c.bf16 %v1164_v47, %v1157_v21 }
 0x2bf   :  { %956 = vrot.lane.b32.xlu1 %v926_v33, %s14581_s21  ;;  %954 = vrot.lane.b32.xlu0 %v927_v34, %s14582_s22  ;;  %v979_v50 = vsel %vm976_vm1, %v927_v34, 0 }
 0x2c0   :  { %v1166_v54 = vand.u32 4294901760, %v1165_v40  ;;  %v1076_v55 = vand.u32 4294901760, %v15198_v44  ;;  %v15219_v45 = vand.u32 4294901760, %v979_v50 }
 0x2c2   :  { %v1077_v19 = vsub.f32 %v15198_v44, %v1076_v55  ;;  %v15208_v22 = vpack.c.bf16 %v1166_v54, %v1159_v51  ;;  %v15233_v38 = vsub.f32 %v979_v50, %v15219_v45 }
 0x2c3   :  { %960 = vrot.lane.b32.xlu1 %v926_v33, %s14583_s2  ;;  %958 = vrot.lane.b32.xlu0 %v927_v34, %s14581_s21 }
 0x2c4   :  { %v1078_v59 = vand.u32 4294901760, %v1077_v19  ;;  %v1086_v35 = vand.u32 4294901760, %v15233_v38 }
 0x2c5   :  { %12605 = vmatpush3.bf16.xpose.msra.mxu1 %v15186_v36 }
 0x2c6   :  { %11084 = vmatprep.mubr.f32.mxu1 %v1078_v59  ;;  %v1087_v37 = vsub.f32 %v15233_v38, %v1086_v35 }
 0x2c7   :  { %962 = vrot.lane.b32.xlu0 %v927_v34, %s14583_s2 }
 0x2c8   :  { %v1088_v51 = vand.u32 4294901760, %v1087_v37 }
 0x325   :  { %v967_v0 = vpop.permute.xlu1 %966 }
 0x326   :  { %v997_v1 = vsel %vm976_vm1, %v967_v0, 0 }
 0x327   :  { %v1014_v60 = vand.u32 4294901760, %v997_v1 }
 0x329   :  { %v969_v39 = vpop.permute.xlu0 %968  ;;  %v15217_v7 = vsub.f32 %v997_v1, %v1014_v60 }
 0x32a   :  { %v999_v43 = vsel %vm976_vm1, %v969_v39, 0 }
 0x32b   :  { %v1017_v11 = vand.u32 4294901760, %v999_v43  ;;  %v1185_v12 = vand.u32 4294901760, %v15217_v7 }
 0x32d   :  { %v15221_v13 = vpack.c.bf16 %v1017_v11, %v1014_v60  ;;  %v15223_v24 = vsub.f32 %v999_v43, %v1017_v11  ;;  %v953_v29 = vpop.permute.xlu1 %952  ;;  %v1186_v60 = vsub.f32 %v15217_v7, %v1185_v12 }
 0x32e   :  { %v981_v9 = vsel %vm976_vm1, %v953_v29, 0 }
 0x32f   :  { %v1192_v56 = vand.u32 4294901760, %v15223_v24  ;;  %v15228_v18 = vand.u32 4294901760, %v981_v9  ;;  %12607 = vmatprep.subr.bf16.mxu1 %v15221_v13 }
 0x330   :  { %12609 = vmatpush3.bf16.xpose.msra.mxu1 %v15221_v13 }
 0x331   :  { %v957_v57 = vpop.permute.xlu1 %956  ;;  %12611 = vmatprep.subr.bf16.mxu1 %v15221_v13  ;;  %v955_v30 = vpop.permute.xlu0 %954  ;;  %v15236_v49 = vpack.c.bf16 %v1192_v56, %v1185_v12  ;;  %v15239_v48 = vsub.f32 %v981_v9, %v15228_v18  ;;  %v1193_v1 = vsub.f32 %v15223_v24, %v1192_v56  ;;  %v1187_v56 = vand.u32 4294901760, %v1186_v60 }
 0x332   :  { %v985_v53 = vsel %vm976_vm1, %v957_v57, 0  ;;  %v983_v62 = vsel %vm976_vm1, %v955_v30, 0 }
 0x333   :  { %v15243_v58 = vand.u32 4294901760, %v985_v53  ;;  %v15245_v4 = vand.u32 4294901760, %v983_v62  ;;  %v1096_v15 = vand.u32 4294901760, %v15239_v48  ;;  %v1194_v9 = vand.u32 4294901760, %v1193_v1 }
 0x335   :  { %v15249_v8 = vsub.f32 %v983_v62, %v15245_v4  ;;  %v961_v10 = vpop.permute.xlu1 %960  ;;  %v959_v14 = vpop.permute.xlu0 %958  ;;  %v15253_v16 = vsub.f32 %v985_v53, %v15243_v58  ;;  %v1097_v47 = vsub.f32 %v15239_v48, %v1096_v15  ;;  %v12622_v53 = vpack.c.bf16 %v1194_v9, %v1187_v56 }
 0x336   :  { %v989_v17 = vsel %vm976_vm1, %v961_v10, 0  ;;  %v987_v20 = vsel %vm976_vm1, %v959_v14, 0 }
 0x337   :  { %v15257_v21 = vand.u32 4294901760, %v989_v17  ;;  %v15259_v26 = vand.u32 4294901760, %v987_v20  ;;  %v1106_v27 = vand.u32 4294901760, %v15249_v8  ;;  %v1116_v41 = vand.u32 4294901760, %v15253_v16 }
 0x338   :  { %12613 = vmatpush3.bf16.xpose.msra.mxu1 %v15221_v13  ;;  %v1098_v59 = vand.u32 4294901760, %v1097_v47 }
 0x339   :  { %v15264_v32 = vsub.f32 %v987_v20, %v15259_v26  ;;  %12615 = vmatprep.subr.bf16.mxu1 %v15208_v22  ;;  %v963_v33 = vpop.permute.xlu0 %962  ;;  %v15272_v42 = vsub.f32 %v989_v17, %v15257_v21  ;;  %v1107_v54 = vsub.f32 %v15249_v8, %v1106_v27  ;;  %v1117_v0 = vsub.f32 %v15253_v16, %v1116_v41  ;;  %v160_v17 = vld [vmem:[#allocation10 + $0x38] sm:$0xff]  ;;  %v159_v20 = vld [vmem:[#allocation10 + $0x30] sm:$0xff] }
 0x33a   :  { %v991_v46 = vsel %vm976_vm1, %v963_v33, 0 }
 0x33b   :  { %v15278_v3 = vand.u32 4294901760, %v991_v46  ;;  %v1126_v34 = vand.u32 4294901760, %v15264_v32  ;;  %v1136_v19 = vand.u32 4294901760, %v15272_v42  ;;  %v1108_v50 = vand.u32 4294901760, %v1107_v54 }
 0x33c   :  { %v1118_v11 = vand.u32 4294901760, %v1117_v0 }
 0x33d   :  { %v15282_v40 = vsub.f32 %v991_v46, %v15278_v3  ;;  %v1127_v43 = vsub.f32 %v15264_v32, %v1126_v34  ;;  %v1137_v29 = vsub.f32 %v15272_v42, %v1136_v19 }
 0x33f   :  { %11085 = vmatmul.mubr.f32.vlgmr.msra.gmra.mrb[4].mxu1 %v1088_v51  ;;  %v1146_v39 = vand.u32 4294901760, %v15282_v40  ;;  %v1128_v57 = vand.u32 4294901760, %v1127_v43  ;;  %v1138_v30 = vand.u32 4294901760, %v1137_v29 }
 0x340   :  { %11087 = vmatprep.mubr.f32.mxu1 %v1098_v59  ;;  %12617 = vmatpush3.bf16.xpose.msra.mxu1 %v15208_v22 }
 0x341   :  { %12619 = vmatprep.subr.bf16.mxu1 %v15208_v22  ;;  %v1147_v12 = vsub.f32 %v15282_v40, %v1146_v39 }
 0x343   :  { %11088 = vmatmul.mubr.f32.gmra.mrb[6].mxu1 %v1108_v50  ;;  %v1148_v62 = vand.u32 4294901760, %v1147_v12 }
 0x344   :  { %11090 = vmatprep.mubr.f32.mxu1 %v1118_v11 }
 0x347   :  { %11091 = vmatmul.mubr.f32.gmra.mrb[8].mxu1 %v1128_v57 }
 0x348   :  { %11093 = vmatprep.mubr.f32.mxu1 %v1138_v30  ;;  %12621 = vmatpush3.bf16.xpose.msra.mxu1 %v15208_v22  ;;  %v12638_v22 = vpack.c.bf16 %v15223_v24, %v15217_v7  ;;  %v156_v7 = vld [vmem:[#allocation10 + $0x18] sm:$0xff] }
 0x349   :  { %12623 = vmatprep.subr.bf16.mxu1 %v12622_v53 }
 0x34b   :  { %11094 = vmatmul.mubr.f32.gmra.mrb[10].mxu1 %v1148_v62 }
 0x34c   :  { %11112 = vmatprep.mubr.f32.mxu1 %v15190_v61 }
 0x350   :  { %12625 = vmatpush3.bf16.xpose.msra.mxu1 %v12622_v53 }
 0x351   :  { %12627 = vmatprep.subr.bf16.mxu1 %v12622_v53 }
 0x358   :  { %12629 = vmatpush3.bf16.xpose.msra.mxu1 %v12622_v53 }
 0x359   :  { %12631 = vmatprep.subr.bf16.mxu1 %v15193_v31 }
 0x35f   :  { %11113 = vmatmul.mubr.f32.vlgmr.msra.gmra.mrb[4].mxu1 %v15219_v45 }
 0x360   :  { %11115 = vmatprep.mubr.f32.mxu1 %v15228_v18  ;;  %12633 = vmatpush3.bf16.xpose.msra.mxu1 %v15193_v31 }
 0x361   :  { %12635 = vmatprep.subr.bf16.mxu1 %v15193_v31 }
 0x363   :  { %11116 = vmatmul.mubr.f32.gmra.mrb[6].mxu1 %v15245_v4 }
 0x364   :  { %11118 = vmatprep.mubr.f32.mxu1 %v15243_v58 }
 0x367   :  { %11119 = vmatmul.mubr.f32.gmra.mrb[8].mxu1 %v15259_v26 }
 0x368   :  { %11121 = vmatprep.mubr.f32.mxu1 %v15257_v21  ;;  %12637 = vmatpush3.bf16.xpose.msra.mxu1 %v15193_v31 }
 0x369   :  { %12639 = vmatprep.subr.bf16.mxu1 %v12638_v22 }
 0x36b   :  { %11122 = vmatmul.mubr.f32.gmra.mrb[10].mxu1 %v15278_v3 }
 0x36c   :  { %11140 = vmatprep.mubr.f32.mxu1 %v15198_v44 }
 0x370   :  { %12641 = vmatpush3.bf16.xpose.msra.mxu1 %v12638_v22 }
 0x371   :  { %12643 = vmatprep.subr.bf16.mxu1 %v12638_v22 }
 0x378   :  { %12645 = vmatpush3.bf16.xpose.msra.mxu1 %v12638_v22 }
 0x379   :  { %12647 = vmatprep.subr.bf16.mxu1 %v15186_v36 }
 0x37f   :  { %11141 = vmatmul.mubr.f32.vlgmr.msra.gmra.mrb[4].mxu1 %v15233_v38 }
 0x380   :  { %11143 = vmatprep.mubr.f32.mxu1 %v15239_v48  ;;  %12649 = vmatpush3.bf16.xpose.msra.mxu1 %v15186_v36 }
 0x381   :  { %12651 = vmatprep.subr.bf16.mxu1 %v15186_v36 }
 0x383   :  { %11144 = vmatmul.mubr.f32.gmra.mrb[6].mxu1 %v15249_v8 }
 0x384   :  { %11146 = vmatprep.mubr.f32.mxu1 %v15253_v16 }
 0x387   :  { %11147 = vmatmul.mubr.f32.gmra.mrb[8].mxu1 %v15264_v32 }
 0x388   :  { %11149 = vmatprep.mubr.f32.mxu1 %v15272_v42  ;;  %12653 = vmatpush3.bf16.xpose.msra.mxu1 %v15186_v36 }
 0x389   :  { %12655 = vmatprep.subr.bf16.mxu1 %v15221_v13 }
 0x38b   :  { %11150 = vmatmul.mubr.f32.gmra.mrb[10].mxu1 %v15282_v40 }
 0x38c   :  { %11168 = vmatprep.mubr.f32.mxu1 %v1076_v55 }
 0x390   :  { %12657 = vmatpush3.bf16.xpose.msra.mxu1 %v15221_v13 }
 0x391   :  { %12659 = vmatprep.subr.bf16.mxu1 %v15221_v13 }
 0x398   :  { %12661 = vmatpush3.bf16.xpose.msra.mxu1 %v15221_v13 }
 0x399   :  { %12663 = vmatprep.subr.bf16.mxu1 %v15200_v6 }
 0x39f   :  { %11169 = vmatmul.mubr.f32.vlgmr.msra.gmra.mrb[4].mxu1 %v1086_v35 }
 0x3a0   :  { %11171 = vmatprep.mubr.f32.mxu1 %v1096_v15  ;;  %12665 = vmatpush3.bf16.xpose.msra.mxu1 %v15200_v6 }
 0x3a1   :  { %12667 = vmatprep.subr.bf16.mxu1 %v15200_v6 }
 0x3a3   :  { %11172 = vmatmul.mubr.f32.gmra.mrb[6].mxu1 %v1106_v27 }
 0x3a4   :  { %11174 = vmatprep.mubr.f32.mxu1 %v1116_v41 }
 0x3a7   :  { %11175 = vmatmul.mubr.f32.gmra.mrb[8].mxu1 %v1126_v34 }
 0x3a8   :  { %11177 = vmatprep.mubr.f32.mxu1 %v1136_v19  ;;  %12669 = vmatpush3.bf16.xpose.msra.mxu1 %v15200_v6 }
 0x3a9   :  { %12671 = vmatprep.subr.bf16.mxu1 %v15236_v49 }
 0x3ab   :  { %11178 = vmatmul.mubr.f32.gmra.mrb[10].mxu1 %v1146_v39 }
 0x3ac   :  { %11196 = vmatprep.mubr.f32.mxu1 %v15190_v61 }
 0x3b0   :  { %12673 = vmatpush3.bf16.xpose.msra.mxu1 %v15236_v49 }
 0x3b1   :  { %12675 = vmatprep.subr.bf16.mxu1 %v15236_v49 }
 0x3b8   :  { %12677 = vmatpush3.bf16.xpose.msra.mxu1 %v15236_v49 }
 0x3b9   :  { %12679 = vmatprep.subr.bf16.mxu1 %v15186_v36 }
 0x3bf   :  { %11197 = vmatmul.mubr.f32.vlgmr.msra.gmra.mrb[4].mxu1 %v15219_v45 }
 0x3c0   :  { %11199 = vmatprep.mubr.f32.mxu1 %v15228_v18  ;;  %12681 = vmatpush3.bf16.xpose.msra.mxu1 %v15186_v36 }
 0x3c1   :  { %12683 = vmatprep.subr.bf16.mxu1 %v15186_v36 }
 0x3c3   :  { %11200 = vmatmul.mubr.f32.gmra.mrb[6].mxu1 %v15245_v4 }
 0x3c4   :  { %11202 = vmatprep.mubr.f32.mxu1 %v15243_v58 }
 0x3c7   :  { %11203 = vmatmul.mubr.f32.gmra.mrb[8].mxu1 %v15259_v26 }
 0x3c8   :  { %11205 = vmatprep.mubr.f32.mxu1 %v15257_v21  ;;  %12685 = vmatpush3.bf16.xpose.msra.mxu1 %v15186_v36  ;;  %v154_v36 = vld [vmem:[#allocation10 + $0x8] sm:$0xff] }
 0x3c9   :  { %12687 = vmatprep.subr.bf16.mxu1 %v15221_v13 }
 0x3cb   :  { %11206 = vmatmul.mubr.f32.gmra.mrb[10].mxu1 %v15278_v3 }
 0x3cc   :  { %11224 = vmatprep.mubr.f32.mxu1 %v15190_v61  ;;  %v153_v61 = vld [vmem:[#allocation10] sm:$0xff] }
 0x3d0   :  { %12689 = vmatpush3.bf16.xpose.msra.mxu1 %v15221_v13 }
 0x3d1   :  { %12691 = vmatprep.subr.bf16.mxu1 %v15221_v13 }
 0x3d8   :  { %12693 = vmatpush3.bf16.xpose.msra.mxu1 %v15221_v13  ;;  %v155_v13 = vld [vmem:[#allocation10 + $0x10] sm:$0xff] }
 0x3df   :  { %11225 = vmatmul.mubr.f32.vlgmr.msra.gmra.mrb[4].mxu1 %v15219_v45 }
 0x3e0   :  { %11227 = vmatprep.mubr.f32.mxu1 %v15228_v18 }
 0x3e3   :  { %11228 = vmatmul.mubr.f32.gmra.mrb[6].mxu1 %v15245_v4  ;;  %v157_v4 = vld [vmem:[#allocation10 + $0x20] sm:$0xff] }
 0x3e4   :  { %11230 = vmatprep.mubr.f32.mxu1 %v15243_v58  ;;  %v158_v58 = vld [vmem:[#allocation10 + $0x28] sm:$0xff] }
 0x3e7   :  { %11231 = vmatmul.mubr.f32.gmra.mrb[8].mxu1 %v15259_v26 }
 0x3e8   :  { %11233 = vmatprep.mubr.f32.mxu1 %v15257_v21 }
 0x3eb   :  { %11234 = vmatmul.mubr.f32.gmra.mrb[10].mxu1 %v15278_v3 }
 0x3ec   :  { %3556 = vmatprep.mubr.f32.mxu1 %v17759_v25 }
 0x4b2   :  { %v11226_v31 = vpop.f32.mrb[4].mxu1 }
 0x4b3   :  { %v13946_v44 = vadd.f32 %v11226_v31, %v154_v36  ;;  %v1793_v6 = vpop.f32.mrb[5].mxu1 }
 0x4b4   :  { %v13947_v55 = vadd.f32 %v1793_v6, %v153_v61 }
 0x4b5   :  { %v1842_v45 = vsel %vm164_vm0, %v13946_v44, -inf }
 0x4b6   :  { %1843 = vmax.xlane.f32.xlu0 %v1842_v45  ;;  %v11229_v24 = vpop.f32.mrb[6].mxu1  ;;  %v1839_v18 = vsel %vm164_vm0, %v13947_v55, -inf }
 0x4b7   :  { %v13948_v38 = vadd.f32 %v11229_v24, %v156_v7  ;;  %v1805_v49 = vpop.f32.mrb[7].mxu1  ;;  %1840 = vmax.xlane.f32.xlu1 %v1839_v18 }
 0x4b8   :  { %v13949_v48 = vadd.f32 %v1805_v49, %v155_v13 }
 0x4b9   :  { %v1848_v35 = vsel %vm164_vm0, %v13948_v38, -inf }
 0x4ba   :  { %v11232_v8 = vpop.f32.mrb[8].mxu1  ;;  %v1845_v10 = vsel %vm164_vm0, %v13949_v48, -inf }
 0x4bb   :  { %v13950_v14 = vadd.f32 %v11232_v8, %v158_v58  ;;  %v1817_v15 = vpop.f32.mrb[9].mxu1  ;;  %1846 = vmax.xlane.f32.xlu0 %v1845_v10  ;;  %1849 = vmax.xlane.f32.xlu1 %v1848_v35 }
 0x4bc   :  { %v13951_v16 = vadd.f32 %v1817_v15, %v157_v4 }
 0x4bd   :  { %v1854_v21 = vsel %vm164_vm0, %v13950_v14, -inf }
 0x4be   :  { %v11235_v26 = vpop.f32.mrb[10].mxu1  ;;  %v1851_v27 = vsel %vm164_vm0, %v13951_v16, -inf }
 0x4bf   :  { %v13952_v32 = vadd.f32 %v11235_v26, %v160_v17  ;;  %v1829_v33 = vpop.f32.mrb[11].mxu1  ;;  %1852 = vmax.xlane.f32.xlu0 %v1851_v27  ;;  %1855 = vmax.xlane.f32.xlu1 %v1854_v21 }
 0x4c0   :  { %v13953_v37 = vadd.f32 %v1829_v33, %v159_v20 }
 0x4c1   :  { %v1860_v41 = vsel %vm164_vm0, %v13952_v32, -inf }
 0x4c2   :  { %v1857_v42 = vsel %vm164_vm0, %v13953_v37, -inf }
 0x4c3   :  { %1858 = vmax.xlane.f32.xlu0 %v1857_v42  ;;  %1861 = vmax.xlane.f32.xlu1 %v1860_v41 }
 0x4d4   :  { %974 = vrot.lane.b32.xlu1 %v15164_v23, %s14582_s22 }
 0x4d8   :  { %1929 = vrot.lane.b32.xlu1 %v15164_v23, %s14580_s4 }
 0x4d9   :  { %972 = vrot.lane.b32.xlu0 %v15160_v28, %s14582_s22 }
 0x4dd   :  { %1927 = vrot.lane.b32.xlu0 %v15160_v28, %s14580_s4 }
 0x543   :  { %v1844_v46 = vpop.xlane.xlu0 %1843 }
 0x544   :  { %v1864_v47 = vsub.f32 %v13946_v44, %v1844_v46  ;;  %v1841_v3 = vpop.xlane.xlu1 %1840 }
 0x545   :  { %v1863_v34 = vsub.f32 %v13947_v55, %v1841_v3 }
 0x546   :  { %v1873_v40 = vmul.f32 1.442695, %v1864_v47 }
 0x547   :  { %v1871_v51 = vmul.f32 1.442695, %v1863_v34 }
 0x548   :  { %14271 = vpow2.f32 %v1873_v40  ;;  %v1847_v54 = vpop.xlane.xlu0 %1846  ;;  %v1850_v19 = vpop.xlane.xlu1 %1849 }
 0x549   :  { %14273 = vpow2.f32 %v1871_v51  ;;  %v1865_v59 = vsub.f32 %v13949_v48, %v1847_v54  ;;  %v1866_v0 = vsub.f32 %v13948_v38, %v1850_v19 }
 0x54b   :  { %v1875_v1 = vmul.f32 1.442695, %v1865_v59  ;;  %v1877_v23 = vmul.f32 1.442695, %v1866_v0 }
 0x54c   :  { %v1853_v60 = vpop.xlane.xlu0 %1852  ;;  %v1856_v39 = vpop.xlane.xlu1 %1855 }
 0x54d   :  { %14275 = vpow2.f32 %v1875_v1  ;;  %v1867_v50 = vsub.f32 %v13951_v16, %v1853_v60  ;;  %v1868_v43 = vsub.f32 %v13950_v14, %v1856_v39 }
 0x54e   :  { %14277 = vpow2.f32 %v1877_v23 }
 0x54f   :  { %v1879_v28 = vmul.f32 1.442695, %v1867_v50  ;;  %v1881_v11 = vmul.f32 1.442695, %v1868_v43 }
 0x550   :  { %v1859_v29 = vpop.xlane.xlu0 %1858  ;;  %v1862_v9 = vpop.xlane.xlu1 %1861 }
 0x551   :  { %14279 = vpow2.f32 %v1879_v28  ;;  %v1869_v56 = vsub.f32 %v13953_v37, %v1859_v29  ;;  %v1870_v57 = vsub.f32 %v13952_v32, %v1862_v9 }
 0x552   :  { %v15401_v12 = vpop.eup %14271  ;;  %14281 = vpow2.f32 %v1881_v11 }
 0x553   :  { %v15403_v30 = vpop.eup %14273  ;;  %v1883_v53 = vmul.f32 1.442695, %v1869_v56  ;;  %v1885_v62 = vmul.f32 1.442695, %v1870_v57  ;;  %v1890_v22 = vsel %vm164_vm0, %v15401_v12, 0.0 }
 0x554   :  { %1891 = vadd.xlane.f32.xlu0 %v1890_v22  ;;  %v973_v36 = vpop.permute.xlu0 %972  ;;  %v975_v61 = vpop.permute.xlu1 %974  ;;  %v1887_v31 = vsel %vm164_vm0, %v15403_v30, 0.0 }
 0x555   :  { %14283 = vpow2.f32 %v1883_v53  ;;  %1888 = vadd.xlane.f32.xlu1 %v1887_v31 }
 0x556   :  { %14285 = vpow2.f32 %v1885_v62 }
 0x557   :  { %v15409_v44 = vpop.eup %14275 }
 0x558   :  { %v15411_v6 = vpop.eup %14277  ;;  %v1928_v55 = vpop.permute.xlu0 %1927  ;;  %v1893_v45 = vsel %vm164_vm0, %v15409_v44, 0.0 }
 0x559   :  { %v1930_v7 = vpop.permute.xlu1 %1929  ;;  %v1964_v13 = vand.u32 4294901760, %v1928_v55  ;;  %1894 = vadd.xlane.f32.xlu0 %v1893_v45  ;;  %v1896_v18 = vsel %vm164_vm0, %v15411_v6, 0.0 }
 0x55a   :  { %v1967_v24 = vand.u32 4294901760, %v1930_v7  ;;  %1897 = vadd.xlane.f32.xlu1 %v1896_v18 }
 0x55b   :  { %v15417_v38 = vpop.eup %14279  ;;  %v2118_v49 = vsub.f32 %v1928_v55, %v1964_v13 }
 0x55c   :  { %v15419_v48 = vpack.c.bf16 %v1967_v24, %v1964_v13  ;;  %v2125_v58 = vsub.f32 %v1930_v7, %v1967_v24  ;;  %v15421_v4 = vpop.eup %14281  ;;  %v1899_v35 = vsel %vm164_vm0, %v15417_v38, 0.0 }
 0x55d   :  { %v2119_v8 = vand.u32 4294901760, %v2118_v49  ;;  %1900 = vadd.xlane.f32.xlu0 %v1899_v35  ;;  %v1902_v15 = vsel %vm164_vm0, %v15421_v4, 0.0 }
 0x55e   :  { %v2126_v10 = vand.u32 4294901760, %v2125_v58  ;;  %v15425_v14 = vpack.c.bf16 %v2125_v58, %v2118_v49  ;;  %12695 = vmatprep.subr.bf16.mxu0 %v15419_v48  ;;  %1903 = vadd.xlane.f32.xlu1 %v1902_v15 }
 0x55f   :  { %12697 = vmatpush3.bf16.msra.mxu0 %v15419_v48  ;;  %v15431_v16 = vpop.eup %14283  ;;  %v2120_v17 = vsub.f32 %v2118_v49, %v2119_v8 }
 0x560   :  { %v2127_v20 = vsub.f32 %v2125_v58, %v2126_v10  ;;  %12699 = vmatprep.subr.bf16.mxu0 %v15419_v48  ;;  %v15434_v21 = vpack.c.bf16 %v2126_v10, %v2119_v8  ;;  %v15436_v26 = vpop.eup %14285  ;;  %v1905_v27 = vsel %vm164_vm0, %v15431_v16, 0.0 }
 0x561   :  { %v2121_v32 = vand.u32 4294901760, %v2120_v17  ;;  %1906 = vadd.xlane.f32.xlu0 %v1905_v27  ;;  %v1908_v37 = vsel %vm164_vm0, %v15436_v26, 0.0 }
 0x562   :  { %v2128_v33 = vand.u32 4294901760, %v2127_v20  ;;  %1909 = vadd.xlane.f32.xlu1 %v1908_v37 }
 0x563   :  { %12701 = vmatpush3.bf16.msra.mxu0 %v15419_v48 }
 0x564   :  { %v15443_v41 = vpack.c.bf16 %v2128_v33, %v2121_v32 }
 0x573   :  { %1931 = vrot.lane.b32.xlu1 %v973_v36, %s14580_s4 }
 0x577   :  { %1933 = vrot.lane.b32.xlu0 %v975_v61, %s14580_s4 }
 0x5e1   :  { %v1892_v42 = vpop.xlane.xlu0 %1891 }
 0x5e2   :  { %14287 = vrcp.f32 %v1892_v42  ;;  %v1889_v46 = vpop.xlane.xlu1 %1888 }
 0x5e3   :  { %14289 = vrcp.f32 %v1889_v46 }
 0x5e6   :  { %v1895_v47 = vpop.xlane.xlu0 %1894 }
 0x5e7   :  { %14291 = vrcp.f32 %v1895_v47  ;;  %v1898_v3 = vpop.xlane.xlu1 %1897 }
 0x5e8   :  { %14293 = vrcp.f32 %v1898_v3 }
 0x5ea   :  { %v1901_v34 = vpop.xlane.xlu0 %1900 }
 0x5eb   :  { %14295 = vrcp.f32 %v1901_v34  ;;  %v1904_v40 = vpop.xlane.xlu1 %1903 }
 0x5ec   :  { %v14288_v51 = vpop.eup %14287  ;;  %14297 = vrcp.f32 %v1904_v40 }
 0x5ed   :  { %v14290_v54 = vpop.eup %14289  ;;  %v1914_v19 = vmul.f32 %v14288_v51, %v15401_v12 }
 0x5ee   :  { %v1912_v59 = vmul.f32 %v14290_v54, %v15403_v30  ;;  %v1907_v0 = vpop.xlane.xlu0 %1906 }
 0x5ef   :  { %v1943_v1 = vsel %vm164_vm0, %v1914_v19, 0  ;;  %14299 = vrcp.f32 %v1907_v0  ;;  %v1910_v23 = vpop.xlane.xlu1 %1909 }
 0x5f0   :  { %v15450_v60 = vand.u32 4294901760, %v1943_v1  ;;  %14301 = vrcp.f32 %v1910_v23  ;;  %v1940_v39 = vsel %vm164_vm0, %v1912_v59, 0 }
 0x5f1   :  { %v14292_v50 = vpop.eup %14291  ;;  %v15453_v43 = vand.u32 4294901760, %v1940_v39 }
 0x5f2   :  { %v14294_v28 = vpop.eup %14293  ;;  %v15456_v11 = vsub.f32 %v1943_v1, %v15450_v60  ;;  %v1916_v29 = vmul.f32 %v14292_v50, %v15409_v44  ;;  %v1934_v9 = vpop.permute.xlu0 %1933 }
 0x5f3   :  { %v1918_v56 = vmul.f32 %v14294_v28, %v15411_v6  ;;  %v1979_v57 = vand.u32 4294901760, %v1934_v9  ;;  %v1932_v12 = vpop.permute.xlu1 %1931  ;;  %v15461_v30 = vsub.f32 %v1940_v39, %v15453_v43 }
 0x5f4   :  { %v1976_v53 = vand.u32 4294901760, %v1932_v12  ;;  %v1946_v62 = vsel %vm164_vm0, %v1916_v29, 0  ;;  %v2048_v13 = vand.u32 4294901760, %v15456_v11 }
 0x5f5   :  { %v14296_v22 = vpop.eup %14295  ;;  %v15464_v36 = vsub.f32 %v1934_v9, %v1979_v57  ;;  %v2038_v61 = vand.u32 4294901760, %v15461_v30  ;;  %v15467_v31 = vand.u32 4294901760, %v1946_v62  ;;  %v1949_v44 = vsel %vm164_vm0, %v1918_v56, 0 }
 0x5f6   :  { %v14298_v55 = vpop.eup %14297  ;;  %v1920_v6 = vmul.f32 %v14296_v22, %v15417_v38  ;;  %v15471_v7 = vpack.c.bf16 %v1979_v57, %v1976_v53  ;;  %v15473_v45 = vsub.f32 %v1932_v12, %v1976_v53  ;;  %v15486_v38 = vand.u32 4294901760, %v1949_v44 }
 0x5f7   :  { %v1922_v24 = vmul.f32 %v14298_v55, %v15421_v4  ;;  %v2154_v18 = vand.u32 4294901760, %v15464_v36  ;;  %v2039_v49 = vsub.f32 %v15461_v30, %v2038_v61  ;;  %v15482_v58 = vsub.f32 %v1946_v62, %v15467_v31 }
 0x5f8   :  { %v2147_v35 = vand.u32 4294901760, %v15473_v45  ;;  %12703 = vmatprep.subr.bf16.mxu0 %v15471_v7  ;;  %v1952_v15 = vsel %vm164_vm0, %v1920_v6, 0  ;;  %v2049_v27 = vsub.f32 %v15456_v11, %v2048_v13  ;;  %v15497_v32 = vsub.f32 %v1949_v44, %v15486_v38 }
 0x5f9   :  { %v14300_v8 = vpop.eup %14299  ;;  %12705 = vmatpush3.bf16.msra.mxu0 %v15471_v7  ;;  %v2040_v10 = vand.u32 4294901760, %v2039_v49  ;;  %v2058_v4 = vand.u32 4294901760, %v15482_v58  ;;  %v15499_v33 = vand.u32 4294901760, %v1952_v15  ;;  %v2155_v42 = vsub.f32 %v15464_v36, %v2154_v18 }
 0x5fa   :  { %v14302_v17 = vpop.eup %14301  ;;  %v1924_v20 = vmul.f32 %v14300_v8, %v15431_v16  ;;  %12707 = vmatprep.subr.bf16.mxu0 %v15471_v7  ;;  %v1955_v46 = vsel %vm164_vm0, %v1922_v24, 0  ;;  %v2148_v47 = vsub.f32 %v15473_v45, %v2147_v35  ;;  %v2068_v3 = vand.u32 4294901760, %v15497_v32 }
 0x5fb   :  { %v1926_v37 = vmul.f32 %v14302_v17, %v15436_v26  ;;  %11252 = vmatprep.mubr.f32.mxu0 %v2040_v10  ;;  %v2059_v16 = vsub.f32 %v15482_v58, %v2058_v4  ;;  %v15514_v34 = vsub.f32 %v1952_v15, %v15499_v33  ;;  %v15516_v26 = vand.u32 4294901760, %v1955_v46 }
 0x5fc   :  { %v1958_v51 = vsel %vm164_vm0, %v1924_v20, 0  ;;  %v2050_v19 = vand.u32 4294901760, %v2049_v27  ;;  %v2069_v59 = vsub.f32 %v15497_v32, %v2068_v3  ;;  %v2156_v50 = vand.u32 4294901760, %v2155_v42 }
 0x5fd   :  { %12709 = vmatpush3.bf16.msra.mxu0 %v15471_v7  ;;  %v2060_v40 = vand.u32 4294901760, %v2059_v16  ;;  %v1961_v54 = vsel %vm164_vm0, %v1926_v37, 0  ;;  %v2078_v0 = vand.u32 4294901760, %v15514_v34  ;;  %v15527_v1 = vsub.f32 %v1955_v46, %v15516_v26 }
 0x5fe   :  { %12711 = vmatprep.subr.bf16.mxu0 %v15443_v41  ;;  %v15529_v23 = vand.u32 4294901760, %v1958_v51  ;;  %v15531_v39 = vand.u32 4294901760, %v1961_v54  ;;  %v2149_v28 = vand.u32 4294901760, %v2148_v47  ;;  %v2070_v12 = vand.u32 4294901760, %v2069_v59 }
 0x5ff   :  { %v2079_v29 = vsub.f32 %v15514_v34, %v2078_v0  ;;  %v2088_v9 = vand.u32 4294901760, %v15527_v1 }
 0x600   :  { %11253 = vmatmul.mubr.f32.vlgmr.msra.gmra.mrb[4].mxu0 %v2050_v19  ;;  %v15539_v56 = vsub.f32 %v1958_v51, %v15529_v23  ;;  %v15542_v57 = vsub.f32 %v1961_v54, %v15531_v39  ;;  %v12718_v55 = vpack.c.bf16 %v2156_v50, %v2149_v28 }
 0x601   :  { %11255 = vmatprep.mubr.f32.mxu0 %v2060_v40  ;;  %12713 = vmatpush3.bf16.msra.mxu0 %v15443_v41  ;;  %v2080_v53 = vand.u32 4294901760, %v2079_v29  ;;  %v2089_v62 = vsub.f32 %v15527_v1, %v2088_v9 }
 0x602   :  { %12715 = vmatprep.subr.bf16.mxu0 %v15443_v41  ;;  %v2098_v22 = vand.u32 4294901760, %v15539_v56  ;;  %v2108_v44 = vand.u32 4294901760, %v15542_v57 }
 0x603   :  { %v2090_v24 = vand.u32 4294901760, %v2089_v62 }
 0x604   :  { %11256 = vmatmul.mubr.f32.gmra.mrb[6].mxu0 %v2070_v12  ;;  %v2099_v6 = vsub.f32 %v15539_v56, %v2098_v22  ;;  %v2109_v49 = vsub.f32 %v15542_v57, %v2108_v44 }
 0x605   :  { %11258 = vmatprep.mubr.f32.mxu0 %v2080_v53  ;;  %12717 = vmatpush3.bf16.msra.mxu0 %v15443_v41  ;;  %v12734_v41 = vpack.c.bf16 %v15464_v36, %v15473_v45  ;;  %v2836_v36 = vld [vmem:[%s17753_s9 + $0x18] sm:$0xff] }
 0x606   :  { %12719 = vmatprep.subr.bf16.mxu0 %v12718_v55  ;;  %v2100_v8 = vand.u32 4294901760, %v2099_v6  ;;  %v2110_v10 = vand.u32 4294901760, %v2109_v49 }
 0x608   :  { %11259 = vmatmul.mubr.f32.gmra.mrb[8].mxu0 %v2090_v24 }
 0x609   :  { %11261 = vmatprep.mubr.f32.mxu0 %v2100_v8  ;;  %12721 = vmatpush3.bf16.msra.mxu0 %v12718_v55 }
 0x60a   :  { %12723 = vmatprep.subr.bf16.mxu0 %v12718_v55 }
 0x60c   :  { %11262 = vmatmul.mubr.f32.gmra.mrb[10].mxu0 %v2110_v10 }
 0x60d   :  { %12725 = vmatpush3.bf16.msra.mxu0 %v12718_v55  ;;  %11280 = vmatprep.mubr.f32.mxu0 %v15453_v43 }
 0x60e   :  { %12727 = vmatprep.subr.bf16.mxu0 %v15425_v14 }
 0x610   :  { %11281 = vmatmul.mubr.f32.vlgmr.msra.gmra.mrb[4].mxu0 %v15450_v60 }
 0x611   :  { %11283 = vmatprep.mubr.f32.mxu0 %v15467_v31  ;;  %12729 = vmatpush3.bf16.msra.mxu0 %v15425_v14 }
 0x612   :  { %12731 = vmatprep.subr.bf16.mxu0 %v15425_v14 }
 0x614   :  { %11284 = vmatmul.mubr.f32.gmra.mrb[6].mxu0 %v15486_v38 }
 0x615   :  { %11286 = vmatprep.mubr.f32.mxu0 %v15499_v33  ;;  %12733 = vmatpush3.bf16.msra.mxu0 %v15425_v14  ;;  %v12766_v14 = vpack.c.bf16 %v2154_v18, %v2147_v35  ;;  %v2837_v18 = vld [vmem:[%s17753_s9 + $0x20] sm:$0xff] }
 0x616   :  { %12735 = vmatprep.subr.bf16.mxu0 %v12734_v41 }
 0x618   :  { %11287 = vmatmul.mubr.f32.gmra.mrb[8].mxu0 %v15516_v26 }
 0x619   :  { %11289 = vmatprep.mubr.f32.mxu0 %v15529_v23  ;;  %12737 = vmatpush3.bf16.msra.mxu0 %v12734_v41 }
 0x61a   :  { %12739 = vmatprep.subr.bf16.mxu0 %v12734_v41 }
 0x61c   :  { %11290 = vmatmul.mubr.f32.gmra.mrb[10].mxu0 %v15531_v39 }
 0x61d   :  { %12741 = vmatpush3.bf16.msra.mxu0 %v12734_v41  ;;  %11308 = vmatprep.mubr.f32.mxu0 %v15461_v30  ;;  %v2835_v30 = vld [vmem:[%s17753_s9 + $0x10] sm:$0xff] }
 0x61e   :  { %12743 = vmatprep.subr.bf16.mxu0 %v15419_v48 }
 0x620   :  { %11309 = vmatmul.mubr.f32.vlgmr.msra.gmra.mrb[4].mxu0 %v15456_v11 }
 0x621   :  { %11311 = vmatprep.mubr.f32.mxu0 %v15482_v58  ;;  %12745 = vmatpush3.bf16.msra.mxu0 %v15419_v48  ;;  %v2838_v58 = vld [vmem:[%s17753_s9 + $0x28] sm:$0xff] }
 0x622   :  { %12747 = vmatprep.subr.bf16.mxu0 %v15419_v48 }
 0x624   :  { %11312 = vmatmul.mubr.f32.gmra.mrb[6].mxu0 %v15497_v32  ;;  %v2839_v32 = vld [vmem:[%s17753_s9 + $0x30] sm:$0xff] }
 0x625   :  { %11314 = vmatprep.mubr.f32.mxu0 %v15514_v34  ;;  %12749 = vmatpush3.bf16.msra.mxu0 %v15419_v48  ;;  %v2866_v42 = vand.u32 4294901760, %v2839_v32 }
 0x626   :  { %12751 = vmatprep.subr.bf16.mxu0 %v15471_v7 }
 0x627   :  { %v2984_v55 = vsub.f32 %v2839_v32, %v2866_v42 }
 0x628   :  { %11315 = vmatmul.mubr.f32.gmra.mrb[8].mxu0 %v15527_v1 }
 0x629   :  { %11317 = vmatprep.mubr.f32.mxu0 %v15539_v56  ;;  %12753 = vmatpush3.bf16.msra.mxu0 %v15471_v7  ;;  %v2985_v10 = vand.u32 4294901760, %v2984_v55 }
 0x62a   :  { %12755 = vmatprep.subr.bf16.mxu0 %v15471_v7 }
 0x62c   :  { %11318 = vmatmul.mubr.f32.gmra.mrb[10].mxu0 %v15542_v57 }
 0x62d   :  { %12757 = vmatpush3.bf16.msra.mxu0 %v15471_v7  ;;  %11336 = vmatprep.mubr.f32.mxu0 %v2038_v61 }
 0x62e   :  { %12759 = vmatprep.subr.bf16.mxu0 %v15434_v21 }
 0x630   :  { %11337 = vmatmul.mubr.f32.vlgmr.msra.gmra.mrb[4].mxu0 %v2048_v13 }
 0x631   :  { %11339 = vmatprep.mubr.f32.mxu0 %v2058_v4  ;;  %12761 = vmatpush3.bf16.msra.mxu0 %v15434_v21  ;;  %v2863_v4 = vand.u32 4294901760, %v2838_v58 }
 0x632   :  { %12763 = vmatprep.subr.bf16.mxu0 %v15434_v21 }
 0x634   :  { %11340 = vmatmul.mubr.f32.gmra.mrb[6].mxu0 %v2068_v3 }
 0x635   :  { %11342 = vmatprep.mubr.f32.mxu0 %v2078_v0  ;;  %12765 = vmatpush3.bf16.msra.mxu0 %v15434_v21  ;;  %v2834_v21 = vld [vmem:[%s17753_s9 + $0x8] sm:$0xff] }
 0x636   :  { %12767 = vmatprep.subr.bf16.mxu0 %v12766_v14 }
 0x638   :  { %11343 = vmatmul.mubr.f32.gmra.mrb[8].mxu0 %v2088_v9  ;;  %v2977_v9 = vsub.f32 %v2838_v58, %v2863_v4 }
 0x639   :  { %11345 = vmatprep.mubr.f32.mxu0 %v2098_v22  ;;  %12769 = vmatpush3.bf16.msra.mxu0 %v12766_v14 }
 0x63a   :  { %12771 = vmatprep.subr.bf16.mxu0 %v12766_v14  ;;  %v2978_v53 = vand.u32 4294901760, %v2977_v9 }
 0x63c   :  { %11346 = vmatmul.mubr.f32.gmra.mrb[10].mxu0 %v2108_v44  ;;  %v2979_v44 = vsub.f32 %v2977_v9, %v2978_v53 }
 0x63d   :  { %12773 = vmatpush3.bf16.msra.mxu0 %v12766_v14  ;;  %11364 = vmatprep.mubr.f32.mxu0 %v15453_v43 }
 0x63e   :  { %12775 = vmatprep.subr.bf16.mxu0 %v15419_v48  ;;  %v2980_v8 = vand.u32 4294901760, %v2979_v44 }
 0x640   :  { %11365 = vmatmul.mubr.f32.vlgmr.msra.gmra.mrb[4].mxu0 %v15450_v60 }
 0x641   :  { %11367 = vmatprep.mubr.f32.mxu0 %v15467_v31  ;;  %12777 = vmatpush3.bf16.msra.mxu0 %v15419_v48 }
 0x642   :  { %12779 = vmatprep.subr.bf16.mxu0 %v15419_v48 }
 0x644   :  { %11368 = vmatmul.mubr.f32.gmra.mrb[6].mxu0 %v15486_v38 }
 0x645   :  { %11370 = vmatprep.mubr.f32.mxu0 %v15499_v33  ;;  %12781 = vmatpush3.bf16.msra.mxu0 %v15419_v48  ;;  %v2833_v48 = vld [vmem:[%s17753_s9] sm:$0xff] }
 0x646   :  { %12783 = vmatprep.subr.bf16.mxu0 %v15471_v7 }
 0x648   :  { %11371 = vmatmul.mubr.f32.gmra.mrb[8].mxu0 %v15516_v26 }
 0x649   :  { %11373 = vmatprep.mubr.f32.mxu0 %v15529_v23  ;;  %12785 = vmatpush3.bf16.msra.mxu0 %v15471_v7 }
 0x64a   :  { %12787 = vmatprep.subr.bf16.mxu0 %v15471_v7 }
 0x64c   :  { %11374 = vmatmul.mubr.f32.gmra.mrb[10].mxu0 %v15531_v39 }
 0x64d   :  { %12789 = vmatpush3.bf16.msra.mxu0 %v15471_v7  ;;  %11392 = vmatprep.mubr.f32.mxu0 %v15453_v43  ;;  %v2851_v43 = vand.u32 4294901760, %v2834_v21  ;;  %v2857_v7 = vand.u32 4294901760, %v2836_v36 }
 0x64f   :  { %v2949_v27 = vsub.f32 %v2834_v21, %v2851_v43  ;;  %v2963_v54 = vsub.f32 %v2836_v36, %v2857_v7 }
 0x650   :  { %11393 = vmatmul.mubr.f32.vlgmr.msra.gmra.mrb[4].mxu0 %v15450_v60  ;;  %v2848_v60 = vand.u32 4294901760, %v2833_v48 }
 0x651   :  { %11395 = vmatprep.mubr.f32.mxu0 %v15467_v31  ;;  %v2854_v31 = vand.u32 4294901760, %v2835_v30  ;;  %v2950_v47 = vand.u32 4294901760, %v2949_v27 }
 0x652   :  { %v15637_v11 = vpack.c.bf16 %v2851_v43, %v2848_v60  ;;  %v2942_v20 = vsub.f32 %v2833_v48, %v2848_v60  ;;  %v2986_v48 = vsub.f32 %v2984_v55, %v2985_v10 }
 0x653   :  { %v15651_v13 = vpack.c.bf16 %v2857_v7, %v2854_v31  ;;  %v2951_v40 = vsub.f32 %v2949_v27, %v2950_v47  ;;  %v2956_v51 = vsub.f32 %v2835_v30, %v2854_v31 }
 0x654   :  { %11396 = vmatmul.mubr.f32.gmra.mrb[6].mxu0 %v15486_v38  ;;  %12791 = vmatprep.subr.bf16.mxu0 %v15637_v11  ;;  %v2860_v38 = vand.u32 4294901760, %v2837_v18  ;;  %v2943_v46 = vand.u32 4294901760, %v2942_v20  ;;  %v2987_v60 = vand.u32 4294901760, %v2986_v48  ;;  %v12822_v36 = vpack.c.bf16 %v2949_v27, %v2942_v20 }
 0x655   :  { %11398 = vmatprep.mubr.f32.mxu0 %v15499_v33  ;;  %12793 = vmatpush3.bf16.msra.mxu0 %v15637_v11  ;;  %v2840_v33 = vld [vmem:[%s17753_s9 + $0x38] sm:$0xff]  ;;  %v2952_v0 = vand.u32 4294901760, %v2951_v40  ;;  %v2957_v1 = vand.u32 4294901760, %v2956_v51  ;;  %v12826_v31 = vpack.c.bf16 %v2963_v54, %v2956_v51 }
 0x656   :  { %12795 = vmatprep.subr.bf16.mxu0 %v15651_v13  ;;  %v15663_v17 = vpack.c.bf16 %v2863_v4, %v2860_v38  ;;  %v2869_v16 = vand.u32 4294901760, %v2840_v33  ;;  %v2970_v29 = vsub.f32 %v2837_v18, %v2860_v38  ;;  %v12854_v58 = vpack.c.bf16 %v2950_v47, %v2943_v46 }
 0x657   :  { %v2958_v28 = vsub.f32 %v2956_v51, %v2957_v1 }
 0x658   :  { %11399 = vmatmul.mubr.f32.gmra.mrb[8].mxu0 %v15516_v26  ;;  %v15675_v34 = vpack.c.bf16 %v2869_v16, %v2866_v42  ;;  %v2944_v26 = vsub.f32 %v2942_v20, %v2943_v46  ;;  %v2971_v12 = vand.u32 4294901760, %v2970_v29  ;;  %v2991_v6 = vsub.f32 %v2840_v33, %v2869_v16 }
 0x659   :  { %11401 = vmatprep.mubr.f32.mxu0 %v15529_v23  ;;  %12797 = vmatpush3.bf16.msra.mxu0 %v15651_v13  ;;  %v2959_v57 = vand.u32 4294901760, %v2958_v28  ;;  %v12830_v7 = vpack.c.bf16 %v2977_v9, %v2970_v29 }
 0x65a   :  { %12799 = vmatprep.subr.bf16.mxu0 %v15663_v17  ;;  %v2945_v59 = vand.u32 4294901760, %v2944_v26  ;;  %v2972_v22 = vsub.f32 %v2970_v29, %v2971_v12  ;;  %v2992_v41 = vand.u32 4294901760, %v2991_v6  ;;  %v12834_v18 = vpack.c.bf16 %v2991_v6, %v2984_v55  ;;  %v14367_v29 = vld [vmem:[%s17744_s0 + $0x8] sm:$0xff]  ;;  %v3454_v55 = vld [vmem:[#allocation11] sm:$0xff] }
 0x65b   :  { %v15683_v38 = vpack.c.bf16 %v2978_v53, %v2971_v12  ;;  %v3455_v53 = vld [vmem:[#allocation11 + $0x8] sm:$0xff] }
 0x65c   :  { %11402 = vmatmul.mubr.f32.gmra.mrb[10].mxu0 %v15531_v39  ;;  %v2964_v39 = vand.u32 4294901760, %v2963_v54  ;;  %v12806_v50 = vpack.c.bf16 %v2952_v0, %v2945_v59  ;;  %v2973_v49 = vand.u32 4294901760, %v2972_v22  ;;  %v2993_v21 = vsub.f32 %v2991_v6, %v2992_v41  ;;  %v3456_v6 = vld [vmem:[#allocation11 + $0x10] sm:$0xff] }
 0x65d   :  { %12801 = vmatpush3.bf16.msra.mxu0 %v15663_v17  ;;  %v15685_v4 = vpack.c.bf16 %v2992_v41, %v2985_v10  ;;  %v3476_v22 = vand.u32 4294901760, %v3455_v53  ;;  %v3459_v41 = vld [vmem:[#allocation11 + $0x28] sm:$0xff] }
 0x65e   :  { %12803 = vmatprep.subr.bf16.mxu0 %v15675_v34  ;;  %v2965_v56 = vsub.f32 %v2963_v54, %v2964_v39  ;;  %v12814_v14 = vpack.c.bf16 %v2980_v8, %v2973_v49  ;;  %v2994_v43 = vand.u32 4294901760, %v2993_v21  ;;  %v3482_v49 = vand.u32 4294901760, %v3456_v6 }
 0x65f   :  { %v3484_v48 = vand.u32 4294901760, %v3459_v41 }
 0x660   :  { %v2966_v62 = vand.u32 4294901760, %v2965_v56  ;;  %v12818_v30 = vpack.c.bf16 %v2994_v43, %v2987_v60  ;;  %v3458_v60 = vld [vmem:[#allocation11 + $0x20] sm:$0xff]  ;;  %v3460_v43 = vld [vmem:[#allocation11 + $0x30] sm:$0xff] }
 0x661   :  { %12805 = vmatpush3.bf16.msra.mxu0 %v15675_v34 }
 0x662   :  { %12807 = vmatprep.subr.bf16.mxu0 %v12806_v50  ;;  %v12810_v24 = vpack.c.bf16 %v2966_v62, %v2959_v57  ;;  %v3457_v62 = vld [vmem:[#allocation11 + $0x18] sm:$0xff] }
 0x663   :  { %v3480_v44 = vand.u32 4294901760, %v3457_v62 }
 0x665   :  { %v15735_v8 = vpack.c.bf16 %v3480_v44, %v3476_v22 }
 0x667   :  { %12887 = vmatprep.subr.bf16.mxu1 %v15735_v8 }
 0x723   :  { %v15645_v61 = vpop.f32.mrb[4].mxu0 }
 0x724   :  { %v15648_v45 = vpop.f32.mrb[5].mxu0 }
 0x727   :  { %v11397_v35 = vpop.f32.mrb[6].mxu0 }
 0x728   :  { %2805 = vrot.lane.b32.xlu0 %v11397_v35, %s14573_s16  ;;  %v2767_v15 = vpop.f32.mrb[7].mxu0  ;;  %v15681_v35 = vpack.c.bf16 %v2964_v39, %v2957_v1 }
 0x729   :  { %2803 = vrot.lane.b32.xlu1 %v2767_v15, %s14573_s16 }
 0x72b   :  { %v11400_v37 = vpop.f32.mrb[8].mxu0 }
 0x72c   :  { %2813 = vrot.lane.b32.xlu0 %v11400_v37, %s14579_s24  ;;  %v2779_v3 = vpop.f32.mrb[9].mxu0 }
 0x72d   :  { %2811 = vrot.lane.b32.xlu1 %v2779_v3, %s14579_s24 }
 0x72f   :  { %v11403_v19 = vpop.f32.mrb[10].mxu0 }
 0x730   :  { %2821 = vrot.lane.b32.xlu0 %v11403_v19, %s14584_s13  ;;  %v2791_v23 = vpop.f32.mrb[11].mxu0 }
 0x731   :  { %2819 = vrot.lane.b32.xlu1 %v2791_v23, %s14584_s13 }
 0x79a   :  { %v2806_v15 = vpop.permute.xlu0 %2805 }
 0x79b   :  { %v2804_v32 = vpop.permute.xlu1 %2803  ;;  %v2826_v42 = vsel %vm976_vm1, %v15645_v61, %v2806_v15  ;;  %v3464_v15 = vld [vmem:[#allocation11 + $0x50] sm:$0xff] }
 0x79c   :  { %v2825_v20 = vsel %vm976_vm1, %v15648_v45, %v2804_v32  ;;  %v15746_v32 = vsub.f32 %v3455_v53, %v3476_v22 }
 0x79e   :  { %v2814_v33 = vpop.permute.xlu0 %2813 }
 0x79f   :  { %v2812_v37 = vpop.permute.xlu1 %2811  ;;  %v2829_v27 = vsel %vm2827_vm2, %v2826_v42, %v2814_v33  ;;  %v15748_v33 = vsub.f32 %v3457_v62, %v3480_v44  ;;  %v15752_v42 = vsub.f32 %v3456_v6, %v3482_v49 }
 0x7a0   :  { %v2828_v46 = vsel %vm2827_vm2, %v2825_v20, %v2812_v37  ;;  %v3467_v20 = vld [vmem:[#allocation11 + $0x68] sm:$0xff] }
 0x7a2   :  { %v2822_v16 = vpop.permute.xlu0 %2821 }
 0x7a3   :  { %v2832_v47 = vsel %vm2830_vm3, %v2829_v27, %v2822_v16  ;;  %v2820_v3 = vpop.permute.xlu1 %2819  ;;  %v3469_v27 = vld [vmem:[#allocation11 + $0x78] sm:$0xff]  ;;  %v3466_v16 = vld [vmem:[#allocation11 + $0x60] sm:$0xff] }
 0x7a4   :  { %v2845_v26 = vsel %vm164_vm0, %v2832_v47, 0  ;;  %v2831_v40 = vsel %vm2830_vm3, %v2828_v46, %v2820_v3  ;;  %v15755_v46 = vsub.f32 %v3459_v41, %v3484_v48 }
 0x7a5   :  { %v2930_v51 = vand.u32 4294901760, %v2845_v26  ;;  %v2842_v54 = vsel %vm164_vm0, %v2831_v40, 0  ;;  %v3468_v40 = vld [vmem:[#allocation11 + $0x70] sm:$0xff] }
 0x7a6   :  { %v2920_v19 = vand.u32 4294901760, %v2842_v54  ;;  %v3605_v6 = vand.u32 4294901760, %v15755_v46 }
 0x7a7   :  { %v2931_v61 = vsub.f32 %v2845_v26, %v2930_v51 }
 0x7a8   :  { %v2921_v59 = vsub.f32 %v2842_v54, %v2920_v19 }
 0x7a9   :  { %v2932_v0 = vand.u32 4294901760, %v2931_v61 }
 0x7aa   :  { %v2922_v45 = vand.u32 4294901760, %v2921_v59 }
 0x7ab   :  { %v2933_v1 = vsub.f32 %v2931_v61, %v2932_v0 }
 0x7ac   :  { %v2923_v23 = vsub.f32 %v2921_v59, %v2922_v45 }
 0x7ad   :  { %v2934_v28 = vand.u32 4294901760, %v2933_v1  ;;  %v3502_v1 = vand.u32 4294901760, %v3466_v16 }
 0x7ae   :  { %v2924_v39 = vand.u32 4294901760, %v2923_v23 }
 0x7b0   :  { %11420 = vmatprep.mubr.f32.mxu0 %v2924_v39  ;;  %v3506_v39 = vand.u32 4294901760, %v3468_v40 }
 0x7b1   :  { %11421 = vmatmul.mubr.f32.vlgmr.msra.gmra.mrb[12].mxu0 %v2934_v28  ;;  %v17764_v28 = vand.u32 4294901760, %v15746_v32 }
 0x7b2   :  { %12809 = vmatpush3.bf16.msra.mxu0 %v12806_v50  ;;  %11439 = vmatprep.mubr.f32.mxu0 %v2920_v19  ;;  %v15788_v53 = vsub.f32 %v3468_v40, %v3506_v39 }
 0x7b3   :  { %12811 = vmatprep.subr.bf16.mxu0 %v12810_v24  ;;  %v3582_v62 = vsub.f32 %v15746_v32, %v17764_v28 }
 0x7b6   :  { %12813 = vmatpush3.bf16.msra.mxu0 %v12810_v24  ;;  %v3478_v24 = vand.u32 4294901760, %v3454_v55 }
 0x7b7   :  { %12815 = vmatprep.subr.bf16.mxu0 %v12814_v14 }
 0x7b8   :  { %v15737_v10 = vpack.c.bf16 %v3482_v49, %v3478_v24  ;;  %v15750_v37 = vsub.f32 %v3454_v55, %v3478_v24  ;;  %v17761_v55 = vand.u32 4294901760, %v15752_v42 }
 0x7ba   :  { %12817 = vmatpush3.bf16.msra.mxu0 %v12814_v14  ;;  %v3461_v14 = vld [vmem:[#allocation11 + $0x38] sm:$0xff]  ;;  %12889 = vmatpush1.bf16.msra.mxu1 %v15737_v10  ;;  %v17762_v44 = vand.u32 4294901760, %v15750_v37 }
 0x7bb   :  { %12819 = vmatprep.subr.bf16.mxu0 %v12818_v30  ;;  %v3488_v21 = vand.u32 4294901760, %v3461_v14 }
 0x7bd   :  { %v15757_v47 = vsub.f32 %v3461_v14, %v3488_v21  ;;  %v3583_v14 = vand.u32 4294901760, %v3582_v62 }
 0x7be   :  { %12821 = vmatpush3.bf16.msra.mxu0 %v12818_v30  ;;  %v3486_v30 = vand.u32 4294901760, %v3458_v60 }
 0x7bf   :  { %12823 = vmatprep.subr.bf16.mxu0 %v12822_v36  ;;  %v3617_v24 = vand.u32 4294901760, %v15757_v47 }
 0x7c0   :  { %v15759_v3 = vsub.f32 %v3458_v60, %v3486_v30  ;;  %v3600_v60 = vsub.f32 %v15752_v42, %v17761_v55 }
 0x7c1   :  { %11440 = vmatmul.mubr.f32.vlgmr.msra.gmra.mrb[12].mxu0 %v2930_v51 }
 0x7c2   :  { %12825 = vmatpush3.bf16.msra.mxu0 %v12822_v36  ;;  %11458 = vmatprep.mubr.f32.mxu0 %v2921_v59  ;;  %v3490_v36 = vand.u32 4294901760, %v3460_v43  ;;  %v3498_v59 = vand.u32 4294901760, %v3464_v15  ;;  %v3611_v49 = vand.u32 4294901760, %v15759_v3 }
 0x7c3   :  { %12827 = vmatprep.subr.bf16.mxu0 %v12826_v31 }
 0x7c4   :  { %v15761_v26 = vsub.f32 %v3460_v43, %v3490_v36  ;;  %v3606_v43 = vsub.f32 %v15755_v46, %v3605_v6 }
 0x7c6   :  { %12829 = vmatpush3.bf16.msra.mxu0 %v12826_v31  ;;  %v15741_v31 = vpack.c.bf16 %v3488_v21, %v3484_v48  ;;  %v3623_v41 = vand.u32 4294901760, %v15761_v26  ;;  %v3588_v21 = vsub.f32 %v15750_v37, %v17762_v44  ;;  %v12924_v52 = vpack.c.bf16 %v15761_v26, %v15759_v3 }
 0x7c7   :  { %12831 = vmatprep.subr.bf16.mxu0 %v12830_v7 }
 0x7c8   :  { %12891 = vmatprep.subr.bf16.mxu1 %v15741_v31 }
 0x7ca   :  { %12833 = vmatpush3.bf16.msra.mxu0 %v12830_v7  ;;  %v15743_v7 = vpack.c.bf16 %v3490_v36, %v3486_v30  ;;  %v3618_v30 = vsub.f32 %v15757_v47, %v3617_v24  ;;  %v3612_v36 = vsub.f32 %v15759_v3, %v3611_v49  ;;  %v17796_v3 = vand.u32 4294901760, %v15752_v42 }
 0x7cb   :  { %12835 = vmatprep.subr.bf16.mxu0 %v12834_v18 }
 0x7cc   :  { %12893 = vmatpush1.bf16.msra.mxu1 %v15743_v7 }
 0x7ce   :  { %12837 = vmatpush3.bf16.msra.mxu0 %v12834_v18  ;;  %v3463_v18 = vld [vmem:[#allocation11 + $0x48] sm:$0xff] }
 0x7cf   :  { %12839 = vmatprep.subr.bf16.mxu0 %v15637_v11 }
 0x7d1   :  { %11459 = vmatmul.mubr.f32.vlgmr.msra.gmra.mrb[12].mxu0 %v2931_v61 }
 0x7d2   :  { %12841 = vmatpush3.bf16.msra.mxu0 %v15637_v11  ;;  %11477 = vmatprep.mubr.f32.mxu0 %v2922_v45  ;;  %v3504_v45 = vand.u32 4294901760, %v3469_v27 }
 0x7d3   :  { %12843 = vmatprep.subr.bf16.mxu0 %v15651_v13 }
 0x7d6   :  { %12845 = vmatpush3.bf16.msra.mxu0 %v15651_v13 }
 0x7d7   :  { %12847 = vmatprep.subr.bf16.mxu0 %v15663_v17 }
 0x7da   :  { %12849 = vmatpush3.bf16.msra.mxu0 %v15663_v17 }
 0x7db   :  { %12851 = vmatprep.subr.bf16.mxu0 %v15675_v34 }
 0x7de   :  { %12853 = vmatpush3.bf16.msra.mxu0 %v15675_v34 }
 0x7df   :  { %12855 = vmatprep.subr.bf16.mxu0 %v12854_v58 }
 0x7e1   :  { %11478 = vmatmul.mubr.f32.vlgmr.msra.gmra.mrb[12].mxu0 %v2932_v0  ;;  %v3500_v0 = vand.u32 4294901760, %v3467_v20 }
 0x7e2   :  { %12857 = vmatpush3.bf16.msra.mxu0 %v12854_v58  ;;  %11496 = vmatprep.mubr.f32.mxu0 %v2920_v19  ;;  %v3465_v58 = vld [vmem:[#allocation11 + $0x58] sm:$0xff] }
 0x7e3   :  { %12859 = vmatprep.subr.bf16.mxu0 %v15681_v35 }
 0x7e6   :  { %12861 = vmatpush3.bf16.msra.mxu0 %v15681_v35  ;;  %v3492_v35 = vand.u32 4294901760, %v3463_v18 }
 0x7e7   :  { %12863 = vmatprep.subr.bf16.mxu0 %v15683_v38 }
 0x7e8   :  { %v15765_v54 = vsub.f32 %v3463_v18, %v3492_v35  ;;  %v3624_v18 = vsub.f32 %v15761_v26, %v3623_v41 }
 0x7ea   :  { %12865 = vmatpush3.bf16.msra.mxu0 %v15683_v38  ;;  %v3496_v38 = vand.u32 4294901760, %v3465_v58 }
 0x7eb   :  { %12867 = vmatprep.subr.bf16.mxu0 %v15685_v4 }
 0x7ee   :  { %12869 = vmatpush3.bf16.msra.mxu0 %v15685_v4  ;;  %v3462_v4 = vld [vmem:[#allocation11 + $0x40] sm:$0xff] }
 0x7ef   :  { %12871 = vmatprep.subr.bf16.mxu0 %v15637_v11  ;;  %v3494_v61 = vand.u32 4294901760, %v3462_v4 }
 0x7f1   :  { %11497 = vmatmul.mubr.f32.vlgmr.msra.gmra.mrb[12].mxu0 %v2930_v51  ;;  %v15770_v23 = vsub.f32 %v3462_v4, %v3494_v61  ;;  %v3629_v4 = vand.u32 4294901760, %v15765_v54 }
 0x7f2   :  { %12873 = vmatpush3.bf16.msra.mxu0 %v15637_v11  ;;  %11515 = vmatprep.mubr.f32.mxu0 %v2920_v19  ;;  %v15767_v19 = vsub.f32 %v3465_v58, %v3496_v38 }
 0x7f3   :  { %12875 = vmatprep.subr.bf16.mxu0 %v15651_v13 }
 0x7f6   :  { %12877 = vmatpush3.bf16.msra.mxu0 %v15651_v13  ;;  %v14368_v13 = vld [vmem:[%s17744_s0] sm:$0xff] }
 0x7f7   :  { %12879 = vmatprep.subr.bf16.mxu0 %v15663_v17 }
 0x7fa   :  { %12881 = vmatpush3.bf16.msra.mxu0 %v15663_v17 }
 0x7fb   :  { %12883 = vmatprep.subr.bf16.mxu0 %v15675_v34 }
 0x7fe   :  { %12885 = vmatpush3.bf16.msra.mxu0 %v15675_v34 }
 0x801   :  { %11516 = vmatmul.mubr.f32.vlgmr.msra.gmra.mrb[12].mxu0 %v2930_v51  ;;  %v15763_v51 = vpack.c.bf16 %v3496_v38, %v3492_v35  ;;  %v3589_v35 = vand.u32 4294901760, %v3588_v21  ;;  %v3601_v38 = vand.u32 4294901760, %v3600_v60 }
 0x803   :  { %12895 = vmatprep.subr.bf16.mxu1 %v15763_v51  ;;  %v15816_v40 = vpack.c.bf16 %v3601_v38, %v3589_v35 }
 0x8d4   :  { %v11517_v50 = vpop.f32.mrb[12].mxu0 }
 0x8d5   :  { %v15722_v11 = vadd.f32 %v14367_v29, %v11517_v50  ;;  %v3417_v9 = vpop.f32.mrb[13].mxu0  ;;  %v17763_v50 = vand.u32 4294901760, %v15748_v33  ;;  %v15774_v29 = vpack.c.bf16 %v3498_v59, %v3494_v61  ;;  %v3630_v61 = vsub.f32 %v15765_v54, %v3629_v4 }
 0x8d6   :  { %v15727_v56 = vadd.f32 %v14368_v13, %v3417_v9  ;;  %v15776_v9 = vsub.f32 %v3464_v15, %v3498_v59  ;;  %v15778_v13 = vpack.c.bf16 %v3504_v45, %v3500_v0  ;;  %v3607_v15 = vand.u32 4294901760, %v3606_v43 }
 0x8d7   :  { %v3431_v17 = vmul.f32 %v15722_v11, %v15722_v11  ;;  %12897 = vmatpush1.bf16.msra.mxu1 %v15774_v29  ;;  %v3594_v22 = vsub.f32 %v15748_v33, %v17763_v50  ;;  %v3641_v59 = vand.u32 4294901760, %v15767_v19  ;;  %v3631_v62 = vand.u32 4294901760, %v3630_v61 }
 0x8d8   :  { %v3430_v34 = vmul.f32 %v15727_v56, %v15727_v56  ;;  %12899 = vmatprep.subr.bf16.mxu1 %v15778_v13 }
 0x8d9   :  { %v3435_v57 = vsel %vm164_vm0, %v3431_v17, 0.0  ;;  %v15780_v17 = vsub.f32 %v3467_v20, %v3500_v0  ;;  %v3595_v48 = vand.u32 4294901760, %v3594_v22  ;;  %v3619_v20 = vand.u32 4294901760, %v3618_v30 }
 0x8da   :  { %3436 = vadd.xlane.f32.xlu0 %v3435_v57  ;;  %v3432_v12 = vsel %vm164_vm0, %v3430_v34, 0.0  ;;  %v15782_v34 = vsub.f32 %v3469_v27, %v3504_v45  ;;  %v15784_v57 = vpack.c.bf16 %v3506_v39, %v3502_v1  ;;  %v3613_v27 = vand.u32 4294901760, %v3612_v36 }
 0x8db   :  { %3433 = vadd.xlane.f32.xlu1 %v3432_v12  ;;  %v15786_v12 = vsub.f32 %v3466_v16, %v3502_v1  ;;  %v12902_v58 = vpack.c.bf16 %v3595_v48, %v3583_v14  ;;  %v3625_v16 = vand.u32 4294901760, %v3624_v18  ;;  %v3635_v0 = vand.u32 4294901760, %v15770_v23 }
 0x8dc   :  { %12901 = vmatpush1.bf16.msra.mxu1 %v15784_v57  ;;  %v15821_v45 = vpack.c.bf16 %v3619_v20, %v3607_v15  ;;  %v3647_v39 = vand.u32 4294901760, %v15776_v9  ;;  %v3642_v22 = vsub.f32 %v15767_v19, %v3641_v59  ;;  %v3653_v48 = vand.u32 4294901760, %v15780_v17 }
 0x8dd   :  { %12903 = vmatprep.subr.bf16.mxu1 %v12902_v58  ;;  %v15823_v1 = vpack.c.bf16 %v3625_v16, %v3613_v27  ;;  %v3636_v14 = vsub.f32 %v15770_v23, %v3635_v0  ;;  %v3665_v60 = vand.u32 4294901760, %v15782_v34  ;;  %v3659_v43 = vand.u32 4294901760, %v15786_v12 }
 0x8de   :  { %v3648_v21 = vsub.f32 %v15776_v9, %v3647_v39  ;;  %v3671_v30 = vand.u32 4294901760, %v15788_v53  ;;  %v3643_v36 = vand.u32 4294901760, %v3642_v22  ;;  %v3654_v58 = vsub.f32 %v15780_v17, %v3653_v48 }
 0x8df   :  { %v3637_v18 = vand.u32 4294901760, %v3636_v14  ;;  %v3666_v38 = vsub.f32 %v15782_v34, %v3665_v60  ;;  %v3660_v15 = vsub.f32 %v15786_v12, %v3659_v43  ;;  %v12918_v22 = vpack.c.bf16 %v15748_v33, %v15746_v32 }
 0x8e0   :  { %v3649_v35 = vand.u32 4294901760, %v3648_v21  ;;  %v3672_v20 = vsub.f32 %v15788_v53, %v3671_v30  ;;  %v12910_v27 = vpack.c.bf16 %v3643_v36, %v3631_v62  ;;  %v3655_v16 = vand.u32 4294901760, %v3654_v58 }
 0x8e1   :  { %v3667_v25 = vand.u32 4294901760, %v3666_v38  ;;  %v3661_v55 = vand.u32 4294901760, %v3660_v15  ;;  %v12920_v14 = vpack.c.bf16 %v15752_v42, %v15750_v37  ;;  %v12922_v21 = vpack.c.bf16 %v15757_v47, %v15755_v46 }
 0x8e2   :  { %v12912_v61 = vpack.c.bf16 %v3649_v35, %v3637_v18  ;;  %v3673_v44 = vand.u32 4294901760, %v3672_v20  ;;  %v12926_v62 = vpack.c.bf16 %v15767_v19, %v15765_v54  ;;  %v12928_v36 = vpack.c.bf16 %v15776_v9, %v15770_v23 }
 0x8e3   :  { %v12914_v50 = vpack.c.bf16 %v3667_v25, %v3655_v16  ;;  %v12930_v25 = vpack.c.bf16 %v15782_v34, %v15780_v17  ;;  %v17794_v18 = vand.u32 4294901760, %v15748_v33  ;;  %v17795_v47 = vand.u32 4294901760, %v15750_v37 }
 0x8e4   :  { %v12916_v28 = vpack.c.bf16 %v3673_v44, %v3661_v55  ;;  %v12932_v44 = vpack.c.bf16 %v15788_v53, %v15786_v12  ;;  %v17793_v55 = vand.u32 4294901760, %v15746_v32  ;;  %v15865_v54 = vpack.c.bf16 %v3617_v24, %v3605_v6  ;;  %v10242_v24 = vld [vmem:[%s17751_s7] ss:$0 sm:$0xff] }
 0x8e5   :  { %v15863_v26 = vpack.c.bf16 %v17796_v3, %v17795_v47  ;;  %v15867_v19 = vpack.c.bf16 %v3623_v41, %v3611_v49  ;;  %v15869_v23 = vpack.c.bf16 %v3641_v59, %v3629_v4  ;;  %v15871_v9 = vpack.c.bf16 %v3647_v39, %v3635_v0 }
 0x8e6   :  { %v15857_v46 = vpack.c.bf16 %v17794_v18, %v17793_v55  ;;  %v15873_v17 = vpack.c.bf16 %v3665_v60, %v3653_v48  ;;  %v15875_v32 = vpack.c.bf16 %v3671_v30, %v3659_v43  ;;  %v17797_v55 = vmov 0.0  }
 0x967   :  { %v3437_v33 = vpop.xlane.xlu0 %3436 }
 0x968   :  { %v3439_v34 = vmul.f32 0.015625, %v3437_v33  ;;  %v3434_v12 = vpop.xlane.xlu1 %3433 }
 0x969   :  { %v3438_v37 = vmul.f32 0.015625, %v3434_v12 }
 0x96a   :  { %v3441_v53 = vadd.f32 1e-05, %v3439_v34 }
 0x96b   :  { %v3440_v42 = vadd.f32 1e-05, %v3438_v37 }
 0x96c   :  { %14303 = vrsqrt.f32 %v3441_v53 }
 0x96d   :  { %14305 = vrsqrt.f32 %v3440_v42 }
 0x976   :  { %v14304_v6 = vpop.eup %14303 }
 0x977   :  { %v14306_v49 = vpop.eup %14305  ;;  %v3445_v41 = vmul.f32 %v14304_v6, %v15722_v11 }
 0x978   :  { %v3444_v4 = vmul.f32 %v14306_v49, %v15727_v56 }
 0x979   :  { %v3453_v59 = vmul.f32 %v10242_v24, %v3445_v41  ;;  %v16037_v41 = vld [vmem:[%s17755_s11 + $0x40] sm:$0xff] }
 0x97a   :  { %v3452_v0 = vmul.f32 %v10242_v24, %v3444_v4  ;;  %v16042_v4 = vld [vmem:[%s17755_s11 + $0x48] sm:$0xff] }
 0x97b   :  { %v3474_v39 = vsel %vm164_vm0, %v3453_v59, 0 }
 0x97c   :  { %v3471_v48 = vsel %vm164_vm0, %v3452_v0, 0  ;;  %v15884_v60 = vand.u32 4294901760, %v3474_v39 }
 0x97d   :  { %v15886_v43 = vand.u32 4294901760, %v3471_v48 }
 0x97e   :  { %v3569_v30 = vsub.f32 %v3474_v39, %v15884_v60  ;;  %v4227_v39 = vand.u32 4294901760, %v16037_v41 }
 0x97f   :  { %v3558_v58 = vsub.f32 %v3471_v48, %v15886_v43  ;;  %v4230_v48 = vand.u32 4294901760, %v16042_v4 }
 0x980   :  { %v3570_v38 = vand.u32 4294901760, %v3569_v30 }
 0x981   :  { %v3559_v35 = vand.u32 4294901760, %v3558_v58 }
 0x982   :  { %v3571_v16 = vsub.f32 %v3569_v30, %v3570_v38 }
 0x983   :  { %v3560_v15 = vsub.f32 %v3558_v58, %v3559_v35 }
 0x984   :  { %v3572_v18 = vand.u32 4294901760, %v3571_v16  ;;  %v16069_v16 = vld [vmem:[%s17755_s11 + $0x50] sm:$0xff] }
 0x985   :  { %v3561_v20 = vand.u32 4294901760, %v3560_v15 }
 0x987   :  { %3562 = vmatmul.mubr.f32.vlgmr.msra.gmra.mrb[12].mxu1 %v3561_v20 }
 0x988   :  { %12905 = vmatpush1.bf16.msra.mxu1 %v15816_v40  ;;  %3567 = vmatprep.mubr.f32.mxu1 %v17797_v55 }
 0x989   :  { %12907 = vmatprep.subr.bf16.mxu1 %v15821_v45 }
 0x98b   :  { %3573 = vmatmul.mubr.f32.gmra.mrb[14].mxu1 %v3572_v18  ;;  %v16074_v18 = vld [vmem:[%s17755_s11 + $0x58] sm:$0xff] }
 0x98c   :  { %12909 = vmatpush1.bf16.msra.mxu1 %v15823_v1  ;;  %3723 = vmatprep.mubr.f32.mxu1 %v17797_v55 }
 0x98d   :  { %12911 = vmatprep.subr.bf16.mxu1 %v12910_v27 }
 0x990   :  { %12913 = vmatpush1.bf16.msra.mxu1 %v12912_v61 }
 0x991   :  { %12915 = vmatprep.subr.bf16.mxu1 %v12914_v50  ;;  %v15952_v50 = vld [vmem:[%s17755_s11 + $0x18] sm:$0xff] }
 0x992   :  { %v4212_v40 = vand.u32 4294901760, %v15952_v50 }
 0x994   :  { %12917 = vmatpush1.bf16.msra.mxu1 %v12916_v28  ;;  %v15947_v28 = vld [vmem:[%s17755_s11 + $0x10] sm:$0xff]  ;;  %v15972_v61 = vsub.f32 %v15952_v50, %v4212_v40 }
 0x995   :  { %12919 = vmatprep.subr.bf16.mxu1 %v12918_v22  ;;  %v15977_v22 = vld [vmem:[%s17755_s11 + $0x20] sm:$0xff] }
 0x997   :  { %3725 = vmatmul.mubr.f32.vlgmr.msra.gmra.mrb[12].mxu1 %v15886_v43 }
 0x998   :  { %12921 = vmatpush1.bf16.msra.mxu1 %v12920_v14  ;;  %3730 = vmatprep.mubr.f32.mxu1 %v17797_v55  ;;  %v15982_v14 = vld [vmem:[%s17755_s11 + $0x28] sm:$0xff] }
 0x999   :  { %12923 = vmatprep.subr.bf16.mxu1 %v12922_v21 }
 0x99b   :  { %3732 = vmatmul.mubr.f32.gmra.mrb[14].mxu1 %v15884_v60 }
 0x99c   :  { %12925 = vmatpush1.bf16.msra.mxu1 %v12924_v52  ;;  %3834 = vmatprep.mubr.f32.mxu1 %v17797_v55  ;;  %v4186_v52 = vld [vmem:[%s17755_s11] sm:$0xff] }
 0x99d   :  { %12927 = vmatprep.subr.bf16.mxu1 %v12926_v62 }
 0x9a0   :  { %12929 = vmatpush1.bf16.msra.mxu1 %v12928_v36 }
 0x9a1   :  { %12931 = vmatprep.subr.bf16.mxu1 %v12930_v25  ;;  %v4327_v25 = vand.u32 4294901760, %v15972_v61 }
 0x9a4   :  { %12933 = vmatpush1.bf16.msra.mxu1 %v12932_v44  ;;  %v4215_v44 = vand.u32 4294901760, %v15977_v22 }
 0x9a5   :  { %12935 = vmatprep.subr.bf16.mxu1 %v15735_v8 }
 0x9a7   :  { %3837 = vmatmul.mubr.f32.vlgmr.msra.gmra.mrb[12].mxu1 %v3558_v58 }
 0x9a8   :  { %12937 = vmatpush1.bf16.msra.mxu1 %v15737_v10  ;;  %3842 = vmatprep.mubr.f32.mxu1 %v17797_v55 }
 0x9a9   :  { %12939 = vmatprep.subr.bf16.mxu1 %v15741_v31 }
 0x9ab   :  { %3845 = vmatmul.mubr.f32.gmra.mrb[14].mxu1 %v3569_v30 }
 0x9ac   :  { %12941 = vmatpush1.bf16.msra.mxu1 %v15743_v7  ;;  %3931 = vmatprep.mubr.f32.mxu1 %v17797_v55 }
 0x9ad   :  { %12943 = vmatprep.subr.bf16.mxu1 %v15763_v51 }
 0x9b0   :  { %12945 = vmatpush1.bf16.msra.mxu1 %v15774_v29 }
 0x9b1   :  { %12947 = vmatprep.subr.bf16.mxu1 %v15778_v13 }
 0x9b4   :  { %12949 = vmatpush1.bf16.msra.mxu1 %v15784_v57 }
 0x9b5   :  { %12951 = vmatprep.subr.bf16.mxu1 %v15857_v46  ;;  %v4218_v46 = vand.u32 4294901760, %v15982_v14 }
 0x9b7   :  { %3935 = vmatmul.mubr.f32.vlgmr.msra.gmra.mrb[12].mxu1 %v3559_v35  ;;  %v16057_v35 = vsub.f32 %v16037_v41, %v4227_v39 }
 0x9b8   :  { %12953 = vmatpush1.bf16.msra.mxu1 %v15863_v26  ;;  %3940 = vmatprep.mubr.f32.mxu1 %v17797_v55  ;;  %v4328_v26 = vsub.f32 %v15972_v61, %v4327_v25 }
 0x9b9   :  { %12955 = vmatprep.subr.bf16.mxu1 %v15865_v54  ;;  %v15997_v54 = vsub.f32 %v15977_v22, %v4215_v44  ;;  %v4201_v22 = vld [vmem:[%s17755_s11 + $0x78] sm:$0xff] }
 0x9bb   :  { %3944 = vmatmul.mubr.f32.gmra.mrb[14].mxu1 %v3570_v38  ;;  %v4334_v12 = vand.u32 4294901760, %v15997_v54  ;;  %v16062_v38 = vsub.f32 %v16042_v4, %v4230_v48 }
 0x9bc   :  { %12957 = vmatpush1.bf16.msra.mxu1 %v15867_v19  ;;  %4062 = vmatprep.mubr.f32.mxu1 %v17797_v55  ;;  %v16002_v19 = vsub.f32 %v15982_v14, %v4218_v46 }
 0x9bd   :  { %12959 = vmatprep.subr.bf16.mxu1 %v15869_v23  ;;  %v16007_v23 = vld [vmem:[%s17755_s11 + $0x30] sm:$0xff]  ;;  %v4335_v24 = vsub.f32 %v15997_v54, %v4334_v12 }
 0x9be   :  { %v4221_v33 = vand.u32 4294901760, %v16007_v23  ;;  %v4341_v37 = vand.u32 4294901760, %v16002_v19 }
 0x9c0   :  { %12961 = vmatpush1.bf16.msra.mxu1 %v15871_v9  ;;  %v16012_v9 = vld [vmem:[%s17755_s11 + $0x38] sm:$0xff]  ;;  %v16021_v42 = vsub.f32 %v16007_v23, %v4221_v33  ;;  %v4342_v49 = vsub.f32 %v16002_v19, %v4341_v37 }
 0x9c1   :  { %12963 = vmatprep.subr.bf16.mxu1 %v15873_v17  ;;  %v4224_v34 = vand.u32 4294901760, %v16012_v9 }
 0x9c2   :  { %v4348_v59 = vand.u32 4294901760, %v16021_v42 }
 0x9c3   :  { %v16026_v6 = vsub.f32 %v16012_v9, %v4224_v34 }
 0x9c4   :  { %12965 = vmatpush1.bf16.msra.mxu1 %v15875_v32  ;;  %v4329_v32 = vand.u32 4294901760, %v4328_v26  ;;  %v4349_v30 = vsub.f32 %v16021_v42, %v4348_v59 }
 0x9c5   :  { %12967 = vmatprep.subr.bf16.mxu1 %v15735_v8  ;;  %v4187_v8 = vld [vmem:[%s17755_s11 + $0x8] sm:$0xff]  ;;  %v4355_v0 = vand.u32 4294901760, %v16026_v6 }
 0x9c7   :  { %4064 = vmatmul.mubr.f32.vlgmr.msra.gmra.mrb[12].mxu1 %v15886_v43  ;;  %v4356_v58 = vsub.f32 %v16026_v6, %v4355_v0 }
 0x9c8   :  { %12969 = vmatpush1.bf16.msra.mxu1 %v15737_v10  ;;  %4069 = vmatprep.mubr.f32.mxu1 %v17797_v55  ;;  %v4203_v10 = vand.u32 4294901760, %v4186_v52 }
 0x9c9   :  { %12971 = vmatprep.subr.bf16.mxu1 %v15741_v31  ;;  %v4206_v31 = vand.u32 4294901760, %v4187_v8 }
 0x9cb   :  { %4071 = vmatmul.mubr.f32.gmra.mrb[14].mxu1 %v15884_v60  ;;  %v16064_v15 = vpack.c.bf16 %v4206_v31, %v4203_v10 }
 0x9cc   :  { %12973 = vmatpush1.bf16.msra.mxu1 %v15743_v7  ;;  %4157 = vmatprep.mubr.f32.mxu1 %v17797_v55  ;;  %v15940_v7 = vsub.f32 %v4186_v52, %v4203_v10  ;;  %v4350_v52 = vand.u32 4294901760, %v4349_v30  ;;  %v4233_v10 = vand.u32 4294901760, %v16069_v16 }
 0x9cd   :  { %12975 = vmatprep.subr.bf16.mxu1 %v15763_v51  ;;  %v15942_v51 = vsub.f32 %v4187_v8, %v4206_v31  ;;  %v4357_v8 = vand.u32 4294901760, %v4356_v58  ;;  %v4236_v31 = vand.u32 4294901760, %v16074_v18  ;;  %v16122_v58 = vpack.c.bf16 %v4218_v46, %v4215_v44 }
 0x9ce   :  { %v16097_v26 = vsub.f32 %v16069_v16, %v4233_v10 }
 0x9cf   :  { %v16178_v41 = vpack.c.bf16 %v4236_v31, %v4233_v10  ;;  %v13054_v10 = vpack.c.bf16 %v16002_v19, %v15997_v54 }
 0x9d0   :  { %12977 = vmatpush1.bf16.msra.mxu1 %v15774_v29  ;;  %v4306_v29 = vand.u32 4294901760, %v15940_v7 }
 0x9d1   :  { %12979 = vmatprep.subr.bf16.mxu1 %v15778_v13  ;;  %v4313_v13 = vand.u32 4294901760, %v15942_v51 }
 0x9d2   :  { %v4307_v45 = vsub.f32 %v15940_v7, %v4306_v29 }
 0x9d3   :  { %v4314_v1 = vsub.f32 %v15942_v51, %v4313_v13 }
 0x9d4   :  { %12981 = vmatpush1.bf16.msra.mxu1 %v15784_v57  ;;  %v4209_v57 = vand.u32 4294901760, %v15947_v28  ;;  %v4308_v21 = vand.u32 4294901760, %v4307_v45  ;;  %v17773_v45 = vand.u32 4294901760, %v16057_v35 }
 0x9d5   :  { %v4315_v62 = vand.u32 4294901760, %v4314_v1  ;;  %v17772_v1 = vand.u32 4294901760, %v16062_v38  ;;  %12983 = vmatprep.subr.bf16.mxu1 %v16064_v15 }
 0x9d6   :  { %v15967_v27 = vsub.f32 %v15947_v28, %v4209_v57  ;;  %v4199_v28 = vld [vmem:[%s17755_s11 + $0x68] sm:$0xff] }
 0x9d7   :  { %4159 = vmatmul.mubr.f32.vlgmr.msra.gmra.mrb[12].mxu1 %v15886_v43  ;;  %v13014_v47 = vpack.c.bf16 %v4315_v62, %v4308_v21  ;;  %v4343_v43 = vand.u32 4294901760, %v4342_v49  ;;  %v13026_v21 = vpack.c.bf16 %v4357_v8, %v4350_v52  ;;  %v4363_v62 = vsub.f32 %v16057_v35, %v17773_v45  ;;  %v4200_v8 = vld [vmem:[%s17755_s11 + $0x70] sm:$0xff] }
 0x9d8   :  { %4164 = vmatprep.mubr.f32.mxu1 %v17797_v55  ;;  %v4320_v36 = vand.u32 4294901760, %v15967_v27  ;;  %12985 = vmatpush3.bf16.msra.mxu1 %v16064_v15  ;;  %v4245_v46 = vand.u32 4294901760, %v4200_v8  ;;  %v13050_v16 = vpack.c.bf16 %v15972_v61, %v15967_v27  ;;  %v17800_v61 = vand.u32 4294901760, %v16097_v26 }
 0x9d9   :  { %13015 = vmatprep.subr.bf16.mxu0 %v13014_v47  ;;  %v4364_v50 = vand.u32 4294901760, %v4363_v62 }
 0x9da   :  { %v4321_v3 = vsub.f32 %v15967_v27, %v4320_v36  ;;  %13017 = vmatpush3.bf16.msra.mxu0 %v13014_v47  ;;  %v4370_v47 = vsub.f32 %v16062_v38, %v17772_v1 }
 0x9db   :  { %4166 = vmatmul.mubr.f32.gmra.mrb[14].mxu1 %v15884_v60  ;;  %v4336_v60 = vand.u32 4294901760, %v4335_v24  ;;  %v17767_v24 = vand.u32 4294901760, %v16097_v26 }
 0x9dc   :  { %v4322_v17 = vand.u32 4294901760, %v4321_v3  ;;  %v16092_v3 = vpack.c.bf16 %v4212_v40, %v4209_v57  ;;  %v4371_v57 = vand.u32 4294901760, %v4370_v47 }
 0x9dd   :  { %v13022_v20 = vpack.c.bf16 %v4343_v43, %v4336_v60 }
 0x9de   :  { %v13018_v53 = vpack.c.bf16 %v4329_v32, %v4322_v17  ;;  %v16102_v17 = vsub.f32 %v16074_v18, %v4236_v31  ;;  %v4198_v32 = vld [vmem:[%s17755_s11 + $0x60] sm:$0xff]  ;;  %12987 = vmatprep.subr.bf16.mxu1 %v16092_v3  ;;  %v13030_v60 = vpack.c.bf16 %v4371_v57, %v4364_v50  ;;  %v16146_v50 = vsub.f32 %v4200_v8, %v4245_v46 }
 0x9df   :  { %v4239_v40 = vand.u32 4294901760, %v4198_v32  ;;  %12989 = vmatpush3.bf16.msra.mxu1 %v16092_v3  ;;  %v16152_v57 = vpack.c.bf16 %v4224_v34, %v4221_v33  ;;  %v16167_v33 = vpack.c.bf16 %v4230_v48, %v4227_v39  ;;  %v13046_v39 = vpack.c.bf16 %v15942_v51, %v15940_v7 }
 0x9e0   :  { %13019 = vmatprep.subr.bf16.mxu0 %v13018_v53  ;;  %v17766_v49 = vand.u32 4294901760, %v16102_v17  ;;  %12991 = vmatprep.subr.bf16.mxu1 %v16122_v58  ;;  %v13058_v31 = vpack.c.bf16 %v16026_v6, %v16021_v42  ;;  %v13118_v7 = vpack.c.bf16 %v4341_v37, %v4334_v12  ;;  %v13122_v51 = vpack.c.bf16 %v4355_v0, %v4348_v59 }
 0x9e1   :  { %13021 = vmatpush3.bf16.msra.mxu0 %v13018_v53  ;;  %v4242_v53 = vand.u32 4294901760, %v4199_v28  ;;  %v16114_v43 = vsub.f32 %v4198_v32, %v4239_v40  ;;  %v17804_v37 = vand.u32 4294901760, %v16146_v50 }
 0x9e2   :  { %13023 = vmatprep.subr.bf16.mxu0 %v13022_v20  ;;  %v4384_v52 = vsub.f32 %v16102_v17, %v17766_v49 }
 0x9e3   :  { %v16116_v30 = vsub.f32 %v4199_v28, %v4242_v53  ;;  %v17771_v14 = vand.u32 4294901760, %v16114_v43  ;;  %12993 = vmatpush3.bf16.msra.mxu1 %v16122_v58  ;;  %v16184_v48 = vpack.c.bf16 %v4242_v53, %v4239_v40  ;;  %v13062_v40 = vpack.c.bf16 %v16062_v38, %v16057_v35 }
 0x9e4   :  { %v4385_v47 = vand.u32 4294901760, %v4384_v52  ;;  %12995 = vmatprep.subr.bf16.mxu1 %v16152_v57  ;;  %v13066_v53 = vpack.c.bf16 %v16102_v17, %v16097_v26  ;;  %v17802_v54 = vand.u32 4294901760, %v16114_v43 }
 0x9e5   :  { %13025 = vmatpush3.bf16.msra.mxu0 %v13022_v20  ;;  %v4377_v20 = vsub.f32 %v16097_v26, %v17767_v24  ;;  %v17768_v44 = vand.u32 4294901760, %v16116_v30  ;;  %v4391_v32 = vsub.f32 %v16114_v43, %v17771_v14  ;;  %v17770_v24 = vand.u32 4294901760, %v16146_v50 }
 0x9e6   :  { %13027 = vmatprep.subr.bf16.mxu0 %v13026_v21  ;;  %v17803_v19 = vand.u32 4294901760, %v16116_v30 }
 0x9e7   :  { %v4378_v62 = vand.u32 4294901760, %v4377_v20  ;;  %v4398_v28 = vsub.f32 %v16116_v30, %v17768_v44  ;;  %v4392_v52 = vand.u32 4294901760, %v4391_v32  ;;  %12997 = vmatpush3.bf16.msra.mxu1 %v16152_v57  ;;  %v4405_v9 = vsub.f32 %v16146_v50, %v17770_v24 }
 0x9e8   :  { %12999 = vmatprep.subr.bf16.mxu1 %v16167_v33  ;;  %v13134_v12 = vpack.c.bf16 %v17803_v19, %v17802_v54 }
 0x9e9   :  { %13029 = vmatpush3.bf16.msra.mxu0 %v13026_v21  ;;  %v4248_v21 = vand.u32 4294901760, %v4201_v22  ;;  %v13034_v20 = vpack.c.bf16 %v4385_v47, %v4378_v62  ;;  %v4399_v49 = vand.u32 4294901760, %v4398_v28  ;;  %v4406_v8 = vand.u32 4294901760, %v4405_v9 }
 0x9ea   :  { %13031 = vmatprep.subr.bf16.mxu0 %v13030_v60 }
 0x9eb   :  { %v13038_v23 = vpack.c.bf16 %v4399_v49, %v4392_v52  ;;  %13001 = vmatpush3.bf16.msra.mxu1 %v16167_v33  ;;  %v16190_v18 = vpack.c.bf16 %v4248_v21, %v4245_v46  ;;  %v13070_v49 = vpack.c.bf16 %v16116_v30, %v16114_v43 }
 0x9ec   :  { %13003 = vmatprep.subr.bf16.mxu1 %v16178_v41 }
 0x9ed   :  { %13033 = vmatpush3.bf16.msra.mxu0 %v13030_v60  ;;  %v16154_v60 = vsub.f32 %v4201_v22, %v4248_v21 }
 0x9ee   :  { %13035 = vmatprep.subr.bf16.mxu0 %v13034_v20 }
 0x9ef   :  { %v17769_v44 = vand.u32 4294901760, %v16154_v60  ;;  %13005 = vmatpush3.bf16.msra.mxu1 %v16178_v41  ;;  %v13074_v46 = vpack.c.bf16 %v16154_v60, %v16146_v50  ;;  %v17805_v42 = vand.u32 4294901760, %v16154_v60 }
 0x9f0   :  { %13007 = vmatprep.subr.bf16.mxu1 %v16184_v48 }
 0x9f1   :  { %13037 = vmatpush3.bf16.msra.mxu0 %v13034_v20  ;;  %v4412_v34 = vsub.f32 %v16154_v60, %v17769_v44  ;;  %v13138_v6 = vpack.c.bf16 %v17805_v42, %v17804_v37  ;;  %v10245_v60 = vld [vmem:[%s17752_s8 + $0x80] sm:$0xff] }
 0x9f2   :  { %13039 = vmatprep.subr.bf16.mxu0 %v13038_v23 }
 0x9f3   :  { %v4413_v22 = vand.u32 4294901760, %v4412_v34  ;;  %13009 = vmatpush3.bf16.msra.mxu1 %v16184_v48 }
 0x9f4   :  { %13011 = vmatprep.subr.bf16.mxu1 %v16190_v18 }
 0x9f5   :  { %13041 = vmatpush3.bf16.msra.mxu0 %v13038_v23  ;;  %v13042_v4 = vpack.c.bf16 %v4413_v22, %v4406_v8 }
 0x9f7   :  { %13043 = vmatprep.subr.bf16.mxu0 %v13042_v4  ;;  %13013 = vmatpush3.bf16.msra.mxu1 %v16190_v18 }
 0x9f9   :  { %13045 = vmatpush3.bf16.msra.mxu0 %v13042_v4 }
 0x9fa   :  { %13047 = vmatprep.subr.bf16.mxu0 %v13046_v39 }
 0xaaa   :  { %v4160_v21 = vpop.f32.mrb[12].mxu1 }
 0xaab   :  { %v4172_v62 = vsub.f32 0.0, %v4160_v21  ;;  %v4162_v47 = vpop.f32.mrb[13].mxu1 }
 0xaad   :  { %v4174_v32 = vmul.f32 1.442695, %v4172_v62 }
 0xaae   :  { %v4167_v28 = vpop.f32.mrb[14].mxu1 }
 0xaaf   :  { %14307 = vpow2.f32 %v4174_v32  ;;  %v4173_v20 = vsub.f32 0.0, %v4167_v28  ;;  %v4169_v52 = vpop.f32.mrb[15].mxu1 }
 0xab1   :  { %v4176_v23 = vmul.f32 1.442695, %v4173_v20 }
 0xab3   :  { %14309 = vpow2.f32 %v4176_v23 }
 0xab9   :  { %v14308_v9 = vpop.eup %14307 }
 0xaba   :  { %v4178_v34 = vadd.f32 1.0, %v14308_v9 }
 0xabc   :  { %14311 = vrcp.f32 %v4178_v34 }
 0xabd   :  { %v14310_v8 = vpop.eup %14309 }
 0xabe   :  { %v4179_v22 = vadd.f32 1.0, %v14310_v8 }
 0xac0   :  { %14313 = vrcp.f32 %v4179_v22  ;;  %v10254_v22 = vld [vmem:[%s17752_s8 + $0xc8] sm:$0xff] }
 0xac6   :  { %v14312_v4 = vpop.eup %14311 }
 0xac7   :  { %v4181_v44 = vmul.f32 %v14312_v4, %v4160_v21  ;;  %v10256_v4 = vld [vmem:[%s17752_s8 + $0xd8] sm:$0xff] }
 0xac9   :  { %v4184_v24 = vmul.f32 %v4181_v44, %v4162_v47 }
 0xaca   :  { %v14314_v14 = vpop.eup %14313 }
 0xacb   :  { %v16206_v1 = vand.u32 4294901760, %v4184_v24  ;;  %v4183_v45 = vmul.f32 %v14314_v14, %v4167_v28  ;;  %v13114_v14 = vpack.c.bf16 %v4327_v25, %v4320_v36  ;;  %v17801_v36 = vand.u32 4294901760, %v16102_v17 }
 0xacd   :  { %v4284_v62 = vsub.f32 %v4184_v24, %v16206_v1  ;;  %v4185_v32 = vmul.f32 %v4183_v45, %v4169_v52  ;;  %11585 = vmatprep.mubr.f32.mxu0 %v16206_v1  ;;  %v13110_v45 = vpack.c.bf16 %v4313_v13, %v4306_v29  ;;  %v17798_v29 = vand.u32 4294901760, %v16057_v35 }
 0xace   :  { %v17799_v13 = vand.u32 4294901760, %v16062_v38  ;;  %v13130_v25 = vpack.c.bf16 %v17801_v36, %v17800_v61 }
 0xacf   :  { %v16210_v20 = vand.u32 4294901760, %v4185_v32  ;;  %v4285_v23 = vand.u32 4294901760, %v4284_v62 }
 0xad0   :  { %v13126_v27 = vpack.c.bf16 %v17799_v13, %v17798_v29  ;;  %v4953_v29 = vand.u32 4294901760, %v10254_v22  ;;  %v4957_v13 = vand.u32 4294901760, %v10256_v4 }
 0xad1   :  { %v4294_v9 = vsub.f32 %v4185_v32, %v16210_v20  ;;  %11586 = vmatmul.mubr.f32.vlgmr.msra.gmra.mrb[14].mxu0 %v16210_v20  ;;  %v4286_v34 = vsub.f32 %v4284_v62, %v4285_v23 }
 0xad2   :  { %13049 = vmatpush3.bf16.msra.mxu0 %v13046_v39  ;;  %11620 = vmatprep.mubr.f32.mxu0 %v4284_v62  ;;  %v16373_v37 = vsub.f32 %v10254_v22, %v4953_v29  ;;  %v16375_v42 = vsub.f32 %v10256_v4, %v4957_v13 }
 0xad3   :  { %v4295_v44 = vand.u32 4294901760, %v4294_v9  ;;  %13051 = vmatprep.subr.bf16.mxu0 %v13050_v16  ;;  %v4287_v21 = vand.u32 4294901760, %v4286_v34  ;;  %v10255_v34 = vld [vmem:[%s17752_s8 + $0xd0] sm:$0xff] }
 0xad4   :  { %v4959_v61 = vand.u32 4294901760, %v10255_v34 }
 0xad5   :  { %v4296_v47 = vsub.f32 %v4294_v9, %v4295_v44  ;;  %11550 = vmatprep.mubr.f32.mxu1 %v4287_v21 }
 0xad6   :  { %13053 = vmatpush3.bf16.msra.mxu0 %v13050_v16 }
 0xad7   :  { %v4297_v24 = vand.u32 4294901760, %v4296_v47  ;;  %13055 = vmatprep.subr.bf16.mxu0 %v13054_v10 }
 0xad9   :  { %11551 = vmatmul.mubr.f32.vlgmr.msra.gmra.mrb[16].mxu1 %v4297_v24 }
 0xada   :  { %13057 = vmatpush3.bf16.msra.mxu0 %v13054_v10  ;;  %5017 = vmatprep.mubr.f32.mxu1 %v17797_v55  ;;  %v10252_v10 = vld [vmem:[%s17752_s8 + $0xb8] sm:$0xff] }
 0xadb   :  { %13059 = vmatprep.subr.bf16.mxu0 %v13058_v31 }
 0xade   :  { %13061 = vmatpush3.bf16.msra.mxu0 %v13058_v31 }
 0xadf   :  { %13063 = vmatprep.subr.bf16.mxu0 %v13062_v40 }
 0xae2   :  { %13065 = vmatpush3.bf16.msra.mxu0 %v13062_v40  ;;  %v4949_v40 = vand.u32 4294901760, %v10252_v10 }
 0xae3   :  { %13067 = vmatprep.subr.bf16.mxu0 %v13066_v53 }
 0xae4   :  { %v16355_v47 = vsub.f32 %v10252_v10, %v4949_v40 }
 0xae6   :  { %13069 = vmatpush3.bf16.msra.mxu0 %v13066_v53  ;;  %v10249_v53 = vld [vmem:[%s17752_s8 + $0xa0] sm:$0xff] }
 0xae7   :  { %13071 = vmatprep.subr.bf16.mxu0 %v13070_v49 }
 0xaea   :  { %13073 = vmatpush3.bf16.msra.mxu0 %v13070_v49  ;;  %v10251_v49 = vld [vmem:[%s17752_s8 + $0xb0] sm:$0xff] }
 0xaeb   :  { %13075 = vmatprep.subr.bf16.mxu0 %v13074_v46  ;;  %v4951_v28 = vand.u32 4294901760, %v10251_v49 }
 0xaee   :  { %13077 = vmatpush3.bf16.msra.mxu0 %v13074_v46  ;;  %v4947_v46 = vand.u32 4294901760, %v10249_v53 }
 0xaef   :  { %13079 = vmatprep.subr.bf16.mxu0 %v16064_v15 }
 0xaf0   :  { %v16327_v8 = vpack.c.bf16 %v4951_v28, %v4947_v46  ;;  %v16358_v24 = vsub.f32 %v10249_v53, %v4947_v46 }
 0xaf1   :  { %11621 = vmatmul.mubr.f32.vlgmr.msra.gmra.mrb[14].mxu0 %v4294_v9  ;;  %v10253_v9 = vld [vmem:[%s17752_s8 + $0xc0] sm:$0xff] }
 0xaf2   :  { %13081 = vmatpush3.bf16.msra.mxu0 %v16064_v15  ;;  %11655 = vmatprep.mubr.f32.mxu0 %v4285_v23 }
 0xaf3   :  { %13083 = vmatprep.subr.bf16.mxu0 %v16092_v3 }
 0xaf6   :  { %13085 = vmatpush3.bf16.msra.mxu0 %v16092_v3 }
 0xaf7   :  { %13087 = vmatprep.subr.bf16.mxu0 %v16122_v58 }
 0xafa   :  { %13089 = vmatpush3.bf16.msra.mxu0 %v16122_v58 }
 0xafb   :  { %13091 = vmatprep.subr.bf16.mxu0 %v16152_v57 }
 0xafe   :  { %13093 = vmatpush3.bf16.msra.mxu0 %v16152_v57 }
 0xaff   :  { %13095 = vmatprep.subr.bf16.mxu0 %v16167_v33 }
 0xb02   :  { %13097 = vmatpush3.bf16.msra.mxu0 %v16167_v33 }
 0xb03   :  { %13099 = vmatprep.subr.bf16.mxu0 %v16178_v41 }
 0xb06   :  { %13101 = vmatpush3.bf16.msra.mxu0 %v16178_v41 }
 0xb07   :  { %13103 = vmatprep.subr.bf16.mxu0 %v16184_v48 }
 0xb0a   :  { %13105 = vmatpush3.bf16.msra.mxu0 %v16184_v48 }
 0xb0b   :  { %13107 = vmatprep.subr.bf16.mxu0 %v16190_v18 }
 0xb0e   :  { %13109 = vmatpush3.bf16.msra.mxu0 %v16190_v18 }
 0xb0f   :  { %13111 = vmatprep.subr.bf16.mxu0 %v13110_v45 }
 0xb11   :  { %11656 = vmatmul.mubr.f32.vlgmr.msra.gmra.mrb[14].mxu0 %v4295_v44  ;;  %v10258_v44 = vld [vmem:[%s17752_s8 + $0xe8] sm:$0xff] }
 0xb12   :  { %13113 = vmatpush3.bf16.msra.mxu0 %v13110_v45  ;;  %11690 = vmatprep.mubr.f32.mxu0 %v16206_v1  ;;  %v16360_v45 = vsub.f32 %v10251_v49, %v4951_v28  ;;  %v4961_v36 = vand.u32 4294901760, %v10258_v44 }
 0xb13   :  { %13115 = vmatprep.subr.bf16.mxu0 %v13114_v14 }
 0xb14   :  { %v5084_v10 = vand.u32 4294901760, %v16360_v45 }
 0xb16   :  { %13117 = vmatpush3.bf16.msra.mxu0 %v13114_v14  ;;  %v10260_v14 = vld [vmem:[%s17752_s8 + $0xf8] sm:$0xff]  ;;  %v5085_v4 = vsub.f32 %v16360_v45, %v5084_v10 }
 0xb17   :  { %13119 = vmatprep.subr.bf16.mxu0 %v13118_v7 }
 0xb1a   :  { %13121 = vmatpush3.bf16.msra.mxu0 %v13118_v7  ;;  %v10257_v7 = vld [vmem:[%s17752_s8 + $0xe0] sm:$0xff] }
 0xb1b   :  { %13123 = vmatprep.subr.bf16.mxu0 %v13122_v51  ;;  %v4963_v54 = vand.u32 4294901760, %v10257_v7 }
 0xb1e   :  { %13125 = vmatpush3.bf16.msra.mxu0 %v13122_v51  ;;  %v10259_v51 = vld [vmem:[%s17752_s8 + $0xf0] sm:$0xff] }
 0xb1f   :  { %13127 = vmatprep.subr.bf16.mxu0 %v13126_v27  ;;  %v4967_v19 = vand.u32 4294901760, %v10259_v51 }
 0xb22   :  { %13129 = vmatpush3.bf16.msra.mxu0 %v13126_v27  ;;  %v4955_v27 = vand.u32 4294901760, %v10253_v9 }
 0xb23   :  { %13131 = vmatprep.subr.bf16.mxu0 %v13130_v25 }
 0xb26   :  { %13133 = vmatpush3.bf16.msra.mxu0 %v13130_v25  ;;  %v4965_v25 = vand.u32 4294901760, %v10260_v14 }
 0xb27   :  { %13135 = vmatprep.subr.bf16.mxu0 %v13134_v12 }
 0xb2a   :  { %13137 = vmatpush3.bf16.msra.mxu0 %v13134_v12  ;;  %v16371_v12 = vpack.c.bf16 %v4957_v13, %v4953_v29  ;;  %v5086_v13 = vand.u32 4294901760, %v5085_v4 }
 0xb2b   :  { %13139 = vmatprep.subr.bf16.mxu0 %v13138_v6 }
 0xb2e   :  { %13141 = vmatpush3.bf16.msra.mxu0 %v13138_v6  ;;  %v16377_v6 = vpack.c.bf16 %v4959_v61, %v4955_v27 }
 0xb2f   :  { %13143 = vmatprep.subr.bf16.mxu0 %v16064_v15 }
 0xb31   :  { %11691 = vmatmul.mubr.f32.vlgmr.msra.gmra.mrb[14].mxu0 %v16210_v20 }
 0xb32   :  { %13145 = vmatpush3.bf16.msra.mxu0 %v16064_v15  ;;  %11725 = vmatprep.mubr.f32.mxu0 %v16206_v1 }
 0xb33   :  { %13147 = vmatprep.subr.bf16.mxu0 %v16092_v3 }
 0xb36   :  { %13149 = vmatpush3.bf16.msra.mxu0 %v16092_v3 }
 0xb37   :  { %13151 = vmatprep.subr.bf16.mxu0 %v16122_v58 }
 0xb3a   :  { %13153 = vmatpush3.bf16.msra.mxu0 %v16122_v58 }
 0xb3b   :  { %13155 = vmatprep.subr.bf16.mxu0 %v16152_v57 }
 0xb3e   :  { %13157 = vmatpush3.bf16.msra.mxu0 %v16152_v57 }
 0xb3f   :  { %13159 = vmatprep.subr.bf16.mxu0 %v16167_v33 }
 0xb42   :  { %13161 = vmatpush3.bf16.msra.mxu0 %v16167_v33  ;;  %v10247_v33 = vld [vmem:[%s17752_s8 + $0x90] sm:$0xff] }
 0xb43   :  { %13163 = vmatprep.subr.bf16.mxu0 %v16178_v41  ;;  %v4943_v39 = vand.u32 4294901760, %v10247_v33 }
 0xb45   :  { %v16341_v23 = vsub.f32 %v10247_v33, %v4943_v39 }
 0xb46   :  { %13165 = vmatpush3.bf16.msra.mxu0 %v16178_v41  ;;  %v4939_v41 = vand.u32 4294901760, %v10245_v60 }
 0xb47   :  { %13167 = vmatprep.subr.bf16.mxu0 %v16184_v48 }
 0xb48   :  { %v16309_v16 = vpack.c.bf16 %v4943_v39, %v4939_v41  ;;  %v5078_v39 = vand.u32 4294901760, %v16355_v47 }
 0xb4a   :  { %13169 = vmatpush3.bf16.msra.mxu0 %v16184_v48  ;;  %v5079_v28 = vsub.f32 %v16355_v47, %v5078_v39 }
 0xb4b   :  { %13171 = vmatprep.subr.bf16.mxu0 %v16190_v18 }
 0xb4e   :  { %13173 = vmatpush3.bf16.msra.mxu0 %v16190_v18  ;;  %v10250_v18 = vld [vmem:[%s17752_s8 + $0xa8] sm:$0xff] }
 0xb4f   :  { %v4945_v31 = vand.u32 4294901760, %v10250_v18 }
 0xb51   :  { %11726 = vmatmul.mubr.f32.vlgmr.msra.gmra.mrb[14].mxu0 %v16210_v20  ;;  %v16325_v52 = vpack.c.bf16 %v4949_v40, %v4945_v31  ;;  %v16339_v20 = vsub.f32 %v10245_v60, %v4939_v41  ;;  %v16353_v21 = vsub.f32 %v10250_v18, %v4945_v31  ;;  %v5072_v18 = vand.u32 4294901760, %v16358_v24 }
 0xb53   :  { %v5066_v41 = vand.u32 4294901760, %v16353_v21  ;;  %v5073_v22 = vsub.f32 %v16358_v24, %v5072_v18 }
 0xb55   :  { %v5067_v46 = vsub.f32 %v16353_v21, %v5066_v41  ;;  %v5074_v29 = vand.u32 4294901760, %v5073_v22 }
 0xbac   :  { %v11552_v59 = vpop.f32.mrb[16].mxu1 }
 0xbad   :  { %v4289_v0 = vpop.f32.mrb[17].mxu1 }
 0xc24   :  { %v11727_v35 = vpop.f32.mrb[14].mxu0 }
 0xc25   :  { %v13954_v38 = vadd.f32 %v11727_v35, %v11552_v59  ;;  %v4876_v15 = vpop.f32.mrb[15].mxu0  ;;  %v16379_v59 = vsub.f32 %v10253_v9, %v4955_v27  ;;  %v16383_v35 = vpack.c.bf16 %v4965_v25, %v4961_v36 }
 0xc26   :  { %v13955_v1 = vadd.f32 %v4876_v15, %v4289_v0  ;;  %v16381_v0 = vsub.f32 %v10255_v34, %v4959_v61  ;;  %v16388_v15 = vsub.f32 %v10260_v14, %v4965_v25  ;;  %v5102_v14 = vand.u32 4294901760, %v16375_v42 }
 0xc27   :  { %v16284_v3 = vadd.f32 %v13954_v38, %v15722_v11  ;;  %v10246_v11 = vld [vmem:[%s17752_s8 + $0x88] sm:$0xff]  ;;  %v16385_v38 = vsub.f32 %v10258_v44, %v4961_v36  ;;  %v5090_v44 = vand.u32 4294901760, %v16373_v37  ;;  %v5096_v36 = vand.u32 4294901760, %v16379_v59 }
 0xc28   :  { %v16287_v26 = vadd.f32 %v13955_v1, %v15727_v56  ;;  %v10248_v56 = vld [vmem:[%s17752_s8 + $0x98] sm:$0xff]  ;;  %v4937_v50 = vand.u32 4294901760, %v10246_v11  ;;  %v16390_v1 = vpack.c.bf16 %v4967_v19, %v4963_v54  ;;  %v5103_v61 = vsub.f32 %v16375_v42, %v5102_v14 }
 0xc29   :  { %v4891_v17 = vmul.f32 %v16284_v3, %v16284_v3  ;;  %v4941_v57 = vand.u32 4294901760, %v10248_v56  ;;  %v5091_v27 = vsub.f32 %v16373_v37, %v5090_v44  ;;  %v5108_v25 = vand.u32 4294901760, %v16381_v0 }
 0xc2a   :  { %v4890_v43 = vmul.f32 %v16287_v26, %v16287_v26  ;;  %v16335_v62 = vsub.f32 %v10246_v11, %v4937_v50  ;;  %v17775_v11 = vand.u32 4294901760, %v16339_v20 }
 0xc2b   :  { %v4895_v30 = vsel %vm164_vm0, %v4891_v17, 0.0  ;;  %v16307_v48 = vpack.c.bf16 %v4941_v57, %v4937_v50  ;;  %v16337_v32 = vsub.f32 %v10248_v56, %v4941_v57  ;;  %v16392_v17 = vsub.f32 %v10257_v7, %v4963_v54 }
 0xc2c   :  { %4896 = vadd.xlane.f32.xlu1 %v4895_v30  ;;  %v4892_v58 = vsel %vm164_vm0, %v4890_v43, 0.0  ;;  %v16394_v43 = vsub.f32 %v10259_v51, %v4967_v19  ;;  %v5042_v30 = vand.u32 4294901760, %v16335_v62  ;;  %v17774_v56 = vand.u32 4294901760, %v16341_v23 }
 0xc2d   :  { %4893 = vadd.xlane.f32.xlu0 %v4892_v58  ;;  %13175 = vmatprep.subr.bf16.mxu1 %v16307_v48  ;;  %v17776_v58 = vand.u32 4294901760, %v16337_v32  ;;  %v5049_v60 = vsub.f32 %v16339_v20, %v17775_v11  ;;  %v5068_v7 = vand.u32 4294901760, %v5067_v46  ;;  %v5080_v51 = vand.u32 4294901760, %v5079_v28 }
 0xc2e   :  { %13177 = vmatpush1.bf16.msra.mxu1 %v16309_v16  ;;  %v5043_v50 = vsub.f32 %v16335_v62, %v5042_v30  ;;  %v5061_v33 = vsub.f32 %v16341_v23, %v17774_v56  ;;  %v16433_v19 = vpack.c.bf16 %v5086_v13, %v5074_v29 }
 0xc2f   :  { %13179 = vmatprep.subr.bf16.mxu1 %v16325_v52  ;;  %v5055_v57 = vsub.f32 %v16337_v32, %v17776_v58  ;;  %v5050_v53 = vand.u32 4294901760, %v5049_v60  ;;  %v16431_v54 = vpack.c.bf16 %v5080_v51, %v5068_v7  ;;  %v5097_v60 = vsub.f32 %v16379_v59, %v5096_v36 }
 0xc30   :  { %v5044_v31 = vand.u32 4294901760, %v5043_v50  ;;  %v5062_v49 = vand.u32 4294901760, %v5061_v33  ;;  %v5092_v50 = vand.u32 4294901760, %v5091_v27  ;;  %v5109_v33 = vsub.f32 %v16381_v0, %v5108_v25 }
 0xc31   :  { %v5056_v40 = vand.u32 4294901760, %v5055_v57  ;;  %v5104_v57 = vand.u32 4294901760, %v5103_v61  ;;  %v5098_v28 = vand.u32 4294901760, %v5097_v60  ;;  %v13210_v60 = vpack.c.bf16 %v16355_v47, %v16353_v21 }
 0xc32   :  { %13181 = vmatpush1.bf16.msra.mxu1 %v16327_v8  ;;  %v16423_v34 = vpack.c.bf16 %v5062_v49, %v5050_v53  ;;  %v5120_v53 = vand.u32 4294901760, %v16392_v17  ;;  %v5132_v49 = vand.u32 4294901760, %v16394_v43  ;;  %v5110_v22 = vand.u32 4294901760, %v5109_v33 }
 0xc33   :  { %13183 = vmatprep.subr.bf16.mxu1 %v16371_v12  ;;  %v13190_v9 = vpack.c.bf16 %v5056_v40, %v5044_v31  ;;  %v5114_v31 = vand.u32 4294901760, %v16385_v38  ;;  %v5126_v40 = vand.u32 4294901760, %v16388_v15  ;;  %v16441_v46 = vpack.c.bf16 %v5104_v57, %v5092_v50 }
 0xc34   :  { %v5121_v7 = vsub.f32 %v16392_v17, %v5120_v53  ;;  %v5133_v51 = vsub.f32 %v16394_v43, %v5132_v49  ;;  %v13200_v29 = vpack.c.bf16 %v5110_v22, %v5098_v28  ;;  %v13206_v50 = vpack.c.bf16 %v16337_v32, %v16335_v62 }
 0xc35   :  { %v5115_v4 = vsub.f32 %v16385_v38, %v5114_v31  ;;  %v13208_v57 = vpack.c.bf16 %v16341_v23, %v16339_v20  ;;  %v13212_v33 = vpack.c.bf16 %v16360_v45, %v16358_v24  ;;  %v13214_v28 = vpack.c.bf16 %v16375_v42, %v16373_v37 }
 0xc36   :  { %13185 = vmatpush1.bf16.msra.mxu1 %v16377_v6  ;;  %v5122_v61 = vand.u32 4294901760, %v5121_v7  ;;  %v5134_v56 = vand.u32 4294901760, %v5133_v51  ;;  %v13216_v22 = vpack.c.bf16 %v16381_v0, %v16379_v59  ;;  %v17807_v47 = vand.u32 4294901760, %v16339_v20 }
 0xc37   :  { %13187 = vmatprep.subr.bf16.mxu1 %v16383_v35  ;;  %v5116_v13 = vand.u32 4294901760, %v5115_v4  ;;  %v13220_v4 = vpack.c.bf16 %v16394_v43, %v16392_v17  ;;  %v17808_v24 = vand.u32 4294901760, %v16341_v23  ;;  %v16475_v37 = vpack.c.bf16 %v5078_v39, %v5066_v41  ;;  %v10244_v41 = vld [vmem:[%s17750_s6 + $0x1] ss:$0 sm:$0xff] }
 0xc38   :  { %v13204_v58 = vpack.c.bf16 %v5134_v56, %v5122_v61  ;;  %v13218_v56 = vpack.c.bf16 %v16388_v15, %v16385_v38  ;;  %v16477_v42 = vpack.c.bf16 %v5084_v10, %v5072_v18  ;;  %v16479_v59 = vpack.c.bf16 %v5102_v14, %v5090_v44 }
 0xc39   :  { %v16473_v45 = vpack.c.bf16 %v17808_v24, %v17807_v47  ;;  %v16481_v0 = vpack.c.bf16 %v5108_v25, %v5096_v36  ;;  %v16483_v38 = vpack.c.bf16 %v5126_v40, %v5114_v31  ;;  %v16485_v62 = vpack.c.bf16 %v5132_v49, %v5120_v53 }
 0xc3a   :  { %13189 = vmatpush1.bf16.msra.mxu1 %v16390_v1 }
 0xc3b   :  { %13191 = vmatprep.subr.bf16.mxu1 %v13190_v9  ;;  %v5127_v9 = vsub.f32 %v16388_v15, %v5126_v40 }
 0xc3d   :  { %v5128_v27 = vand.u32 4294901760, %v5127_v9  ;;  %v17806_v9 = vand.u32 4294901760, %v16337_v32 }
 0xc3f   :  { %v13202_v11 = vpack.c.bf16 %v5128_v27, %v5116_v13  ;;  %v16467_v21 = vpack.c.bf16 %v17806_v9, %v5042_v30 }
 0xcb9   :  { %v4897_v32 = vpop.xlane.xlu1 %4896 }
 0xcba   :  { %v4899_v15 = vmul.f32 0.015625, %v4897_v32  ;;  %v4894_v17 = vpop.xlane.xlu0 %4893 }
 0xcbb   :  { %v4898_v20 = vmul.f32 0.015625, %v4894_v17 }
 0xcbc   :  { %v4901_v43 = vadd.f32 1e-05, %v4899_v15 }
 0xcbd   :  { %v4900_v23 = vadd.f32 1e-05, %v4898_v20 }
 0xcbe   :  { %14315 = vrsqrt.f32 %v4901_v43 }
 0xcbf   :  { %14317 = vrsqrt.f32 %v4900_v23 }
 0xcc8   :  { %v14316_v30 = vpop.eup %14315 }
 0xcc9   :  { %v14318_v39 = vpop.eup %14317  ;;  %v4905_v18 = vmul.f32 %v14316_v30, %v16284_v3 }
 0xcca   :  { %v4904_v10 = vmul.f32 %v14318_v39, %v16287_v26 }
 0xccb   :  { %v4913_v44 = vmul.f32 %v10244_v41, %v4905_v18 }
 0xccc   :  { %v4912_v14 = vmul.f32 %v10244_v41, %v4904_v10 }
 0xccd   :  { %v4935_v36 = vsel %vm164_vm0, %v4913_v44, 0 }
 0xcce   :  { %v4932_v25 = vsel %vm164_vm0, %v4912_v14, 0  ;;  %v16494_v31 = vand.u32 4294901760, %v4935_v36 }
 0xccf   :  { %v16496_v40 = vand.u32 4294901760, %v4932_v25 }
 0xcd0   :  { %v5030_v53 = vsub.f32 %v4935_v36, %v16494_v31 }
 0xcd1   :  { %v5019_v49 = vsub.f32 %v4932_v25, %v16496_v40 }
 0xcd2   :  { %v5031_v51 = vand.u32 4294901760, %v5030_v53 }
 0xcd3   :  { %v5020_v7 = vand.u32 4294901760, %v5019_v49 }
 0xcd4   :  { %v5032_v61 = vsub.f32 %v5030_v53, %v5031_v51 }
 0xcd5   :  { %v5021_v13 = vsub.f32 %v5019_v49, %v5020_v7 }
 0xcd6   :  { %v5033_v9 = vand.u32 4294901760, %v5032_v61 }
 0xcd7   :  { %v5022_v27 = vand.u32 4294901760, %v5021_v13 }
 0xcd9   :  { %5023 = vmatmul.mubr.f32.vlgmr.msra.gmra.mrb[18].mxu1 %v5022_v27 }
 0xcda   :  { %13193 = vmatpush1.bf16.msra.mxu1 %v16423_v34  ;;  %5028 = vmatprep.mubr.f32.mxu1 %v17797_v55 }
 0xcdb   :  { %13195 = vmatprep.subr.bf16.mxu1 %v16431_v54 }
 0xcdd   :  { %5034 = vmatmul.mubr.f32.gmra.mrb[20].mxu1 %v5033_v9 }
 0xcde   :  { %13197 = vmatpush1.bf16.msra.mxu1 %v16433_v19  ;;  %5184 = vmatprep.mubr.f32.mxu1 %v17797_v55  ;;  %v14370_v19 = vld [vmem:[#allocation7 + $0x8] sm:$0xff] }
 0xcdf   :  { %13199 = vmatprep.subr.bf16.mxu1 %v16441_v46 }
 0xce2   :  { %13201 = vmatpush1.bf16.msra.mxu1 %v13200_v29 }
 0xce3   :  { %13203 = vmatprep.subr.bf16.mxu1 %v13202_v11  ;;  %v14369_v11 = vld [vmem:[#allocation7] sm:$0xff] }
 0xce6   :  { %13205 = vmatpush1.bf16.msra.mxu1 %v13204_v58 }
 0xce7   :  { %13207 = vmatprep.subr.bf16.mxu1 %v13206_v50 }
 0xce9   :  { %5186 = vmatmul.mubr.f32.vlgmr.msra.gmra.mrb[18].mxu1 %v16496_v40 }
 0xcea   :  { %13209 = vmatpush1.bf16.msra.mxu1 %v13208_v57  ;;  %5191 = vmatprep.mubr.f32.mxu1 %v17797_v55 }
 0xceb   :  { %13211 = vmatprep.subr.bf16.mxu1 %v13210_v60 }
 0xced   :  { %5193 = vmatmul.mubr.f32.gmra.mrb[20].mxu1 %v16494_v31 }
 0xcee   :  { %13213 = vmatpush1.bf16.msra.mxu1 %v13212_v33  ;;  %5295 = vmatprep.mubr.f32.mxu1 %v17797_v55  ;;  %v14371_v33 = vld [vmem:[#allocation2] sm:$0xff] }
 0xcef   :  { %13215 = vmatprep.subr.bf16.mxu1 %v13214_v28 }
 0xcf2   :  { %13217 = vmatpush1.bf16.msra.mxu1 %v13216_v22  ;;  %v14372_v22 = vld [vmem:[#allocation2 + $0x8] sm:$0xff] }
 0xcf3   :  { %13219 = vmatprep.subr.bf16.mxu1 %v13218_v56 }
 0xcf6   :  { %13221 = vmatpush1.bf16.msra.mxu1 %v13220_v4 }
 0xcf7   :  { %13223 = vmatprep.subr.bf16.mxu1 %v16307_v48 }
 0xcf9   :  { %5298 = vmatmul.mubr.f32.vlgmr.msra.gmra.mrb[18].mxu1 %v5019_v49 }
 0xcfa   :  { %13225 = vmatpush1.bf16.msra.mxu1 %v16309_v16  ;;  %5303 = vmatprep.mubr.f32.mxu1 %v17797_v55 }
 0xcfb   :  { %13227 = vmatprep.subr.bf16.mxu1 %v16325_v52 }
 0xcfd   :  { %5306 = vmatmul.mubr.f32.gmra.mrb[20].mxu1 %v5030_v53 }
 0xcfe   :  { %13229 = vmatpush1.bf16.msra.mxu1 %v16327_v8  ;;  %5392 = vmatprep.mubr.f32.mxu1 %v17797_v55 }
 0xcff   :  { %13231 = vmatprep.subr.bf16.mxu1 %v16371_v12 }
 0xd02   :  { %13233 = vmatpush1.bf16.msra.mxu1 %v16377_v6 }
 0xd03   :  { %13235 = vmatprep.subr.bf16.mxu1 %v16383_v35 }
 0xd06   :  { %13237 = vmatpush1.bf16.msra.mxu1 %v16390_v1 }
 0xd07   :  { %13239 = vmatprep.subr.bf16.mxu1 %v16467_v21 }
 0xd09   :  { %5396 = vmatmul.mubr.f32.vlgmr.msra.gmra.mrb[18].mxu1 %v5020_v7 }
 0xd0a   :  { %13241 = vmatpush1.bf16.msra.mxu1 %v16473_v45  ;;  %5401 = vmatprep.mubr.f32.mxu1 %v17797_v55 }
 0xd0b   :  { %13243 = vmatprep.subr.bf16.mxu1 %v16475_v37 }
 0xd0d   :  { %5405 = vmatmul.mubr.f32.gmra.mrb[20].mxu1 %v5031_v51 }
 0xd0e   :  { %13245 = vmatpush1.bf16.msra.mxu1 %v16477_v42  ;;  %5523 = vmatprep.mubr.f32.mxu1 %v17797_v55 }
 0xd0f   :  { %13247 = vmatprep.subr.bf16.mxu1 %v16479_v59 }
 0xd12   :  { %13249 = vmatpush1.bf16.msra.mxu1 %v16481_v0 }
 0xd13   :  { %13251 = vmatprep.subr.bf16.mxu1 %v16483_v38 }
 0xd16   :  { %13253 = vmatpush1.bf16.msra.mxu1 %v16485_v62 }
 0xd17   :  { %13255 = vmatprep.subr.bf16.mxu1 %v16307_v48 }
 0xd19   :  { %5525 = vmatmul.mubr.f32.vlgmr.msra.gmra.mrb[18].mxu1 %v16496_v40 }
 0xd1a   :  { %13257 = vmatpush1.bf16.msra.mxu1 %v16309_v16  ;;  %5530 = vmatprep.mubr.f32.mxu1 %v17797_v55 }
 0xd1b   :  { %13259 = vmatprep.subr.bf16.mxu1 %v16325_v52 }
 0xd1d   :  { %5532 = vmatmul.mubr.f32.gmra.mrb[20].mxu1 %v16494_v31 }
 0xd1e   :  { %13261 = vmatpush1.bf16.msra.mxu1 %v16327_v8  ;;  %5618 = vmatprep.mubr.f32.mxu1 %v17797_v55 }
 0xd1f   :  { %13263 = vmatprep.subr.bf16.mxu1 %v16371_v12 }
 0xd22   :  { %13265 = vmatpush1.bf16.msra.mxu1 %v16377_v6 }
 0xd23   :  { %13267 = vmatprep.subr.bf16.mxu1 %v16383_v35 }
 0xd26   :  { %13269 = vmatpush1.bf16.msra.mxu1 %v16390_v1  ;;  %v17809_v1 = vld [vmem:[#allocation20_spill] sm:$0xff] }
 0xd29   :  { %5620 = vmatmul.mubr.f32.vlgmr.msra.gmra.mrb[18].mxu1 %v16496_v40 }
 0xd2a   :  { %5625 = vmatprep.mubr.f32.mxu1 %v17797_v55 }
 0xd2d   :  { %5627 = vmatmul.mubr.f32.gmra.mrb[20].mxu1 %v16494_v31 }
 0xdfc   :  { %v5621_v48 = vpop.f32.mrb[18].mxu1 }
 0xdfd   :  { %v16545_v16 = vpop.f32.mrb[19].mxu1  ;;  %v5635_v58 = vmul.f32 %v5621_v48, %v17809_v1  ;;  %v5633_v28 = vmul.f32 %v14371_v33, %v5621_v48 }
 0xdfe   :  { %v5649_v52 = vmul.f32 %v16545_v16, %v15158_v63  ;;  %v5647_v63 = vmul.f32 %v14369_v11, %v16545_v16 }
 0xe00   :  { %5653 = vrot.lane.b32.xlu0 %v5649_v52, %s14581_s21  ;;  %v5628_v8 = vpop.f32.mrb[20].mxu1 }
 0xe01   :  { %v5636_v12 = vmul.f32 %v5628_v8, %v15175_v5  ;;  %v16551_v6 = vpop.f32.mrb[21].mxu1  ;;  %v5634_v56 = vmul.f32 %v14372_v22, %v5628_v8 }
 0xe02   :  { %v5650_v35 = vmul.f32 %v16551_v6, %v15167_v2  ;;  %v5648_v2 = vmul.f32 %v14370_v19, %v16551_v6 }
 0xe04   :  { %5641 = vrot.lane.b32.xlu0 %v5636_v12, %s14580_s4  ;;  %5655 = vrot.lane.b32.xlu1 %v5650_v35, %s14581_s21 }
 0xe08   :  { %5639 = vrot.lane.b32.xlu1 %v5635_v58, %s14580_s4 }
 0xe72   :  { %v5654_v34 = vpop.permute.xlu0 %5653 }
 0xe73   :  { %v5659_v54 = vadd.f32 %v5654_v34, %v5647_v63 }
 0xe75   :  { %v5703_v5 = vsel %vm976_vm1, %v5659_v54, 0  ;;  %5677 = vrot.lane.b32.xlu1 %v5659_v54, %s14582_s22 }
 0xe76   :  { %v5712_v46 = vand.u32 4294901760, %v5703_v5  ;;  %v5656_v29 = vpop.permute.xlu1 %5655  ;;  %v5642_v60 = vpop.permute.xlu0 %5641 }
 0xe77   :  { %v5660_v50 = vadd.f32 %v5656_v29, %v5648_v2  ;;  %v5646_v45 = vadd.f32 %v5642_v60, %v5634_v56 }
 0xe78   :  { %v5866_v57 = vsub.f32 %v5703_v5, %v5712_v46 }
 0xe79   :  { %v5705_v4 = vsel %vm976_vm1, %v5660_v50, 0  ;;  %5679 = vrot.lane.b32.xlu0 %v5660_v50, %s14582_s22  ;;  %v5689_v31 = vsel %vm976_vm1, %v5646_v45, 0 }
 0xe7a   :  { %v5867_v21 = vand.u32 4294901760, %v5866_v57  ;;  %v5715_v47 = vand.u32 4294901760, %v5705_v4  ;;  %v5640_v24 = vpop.permute.xlu1 %5639  ;;  %v16598_v7 = vand.u32 4294901760, %v5689_v31 }
 0xe7b   :  { %v5645_v37 = vadd.f32 %v5640_v24, %v5633_v28 }
 0xe7c   :  { %v16565_v42 = vpack.c.bf16 %v5715_v47, %v5712_v46  ;;  %v5873_v59 = vsub.f32 %v5705_v4, %v5715_v47  ;;  %v5868_v38 = vsub.f32 %v5866_v57, %v5867_v21  ;;  %v16613_v35 = vsub.f32 %v5689_v31, %v16598_v7 }
 0xe7d   :  { %v5687_v0 = vsel %vm976_vm1, %v5645_v37, 0  ;;  %5663 = vrot.lane.b32.xlu1 %v5645_v37, %s14582_s22  ;;  %5665 = vrot.lane.b32.xlu0 %v5646_v45, %s14582_s22 }
 0xe7e   :  { %v5874_v62 = vand.u32 4294901760, %v5873_v59  ;;  %v16570_v32 = vand.u32 4294901760, %v5687_v0  ;;  %13271 = vmatprep.subr.bf16.mxu1 %v16565_v42  ;;  %v16574_v15 = vpack.c.bf16 %v5873_v59, %v5866_v57  ;;  %v5869_v23 = vand.u32 4294901760, %v5868_v38 }
 0xe7f   :  { %13273 = vmatpush3.bf16.xpose.msra.mxu1 %v16565_v42  ;;  %v5796_v2 = vand.u32 4294901760, %v16613_v35 }
 0xe80   :  { %v5875_v17 = vsub.f32 %v5873_v59, %v5874_v62  ;;  %13275 = vmatprep.subr.bf16.mxu1 %v16565_v42  ;;  %v16578_v20 = vsub.f32 %v5687_v0, %v16570_v32  ;;  %v16580_v43 = vpack.c.bf16 %v5874_v62, %v5867_v21 }
 0xe81   :  { %5667 = vrot.lane.b32.xlu1 %v5645_v37, %s14581_s21  ;;  %5669 = vrot.lane.b32.xlu0 %v5646_v45, %s14581_s21  ;;  %v5797_v24 = vsub.f32 %v16613_v35, %v5796_v2 }
 0xe82   :  { %v5876_v30 = vand.u32 4294901760, %v5875_v17  ;;  %v5786_v41 = vand.u32 4294901760, %v16578_v20 }
 0xe83   :  { %v5798_v62 = vand.u32 4294901760, %v5797_v24 }
 0xe84   :  { %v5787_v39 = vsub.f32 %v16578_v20, %v5786_v41  ;;  %v16588_v18 = vpack.c.bf16 %v5876_v30, %v5869_v23 }
 0xe85   :  { %5671 = vrot.lane.b32.xlu1 %v5645_v37, %s14583_s2  ;;  %5673 = vrot.lane.b32.xlu0 %v5646_v45, %s14583_s2 }
 0xe86   :  { %v5788_v10 = vand.u32 4294901760, %v5787_v39 }
 0xe87   :  { %13277 = vmatpush3.bf16.xpose.msra.mxu1 %v16565_v42 }
 0xe88   :  { %11744 = vmatprep.mubr.f32.mxu1 %v5788_v10 }
 0xee7   :  { %v5678_v44 = vpop.permute.xlu1 %5677 }
 0xee8   :  { %v5707_v14 = vsel %vm976_vm1, %v5678_v44, 0 }
 0xee9   :  { %v5724_v36 = vand.u32 4294901760, %v5707_v14 }
 0xeeb   :  { %v5680_v25 = vpop.permute.xlu0 %5679  ;;  %v16596_v53 = vsub.f32 %v5707_v14, %v5724_v36 }
 0xeec   :  { %v5709_v40 = vsel %vm976_vm1, %v5680_v25, 0 }
 0xeed   :  { %v5727_v49 = vand.u32 4294901760, %v5709_v40  ;;  %v5895_v52 = vand.u32 4294901760, %v16596_v53 }
 0xeef   :  { %v16600_v51 = vpack.c.bf16 %v5727_v49, %v5724_v36  ;;  %v16602_v13 = vsub.f32 %v5709_v40, %v5727_v49  ;;  %v5664_v27 = vpop.permute.xlu1 %5663  ;;  %v5666_v61 = vpop.permute.xlu0 %5665  ;;  %v5896_v44 = vsub.f32 %v16596_v53, %v5895_v52 }
 0xef0   :  { %v5691_v9 = vsel %vm976_vm1, %v5664_v27, 0  ;;  %v5693_v48 = vsel %vm976_vm1, %v5666_v61, 0 }
 0xef1   :  { %v5902_v8 = vand.u32 4294901760, %v16602_v13  ;;  %v16608_v12 = vand.u32 4294901760, %v5691_v9  ;;  %13279 = vmatprep.subr.bf16.mxu1 %v16600_v51  ;;  %v16615_v1 = vand.u32 4294901760, %v5693_v48  ;;  %v5897_v27 = vand.u32 4294901760, %v5896_v44 }
 0xef2   :  { %13281 = vmatpush3.bf16.xpose.msra.mxu1 %v16600_v51 }
 0xef3   :  { %v5668_v58 = vpop.permute.xlu1 %5667  ;;  %v5670_v11 = vpop.permute.xlu0 %5669  ;;  %13283 = vmatprep.subr.bf16.mxu1 %v16600_v51  ;;  %v16618_v63 = vpack.c.bf16 %v5902_v8, %v5895_v52  ;;  %v16621_v34 = vsub.f32 %v5691_v9, %v16608_v12  ;;  %v16629_v46 = vsub.f32 %v5693_v48, %v16615_v1  ;;  %v5903_v10 = vsub.f32 %v16602_v13, %v5902_v8 }
 0xef4   :  { %v5695_v54 = vsel %vm976_vm1, %v5668_v58, 0  ;;  %v5697_v5 = vsel %vm976_vm1, %v5670_v11, 0 }
 0xef5   :  { %v16625_v19 = vand.u32 4294901760, %v5695_v54  ;;  %v16631_v29 = vand.u32 4294901760, %v5697_v5  ;;  %v5806_v60 = vand.u32 4294901760, %v16621_v34  ;;  %v5816_v4 = vand.u32 4294901760, %v16629_v46 }
 0xef6   :  { %v5904_v49 = vand.u32 4294901760, %v5903_v10 }
 0xef7   :  { %v5672_v50 = vpop.permute.xlu1 %5671  ;;  %v5674_v57 = vpop.permute.xlu0 %5673  ;;  %v16635_v33 = vsub.f32 %v5695_v54, %v16625_v19  ;;  %v16644_v21 = vsub.f32 %v5697_v5, %v16631_v29  ;;  %v5807_v59 = vsub.f32 %v16621_v34, %v5806_v60  ;;  %v5817_v17 = vsub.f32 %v16629_v46, %v5816_v4  ;;  %v14377_v54 = vld [vmem:[#allocation10 + $0x28] sm:$0xff] }
 0xef8   :  { %v5699_v28 = vsel %vm976_vm1, %v5672_v50, 0  ;;  %v5701_v22 = vsel %vm976_vm1, %v5674_v57, 0  ;;  %v13294_v52 = vpack.c.bf16 %v5904_v49, %v5897_v27 }
 0xef9   :  { %v16639_v56 = vand.u32 4294901760, %v5699_v28  ;;  %v16646_v47 = vand.u32 4294901760, %v5701_v22  ;;  %v5826_v45 = vand.u32 4294901760, %v16635_v33  ;;  %v5836_v0 = vand.u32 4294901760, %v16644_v21 }
 0xefa   :  { %13285 = vmatpush3.bf16.xpose.msra.mxu1 %v16600_v51  ;;  %v5808_v30 = vand.u32 4294901760, %v5807_v59  ;;  %v5818_v36 = vand.u32 4294901760, %v5817_v17 }
 0xefb   :  { %13287 = vmatprep.subr.bf16.mxu1 %v16588_v18  ;;  %v16654_v37 = vsub.f32 %v5699_v28, %v16639_v56  ;;  %v16661_v38 = vsub.f32 %v5701_v22, %v16646_v47  ;;  %v5827_v39 = vsub.f32 %v16635_v33, %v5826_v45  ;;  %v5837_v25 = vsub.f32 %v16644_v21, %v5836_v0  ;;  %v14380_v22 = vld [vmem:[#allocation10 + $0x30] sm:$0xff] }
 0xefd   :  { %v5846_v23 = vand.u32 4294901760, %v16654_v37  ;;  %v5856_v14 = vand.u32 4294901760, %v16661_v38  ;;  %v5828_v31 = vand.u32 4294901760, %v5827_v39  ;;  %v5838_v61 = vand.u32 4294901760, %v5837_v25 }
 0xeff   :  { %v5847_v40 = vsub.f32 %v16654_v37, %v5846_v23  ;;  %v5857_v9 = vsub.f32 %v16661_v38, %v5856_v14 }
 0xf01   :  { %11745 = vmatmul.mubr.f32.vlgmr.msra.gmra.mrb[22].mxu1 %v5798_v62  ;;  %v5848_v48 = vand.u32 4294901760, %v5847_v40  ;;  %v5858_v8 = vand.u32 4294901760, %v5857_v9 }
 0xf02   :  { %11747 = vmatprep.mubr.f32.mxu1 %v5808_v30  ;;  %13289 = vmatpush3.bf16.xpose.msra.mxu1 %v16588_v18 }
 0xf03   :  { %13291 = vmatprep.subr.bf16.mxu1 %v16588_v18 }
 0xf05   :  { %11748 = vmatmul.mubr.f32.gmra.mrb[24].mxu1 %v5818_v36 }
 0xf06   :  { %11750 = vmatprep.mubr.f32.mxu1 %v5828_v31 }
 0xf09   :  { %11751 = vmatmul.mubr.f32.gmra.mrb[26].mxu1 %v5838_v61 }
 0xf0a   :  { %11753 = vmatprep.mubr.f32.mxu1 %v5848_v48  ;;  %13293 = vmatpush3.bf16.xpose.msra.mxu1 %v16588_v18  ;;  %v13310_v18 = vpack.c.bf16 %v16602_v13, %v16596_v53  ;;  %v14375_v13 = vld [vmem:[#allocation10 + $0x18] sm:$0xff] }
 0xf0b   :  { %13295 = vmatprep.subr.bf16.mxu1 %v13294_v52 }
 0xf0d   :  { %11754 = vmatmul.mubr.f32.gmra.mrb[28].mxu1 %v5858_v8 }
 0xf0e   :  { %11772 = vmatprep.mubr.f32.mxu1 %v16570_v32 }
 0xf12   :  { %13297 = vmatpush3.bf16.xpose.msra.mxu1 %v13294_v52 }
 0xf13   :  { %13299 = vmatprep.subr.bf16.mxu1 %v13294_v52 }
 0xf1a   :  { %13301 = vmatpush3.bf16.xpose.msra.mxu1 %v13294_v52 }
 0xf1b   :  { %13303 = vmatprep.subr.bf16.mxu1 %v16574_v15 }
 0xf21   :  { %11773 = vmatmul.mubr.f32.vlgmr.msra.gmra.mrb[22].mxu1 %v16598_v7 }
 0xf22   :  { %11775 = vmatprep.mubr.f32.mxu1 %v16608_v12  ;;  %13305 = vmatpush3.bf16.xpose.msra.mxu1 %v16574_v15 }
 0xf23   :  { %13307 = vmatprep.subr.bf16.mxu1 %v16574_v15 }
 0xf25   :  { %11776 = vmatmul.mubr.f32.gmra.mrb[24].mxu1 %v16615_v1 }
 0xf26   :  { %11778 = vmatprep.mubr.f32.mxu1 %v16625_v19 }
 0xf29   :  { %11779 = vmatmul.mubr.f32.gmra.mrb[26].mxu1 %v16631_v29 }
 0xf2a   :  { %11781 = vmatprep.mubr.f32.mxu1 %v16639_v56  ;;  %13309 = vmatpush3.bf16.xpose.msra.mxu1 %v16574_v15 }
 0xf2b   :  { %13311 = vmatprep.subr.bf16.mxu1 %v13310_v18 }
 0xf2d   :  { %11782 = vmatmul.mubr.f32.gmra.mrb[28].mxu1 %v16646_v47 }
 0xf2e   :  { %11800 = vmatprep.mubr.f32.mxu1 %v16578_v20 }
 0xf32   :  { %13313 = vmatpush3.bf16.xpose.msra.mxu1 %v13310_v18 }
 0xf33   :  { %13315 = vmatprep.subr.bf16.mxu1 %v13310_v18 }
 0xf3a   :  { %13317 = vmatpush3.bf16.xpose.msra.mxu1 %v13310_v18 }
 0xf3b   :  { %13319 = vmatprep.subr.bf16.mxu1 %v16565_v42 }
 0xf41   :  { %11801 = vmatmul.mubr.f32.vlgmr.msra.gmra.mrb[22].mxu1 %v16613_v35 }
 0xf42   :  { %11803 = vmatprep.mubr.f32.mxu1 %v16621_v34  ;;  %13321 = vmatpush3.bf16.xpose.msra.mxu1 %v16565_v42 }
 0xf43   :  { %13323 = vmatprep.subr.bf16.mxu1 %v16565_v42 }
 0xf45   :  { %11804 = vmatmul.mubr.f32.gmra.mrb[24].mxu1 %v16629_v46 }
 0xf46   :  { %11806 = vmatprep.mubr.f32.mxu1 %v16635_v33 }
 0xf49   :  { %11807 = vmatmul.mubr.f32.gmra.mrb[26].mxu1 %v16644_v21 }
 0xf4a   :  { %11809 = vmatprep.mubr.f32.mxu1 %v16654_v37  ;;  %13325 = vmatpush3.bf16.xpose.msra.mxu1 %v16565_v42 }
 0xf4b   :  { %13327 = vmatprep.subr.bf16.mxu1 %v16600_v51 }
 0xf4d   :  { %11810 = vmatmul.mubr.f32.gmra.mrb[28].mxu1 %v16661_v38 }
 0xf4e   :  { %11828 = vmatprep.mubr.f32.mxu1 %v5786_v41 }
 0xf52   :  { %13329 = vmatpush3.bf16.xpose.msra.mxu1 %v16600_v51 }
 0xf53   :  { %13331 = vmatprep.subr.bf16.mxu1 %v16600_v51 }
 0xf5a   :  { %13333 = vmatpush3.bf16.xpose.msra.mxu1 %v16600_v51 }
 0xf5b   :  { %13335 = vmatprep.subr.bf16.mxu1 %v16580_v43 }
 0xf61   :  { %11829 = vmatmul.mubr.f32.vlgmr.msra.gmra.mrb[22].mxu1 %v5796_v2  ;;  %v14378_v2 = vld [vmem:[#allocation10 + $0x20] sm:$0xff] }
 0xf62   :  { %11831 = vmatprep.mubr.f32.mxu1 %v5806_v60  ;;  %13337 = vmatpush3.bf16.xpose.msra.mxu1 %v16580_v43  ;;  %v14379_v60 = vld [vmem:[#allocation10 + $0x38] sm:$0xff] }
 0xf63   :  { %13339 = vmatprep.subr.bf16.mxu1 %v16580_v43 }
 0xf65   :  { %11832 = vmatmul.mubr.f32.gmra.mrb[24].mxu1 %v5816_v4 }
 0xf66   :  { %11834 = vmatprep.mubr.f32.mxu1 %v5826_v45 }
 0xf69   :  { %11835 = vmatmul.mubr.f32.gmra.mrb[26].mxu1 %v5836_v0 }
 0xf6a   :  { %11837 = vmatprep.mubr.f32.mxu1 %v5846_v23  ;;  %13341 = vmatpush3.bf16.xpose.msra.mxu1 %v16580_v43  ;;  %v14374_v43 = vld [vmem:[#allocation10] sm:$0xff] }
 0xf6b   :  { %13343 = vmatprep.subr.bf16.mxu1 %v16618_v63 }
 0xf6d   :  { %11838 = vmatmul.mubr.f32.gmra.mrb[28].mxu1 %v5856_v14 }
 0xf6e   :  { %11856 = vmatprep.mubr.f32.mxu1 %v16570_v32 }
 0xf72   :  { %13345 = vmatpush3.bf16.xpose.msra.mxu1 %v16618_v63 }
 0xf73   :  { %13347 = vmatprep.subr.bf16.mxu1 %v16618_v63 }
 0xf7a   :  { %13349 = vmatpush3.bf16.xpose.msra.mxu1 %v16618_v63 }
 0xf7b   :  { %13351 = vmatprep.subr.bf16.mxu1 %v16565_v42 }
 0xf81   :  { %11857 = vmatmul.mubr.f32.vlgmr.msra.gmra.mrb[22].mxu1 %v16598_v7 }
 0xf82   :  { %11859 = vmatprep.mubr.f32.mxu1 %v16608_v12  ;;  %13353 = vmatpush3.bf16.xpose.msra.mxu1 %v16565_v42 }
 0xf83   :  { %13355 = vmatprep.subr.bf16.mxu1 %v16565_v42 }
 0xf85   :  { %11860 = vmatmul.mubr.f32.gmra.mrb[24].mxu1 %v16615_v1 }
 0xf86   :  { %11862 = vmatprep.mubr.f32.mxu1 %v16625_v19 }
 0xf89   :  { %11863 = vmatmul.mubr.f32.gmra.mrb[26].mxu1 %v16631_v29 }
 0xf8a   :  { %11865 = vmatprep.mubr.f32.mxu1 %v16639_v56  ;;  %13357 = vmatpush3.bf16.xpose.msra.mxu1 %v16565_v42 }
 0xf8b   :  { %13359 = vmatprep.subr.bf16.mxu1 %v16600_v51 }
 0xf8d   :  { %11866 = vmatmul.mubr.f32.gmra.mrb[28].mxu1 %v16646_v47 }
 0xf8e   :  { %11884 = vmatprep.mubr.f32.mxu1 %v16570_v32  ;;  %v14373_v32 = vld [vmem:[#allocation10 + $0x8] sm:$0xff] }
 0xf92   :  { %13361 = vmatpush3.bf16.xpose.msra.mxu1 %v16600_v51 }
 0xf93   :  { %13363 = vmatprep.subr.bf16.mxu1 %v16600_v51 }
 0xf9a   :  { %13365 = vmatpush3.bf16.xpose.msra.mxu1 %v16600_v51 }
 0xfa1   :  { %11885 = vmatmul.mubr.f32.vlgmr.msra.gmra.mrb[22].mxu1 %v16598_v7 }
 0xfa2   :  { %11887 = vmatprep.mubr.f32.mxu1 %v16608_v12 }
 0xfa5   :  { %11888 = vmatmul.mubr.f32.gmra.mrb[24].mxu1 %v16615_v1  ;;  %v14376_v1 = vld [vmem:[#allocation10 + $0x10] sm:$0xff] }
 0xfa6   :  { %11890 = vmatprep.mubr.f32.mxu1 %v16625_v19 }
 0xfa9   :  { %11891 = vmatmul.mubr.f32.gmra.mrb[26].mxu1 %v16631_v29 }
 0xfaa   :  { %11893 = vmatprep.mubr.f32.mxu1 %v16639_v56 }
 0xfad   :  { %11894 = vmatmul.mubr.f32.gmra.mrb[28].mxu1 %v16646_v47 }
 0xfae   :  { %8267 = vmatprep.mubr.f32.mxu1 %v17797_v55 }
0x1074   :  { %v11886_v42 = vpop.f32.mrb[22].mxu1 }
0x1075   :  { %v13956_v15 = vadd.f32 %v14373_v32, %v11886_v42  ;;  %v6503_v20 = vpop.f32.mrb[23].mxu1 }
0x1076   :  { %v13957_v41 = vadd.f32 %v14374_v43, %v6503_v20 }
0x1077   :  { %v6552_v53 = vsel %vm164_vm0, %v13956_v15, -inf }
0x1078   :  { %6553 = vmax.xlane.f32.xlu0 %v6552_v53  ;;  %v11889_v7 = vpop.f32.mrb[24].mxu1  ;;  %v6549_v51 = vsel %vm164_vm0, %v13957_v41, -inf }
0x1079   :  { %v13958_v12 = vadd.f32 %v14375_v13, %v11889_v7  ;;  %v6515_v35 = vpop.f32.mrb[25].mxu1  ;;  %6550 = vmax.xlane.f32.xlu1 %v6549_v51 }
0x107a   :  { %v13959_v58 = vadd.f32 %v14376_v1, %v6515_v35 }
0x107b   :  { %v6558_v11 = vsel %vm164_vm0, %v13958_v12, -inf }
0x107c   :  { %v11892_v63 = vpop.f32.mrb[26].mxu1  ;;  %v6555_v34 = vsel %vm164_vm0, %v13959_v58, -inf }
0x107d   :  { %v13960_v5 = vadd.f32 %v14377_v54, %v11892_v63  ;;  %v6527_v19 = vpop.f32.mrb[27].mxu1  ;;  %6556 = vmax.xlane.f32.xlu0 %v6555_v34  ;;  %6559 = vmax.xlane.f32.xlu1 %v6558_v11 }
0x107e   :  { %v13961_v46 = vadd.f32 %v14378_v2, %v6527_v19 }
0x107f   :  { %v6564_v29 = vsel %vm164_vm0, %v13960_v5, -inf }
0x1080   :  { %v11895_v50 = vpop.f32.mrb[28].mxu1  ;;  %v6561_v57 = vsel %vm164_vm0, %v13961_v46, -inf }
0x1081   :  { %v13962_v33 = vadd.f32 %v14379_v60, %v11895_v50  ;;  %v6539_v28 = vpop.f32.mrb[29].mxu1  ;;  %6562 = vmax.xlane.f32.xlu0 %v6561_v57  ;;  %6565 = vmax.xlane.f32.xlu1 %v6564_v29 }
0x1082   :  { %v13963_v56 = vadd.f32 %v14380_v22, %v6539_v28 }
0x1083   :  { %v6570_v4 = vsel %vm164_vm0, %v13962_v33, -inf }
0x1084   :  { %v6567_v21 = vsel %vm164_vm0, %v13963_v56, -inf }
0x1085   :  { %6568 = vmax.xlane.f32.xlu0 %v6567_v21  ;;  %6571 = vmax.xlane.f32.xlu1 %v6570_v4 }
0x1096   :  { %5685 = vrot.lane.b32.xlu1 %v16551_v6, %s14582_s22 }
0x109a   :  { %6639 = vrot.lane.b32.xlu1 %v16551_v6, %s14580_s4 }
0x109b   :  { %5683 = vrot.lane.b32.xlu0 %v16545_v16, %s14582_s22 }
0x109f   :  { %6637 = vrot.lane.b32.xlu0 %v16545_v16, %s14580_s4 }
0x1105   :  { %v6554_v47 = vpop.xlane.xlu0 %6553 }
0x1106   :  { %v6574_v24 = vsub.f32 %v13956_v15, %v6554_v47  ;;  %v6551_v45 = vpop.xlane.xlu1 %6550 }
0x1107   :  { %v6573_v37 = vsub.f32 %v13957_v41, %v6551_v45 }
0x1108   :  { %v6583_v59 = vmul.f32 1.442695, %v6574_v24 }
0x1109   :  { %v6581_v0 = vmul.f32 1.442695, %v6573_v37 }
0x110a   :  { %14319 = vpow2.f32 %v6583_v59  ;;  %v6557_v38 = vpop.xlane.xlu0 %6556  ;;  %v6560_v62 = vpop.xlane.xlu1 %6559 }
0x110b   :  { %14321 = vpow2.f32 %v6581_v0  ;;  %v6575_v17 = vsub.f32 %v13959_v58, %v6557_v38  ;;  %v6576_v23 = vsub.f32 %v13958_v12, %v6560_v62 }
0x110d   :  { %v6585_v30 = vmul.f32 1.442695, %v6575_v17  ;;  %v6587_v6 = vmul.f32 1.442695, %v6576_v23 }
0x110e   :  { %v6563_v39 = vpop.xlane.xlu0 %6562  ;;  %v6566_v10 = vpop.xlane.xlu1 %6565 }
0x110f   :  { %14323 = vpow2.f32 %v6585_v30  ;;  %v6577_v44 = vsub.f32 %v13961_v46, %v6563_v39  ;;  %v6578_v14 = vsub.f32 %v13960_v5, %v6566_v10 }
0x1110   :  { %14325 = vpow2.f32 %v6587_v6 }
0x1111   :  { %v6589_v16 = vmul.f32 1.442695, %v6577_v44  ;;  %v6591_v36 = vmul.f32 1.442695, %v6578_v14 }
0x1112   :  { %v6569_v25 = vpop.xlane.xlu0 %6568  ;;  %v6572_v31 = vpop.xlane.xlu1 %6571 }
0x1113   :  { %14327 = vpow2.f32 %v6589_v16  ;;  %v6579_v40 = vsub.f32 %v13963_v56, %v6569_v25  ;;  %v6580_v49 = vsub.f32 %v13962_v33, %v6572_v31 }
0x1114   :  { %v16780_v27 = vpop.eup %14319  ;;  %14329 = vpow2.f32 %v6591_v36 }
0x1115   :  { %v16782_v61 = vpop.eup %14321  ;;  %v6593_v9 = vmul.f32 1.442695, %v6579_v40  ;;  %v6595_v48 = vmul.f32 1.442695, %v6580_v49  ;;  %v6600_v52 = vsel %vm164_vm0, %v16780_v27, 0.0 }
0x1116   :  { %6601 = vadd.xlane.f32.xlu0 %v6600_v52  ;;  %v5684_v8 = vpop.permute.xlu0 %5683  ;;  %v5686_v18 = vpop.permute.xlu1 %5685  ;;  %v6597_v42 = vsel %vm164_vm0, %v16782_v61, 0.0 }
0x1117   :  { %14331 = vpow2.f32 %v6593_v9  ;;  %6598 = vadd.xlane.f32.xlu1 %v6597_v42 }
0x1118   :  { %14333 = vpow2.f32 %v6595_v48 }
0x1119   :  { %v16788_v32 = vpop.eup %14323 }
0x111a   :  { %v16790_v15 = vpop.eup %14325  ;;  %v6638_v20 = vpop.permute.xlu0 %6637  ;;  %v6603_v41 = vsel %vm164_vm0, %v16788_v32, 0.0 }
0x111b   :  { %v6640_v43 = vpop.permute.xlu1 %6639  ;;  %v6674_v53 = vand.u32 4294901760, %v6638_v20  ;;  %6604 = vadd.xlane.f32.xlu0 %v6603_v41  ;;  %v6606_v51 = vsel %vm164_vm0, %v16790_v15, 0.0 }
0x111c   :  { %v6677_v7 = vand.u32 4294901760, %v6640_v43  ;;  %6607 = vadd.xlane.f32.xlu1 %v6606_v51 }
0x111d   :  { %v16796_v13 = vpop.eup %14327  ;;  %v6828_v12 = vsub.f32 %v6638_v20, %v6674_v53 }
0x111e   :  { %v16798_v35 = vpack.c.bf16 %v6677_v7, %v6674_v53  ;;  %v6835_v1 = vsub.f32 %v6640_v43, %v6677_v7  ;;  %v16800_v58 = vpop.eup %14329  ;;  %v6609_v11 = vsel %vm164_vm0, %v16796_v13, 0.0 }
0x111f   :  { %v6829_v63 = vand.u32 4294901760, %v6828_v12  ;;  %6610 = vadd.xlane.f32.xlu0 %v6609_v11  ;;  %v6612_v5 = vsel %vm164_vm0, %v16800_v58, 0.0 }
0x1120   :  { %v6836_v34 = vand.u32 4294901760, %v6835_v1  ;;  %v16804_v54 = vpack.c.bf16 %v6835_v1, %v6828_v12  ;;  %13367 = vmatprep.subr.bf16.mxu0 %v16798_v35  ;;  %6613 = vadd.xlane.f32.xlu1 %v6612_v5 }
0x1121   :  { %13369 = vmatpush3.bf16.msra.mxu0 %v16798_v35  ;;  %v16810_v19 = vpop.eup %14331  ;;  %v6830_v2 = vsub.f32 %v6828_v12, %v6829_v63 }
0x1122   :  { %v6837_v46 = vsub.f32 %v6835_v1, %v6836_v34  ;;  %13371 = vmatprep.subr.bf16.mxu0 %v16798_v35  ;;  %v16813_v29 = vpack.c.bf16 %v6836_v34, %v6829_v63  ;;  %v16815_v50 = vpop.eup %14333  ;;  %v6615_v57 = vsel %vm164_vm0, %v16810_v19, 0.0 }
0x1123   :  { %v6831_v60 = vand.u32 4294901760, %v6830_v2  ;;  %6616 = vadd.xlane.f32.xlu0 %v6615_v57  ;;  %v6618_v28 = vsel %vm164_vm0, %v16815_v50, 0.0 }
0x1124   :  { %v6838_v33 = vand.u32 4294901760, %v6837_v46  ;;  %6619 = vadd.xlane.f32.xlu1 %v6618_v28 }
0x1125   :  { %13373 = vmatpush3.bf16.msra.mxu0 %v16798_v35 }
0x1126   :  { %v16822_v22 = vpack.c.bf16 %v6838_v33, %v6831_v60 }
0x1135   :  { %6641 = vrot.lane.b32.xlu1 %v5684_v8, %s14580_s4 }
0x1139   :  { %6643 = vrot.lane.b32.xlu0 %v5686_v18, %s14580_s4 }
0x11a3   :  { %v6602_v56 = vpop.xlane.xlu0 %6601 }
0x11a4   :  { %14335 = vrcp.f32 %v6602_v56  ;;  %v6599_v4 = vpop.xlane.xlu1 %6598 }
0x11a5   :  { %14337 = vrcp.f32 %v6599_v4 }
0x11a8   :  { %v6605_v21 = vpop.xlane.xlu0 %6604 }
0x11a9   :  { %14339 = vrcp.f32 %v6605_v21  ;;  %v6608_v47 = vpop.xlane.xlu1 %6607 }
0x11aa   :  { %14341 = vrcp.f32 %v6608_v47 }
0x11ac   :  { %v6611_v24 = vpop.xlane.xlu0 %6610 }
0x11ad   :  { %14343 = vrcp.f32 %v6611_v24  ;;  %v6614_v45 = vpop.xlane.xlu1 %6613 }
0x11ae   :  { %v14336_v37 = vpop.eup %14335  ;;  %14345 = vrcp.f32 %v6614_v45 }
0x11af   :  { %v14338_v59 = vpop.eup %14337  ;;  %v6624_v0 = vmul.f32 %v14336_v37, %v16780_v27 }
0x11b0   :  { %v6622_v38 = vmul.f32 %v14338_v59, %v16782_v61  ;;  %v6617_v62 = vpop.xlane.xlu0 %6616 }
0x11b1   :  { %14347 = vrcp.f32 %v6617_v62  ;;  %v6620_v17 = vpop.xlane.xlu1 %6619  ;;  %v6653_v23 = vsel %vm164_vm0, %v6624_v0, 0 }
0x11b2   :  { %14349 = vrcp.f32 %v6620_v17  ;;  %v6650_v30 = vsel %vm164_vm0, %v6622_v38, 0  ;;  %v16830_v6 = vand.u32 4294901760, %v6653_v23 }
0x11b3   :  { %v14340_v39 = vpop.eup %14339  ;;  %v16832_v10 = vand.u32 4294901760, %v6650_v30 }
0x11b4   :  { %v14342_v44 = vpop.eup %14341  ;;  %v6626_v14 = vmul.f32 %v14340_v39, %v16788_v32  ;;  %v6644_v16 = vpop.permute.xlu0 %6643  ;;  %v16836_v36 = vsub.f32 %v6653_v23, %v16830_v6 }
0x11b5   :  { %v6628_v25 = vmul.f32 %v14342_v44, %v16790_v15  ;;  %v6689_v31 = vand.u32 4294901760, %v6644_v16  ;;  %v6642_v40 = vpop.permute.xlu1 %6641  ;;  %v16840_v49 = vsub.f32 %v6650_v30, %v16832_v10 }
0x11b6   :  { %v6686_v27 = vand.u32 4294901760, %v6642_v40  ;;  %v6656_v61 = vsel %vm164_vm0, %v6626_v14, 0  ;;  %v6758_v43 = vand.u32 4294901760, %v16836_v36 }
0x11b7   :  { %v14344_v9 = vpop.eup %14343  ;;  %v16843_v48 = vsub.f32 %v6644_v16, %v6689_v31  ;;  %v6748_v52 = vand.u32 4294901760, %v16840_v49  ;;  %v16846_v8 = vand.u32 4294901760, %v6656_v61  ;;  %v6659_v18 = vsel %vm164_vm0, %v6628_v25, 0 }
0x11b8   :  { %v14346_v42 = vpop.eup %14345  ;;  %v6630_v32 = vmul.f32 %v14344_v9, %v16796_v13  ;;  %v16850_v15 = vpack.c.bf16 %v6689_v31, %v6686_v27  ;;  %v16852_v20 = vsub.f32 %v6642_v40, %v6686_v27  ;;  %v16865_v13 = vand.u32 4294901760, %v6659_v18 }
0x11b9   :  { %v6632_v41 = vmul.f32 %v14346_v42, %v16800_v58  ;;  %v6864_v53 = vand.u32 4294901760, %v16843_v48  ;;  %v6749_v7 = vsub.f32 %v16840_v49, %v6748_v52  ;;  %v16861_v51 = vsub.f32 %v6656_v61, %v16846_v8 }
0x11ba   :  { %v6857_v12 = vand.u32 4294901760, %v16852_v20  ;;  %13375 = vmatprep.subr.bf16.mxu0 %v16850_v15  ;;  %v6662_v63 = vsel %vm164_vm0, %v6630_v32, 0  ;;  %v6759_v2 = vsub.f32 %v16836_v36, %v6758_v43  ;;  %v16876_v46 = vsub.f32 %v6659_v18, %v16865_v13 }
0x11bb   :  { %v14348_v1 = vpop.eup %14347  ;;  %13377 = vmatpush3.bf16.msra.mxu0 %v16850_v15  ;;  %v6750_v11 = vand.u32 4294901760, %v6749_v7  ;;  %v6768_v58 = vand.u32 4294901760, %v16861_v51  ;;  %v16878_v57 = vand.u32 4294901760, %v6662_v63  ;;  %v6865_v33 = vsub.f32 %v16843_v48, %v6864_v53 }
0x11bc   :  { %v14350_v34 = vpop.eup %14349  ;;  %v6634_v5 = vmul.f32 %v14348_v1, %v16810_v19  ;;  %13379 = vmatprep.subr.bf16.mxu0 %v16850_v15  ;;  %v6665_v28 = vsel %vm164_vm0, %v6632_v41, 0  ;;  %v6858_v56 = vsub.f32 %v16852_v20, %v6857_v12  ;;  %v6778_v4 = vand.u32 4294901760, %v16876_v46 }
0x11bd   :  { %v6636_v60 = vmul.f32 %v14350_v34, %v16815_v50  ;;  %11912 = vmatprep.mubr.f32.mxu0 %v6750_v11  ;;  %v6769_v19 = vsub.f32 %v16861_v51, %v6768_v58  ;;  %v16893_v21 = vsub.f32 %v6662_v63, %v16878_v57  ;;  %v16895_v50 = vand.u32 4294901760, %v6665_v28 }
0x11be   :  { %v6668_v24 = vsel %vm164_vm0, %v6634_v5, 0  ;;  %v6760_v37 = vand.u32 4294901760, %v6759_v2  ;;  %v6779_v59 = vsub.f32 %v16876_v46, %v6778_v4  ;;  %v6866_v23 = vand.u32 4294901760, %v6865_v33  ;;  %v10267_v5 = vld [vmem:[%s17753_s9 + $0x70] sm:$0xff]  ;;  %v10268_v2 = vld [vmem:[%s17753_s9 + $0x78] sm:$0xff] }
0x11bf   :  { %13381 = vmatpush3.bf16.msra.mxu0 %v16850_v15  ;;  %v6770_v47 = vand.u32 4294901760, %v6769_v19  ;;  %v6671_v45 = vsel %vm164_vm0, %v6636_v60, 0  ;;  %v6788_v0 = vand.u32 4294901760, %v16893_v21  ;;  %v16906_v38 = vsub.f32 %v6665_v28, %v16895_v50 }
0x11c0   :  { %13383 = vmatprep.subr.bf16.mxu0 %v16822_v22  ;;  %v16908_v62 = vand.u32 4294901760, %v6668_v24  ;;  %v16910_v17 = vand.u32 4294901760, %v6671_v45  ;;  %v6859_v30 = vand.u32 4294901760, %v6858_v56  ;;  %v6780_v25 = vand.u32 4294901760, %v6779_v59 }
0x11c1   :  { %v6789_v39 = vsub.f32 %v16893_v21, %v6788_v0  ;;  %v6798_v44 = vand.u32 4294901760, %v16906_v38  ;;  %v7578_v60 = vand.u32 4294901760, %v10268_v2 }
0x11c2   :  { %11913 = vmatmul.mubr.f32.vlgmr.msra.gmra.mrb[16].mxu0 %v6760_v37  ;;  %v16918_v14 = vsub.f32 %v6668_v24, %v16908_v62  ;;  %v16921_v16 = vsub.f32 %v6671_v45, %v16910_v17  ;;  %v13390_v9 = vpack.c.bf16 %v6866_v23, %v6859_v30 }
0x11c3   :  { %11915 = vmatprep.mubr.f32.mxu0 %v6770_v47  ;;  %13385 = vmatpush3.bf16.msra.mxu0 %v16822_v22  ;;  %v6790_v31 = vand.u32 4294901760, %v6789_v39  ;;  %v6799_v40 = vsub.f32 %v16906_v38, %v6798_v44 }
0x11c4   :  { %13387 = vmatprep.subr.bf16.mxu0 %v16822_v22  ;;  %v6808_v27 = vand.u32 4294901760, %v16918_v14  ;;  %v6818_v61 = vand.u32 4294901760, %v16921_v16 }
0x11c5   :  { %v6800_v42 = vand.u32 4294901760, %v6799_v40 }
0x11c6   :  { %11916 = vmatmul.mubr.f32.gmra.mrb[18].mxu0 %v6780_v25  ;;  %v6809_v18 = vsub.f32 %v16918_v14, %v6808_v27  ;;  %v6819_v32 = vsub.f32 %v16921_v16, %v6818_v61 }
0x11c7   :  { %11918 = vmatprep.mubr.f32.mxu0 %v6790_v31  ;;  %13389 = vmatpush3.bf16.msra.mxu0 %v16822_v22  ;;  %v13406_v22 = vpack.c.bf16 %v16843_v48, %v16852_v20  ;;  %v10264_v48 = vld [vmem:[%s17753_s9 + $0x58] sm:$0xff] }
0x11c8   :  { %13391 = vmatprep.subr.bf16.mxu0 %v13390_v9  ;;  %v6810_v41 = vand.u32 4294901760, %v6809_v18  ;;  %v6820_v7 = vand.u32 4294901760, %v6819_v32 }
0x11ca   :  { %11919 = vmatmul.mubr.f32.gmra.mrb[20].mxu0 %v6800_v42 }
0x11cb   :  { %11921 = vmatprep.mubr.f32.mxu0 %v6810_v41  ;;  %13393 = vmatpush3.bf16.msra.mxu0 %v13390_v9 }
0x11cc   :  { %13395 = vmatprep.subr.bf16.mxu0 %v13390_v9 }
0x11ce   :  { %11922 = vmatmul.mubr.f32.gmra.mrb[22].mxu0 %v6820_v7 }
0x11cf   :  { %13397 = vmatpush3.bf16.msra.mxu0 %v13390_v9  ;;  %11940 = vmatprep.mubr.f32.mxu0 %v16832_v10 }
0x11d0   :  { %13399 = vmatprep.subr.bf16.mxu0 %v16804_v54 }
0x11d2   :  { %11941 = vmatmul.mubr.f32.vlgmr.msra.gmra.mrb[16].mxu0 %v16830_v6 }
0x11d3   :  { %11943 = vmatprep.mubr.f32.mxu0 %v16846_v8  ;;  %13401 = vmatpush3.bf16.msra.mxu0 %v16804_v54 }
0x11d4   :  { %13403 = vmatprep.subr.bf16.mxu0 %v16804_v54 }
0x11d6   :  { %11944 = vmatmul.mubr.f32.gmra.mrb[18].mxu0 %v16865_v13 }
0x11d7   :  { %11946 = vmatprep.mubr.f32.mxu0 %v16878_v57  ;;  %13405 = vmatpush3.bf16.msra.mxu0 %v16804_v54  ;;  %v13438_v54 = vpack.c.bf16 %v6864_v53, %v6857_v12  ;;  %v10265_v53 = vld [vmem:[%s17753_s9 + $0x60] sm:$0xff] }
0x11d8   :  { %13407 = vmatprep.subr.bf16.mxu0 %v13406_v22 }
0x11da   :  { %11947 = vmatmul.mubr.f32.gmra.mrb[20].mxu0 %v16895_v50 }
0x11db   :  { %11949 = vmatprep.mubr.f32.mxu0 %v16908_v62  ;;  %13409 = vmatpush3.bf16.msra.mxu0 %v13406_v22 }
0x11dc   :  { %13411 = vmatprep.subr.bf16.mxu0 %v13406_v22 }
0x11de   :  { %11950 = vmatmul.mubr.f32.gmra.mrb[22].mxu0 %v16910_v17 }
0x11df   :  { %13413 = vmatpush3.bf16.msra.mxu0 %v13406_v22  ;;  %11968 = vmatprep.mubr.f32.mxu0 %v16840_v49  ;;  %v10263_v49 = vld [vmem:[%s17753_s9 + $0x50] sm:$0xff] }
0x11e0   :  { %13415 = vmatprep.subr.bf16.mxu0 %v16798_v35 }
0x11e2   :  { %11969 = vmatmul.mubr.f32.vlgmr.msra.gmra.mrb[16].mxu0 %v16836_v36 }
0x11e3   :  { %11971 = vmatprep.mubr.f32.mxu0 %v16861_v51  ;;  %13417 = vmatpush3.bf16.msra.mxu0 %v16798_v35  ;;  %v10266_v51 = vld [vmem:[%s17753_s9 + $0x68] sm:$0xff] }
0x11e4   :  { %13419 = vmatprep.subr.bf16.mxu0 %v16798_v35  ;;  %v7572_v1 = vand.u32 4294901760, %v10266_v51 }
0x11e6   :  { %11972 = vmatmul.mubr.f32.gmra.mrb[18].mxu0 %v16876_v46  ;;  %v7686_v30 = vsub.f32 %v10266_v51, %v7572_v1 }
0x11e7   :  { %11974 = vmatprep.mubr.f32.mxu0 %v16893_v21  ;;  %13421 = vmatpush3.bf16.msra.mxu0 %v16798_v35 }
0x11e8   :  { %13423 = vmatprep.subr.bf16.mxu0 %v16850_v15 }
0x11ea   :  { %11975 = vmatmul.mubr.f32.gmra.mrb[20].mxu0 %v16906_v38 }
0x11eb   :  { %11977 = vmatprep.mubr.f32.mxu0 %v16918_v14  ;;  %13425 = vmatpush3.bf16.msra.mxu0 %v16850_v15 }
0x11ec   :  { %13427 = vmatprep.subr.bf16.mxu0 %v16850_v15 }
0x11ee   :  { %11978 = vmatmul.mubr.f32.gmra.mrb[22].mxu0 %v16921_v16  ;;  %v7687_v16 = vand.u32 4294901760, %v7686_v30 }
0x11ef   :  { %13429 = vmatpush3.bf16.msra.mxu0 %v16850_v15  ;;  %11996 = vmatprep.mubr.f32.mxu0 %v6748_v52 }
0x11f0   :  { %13431 = vmatprep.subr.bf16.mxu0 %v16813_v29  ;;  %v7688_v40 = vsub.f32 %v7686_v30, %v7687_v16 }
0x11f2   :  { %11997 = vmatmul.mubr.f32.vlgmr.msra.gmra.mrb[16].mxu0 %v6758_v43  ;;  %v7689_v42 = vand.u32 4294901760, %v7688_v40 }
0x11f3   :  { %11999 = vmatprep.mubr.f32.mxu0 %v6768_v58  ;;  %13433 = vmatpush3.bf16.msra.mxu0 %v16813_v29 }
0x11f4   :  { %13435 = vmatprep.subr.bf16.mxu0 %v16813_v29 }
0x11f6   :  { %12000 = vmatmul.mubr.f32.gmra.mrb[18].mxu0 %v6778_v4 }
0x11f7   :  { %12002 = vmatprep.mubr.f32.mxu0 %v6788_v0  ;;  %13437 = vmatpush3.bf16.msra.mxu0 %v16813_v29  ;;  %v10262_v29 = vld [vmem:[%s17753_s9 + $0x48] sm:$0xff] }
0x11f8   :  { %13439 = vmatprep.subr.bf16.mxu0 %v13438_v54 }
0x11fa   :  { %12003 = vmatmul.mubr.f32.gmra.mrb[20].mxu0 %v6798_v44 }
0x11fb   :  { %12005 = vmatprep.mubr.f32.mxu0 %v6808_v27  ;;  %13441 = vmatpush3.bf16.msra.mxu0 %v13438_v54 }
0x11fc   :  { %13443 = vmatprep.subr.bf16.mxu0 %v13438_v54 }
0x11fe   :  { %12006 = vmatmul.mubr.f32.gmra.mrb[22].mxu0 %v6818_v61  ;;  %v7700_v61 = vsub.f32 %v10268_v2, %v7578_v60 }
0x11ff   :  { %13445 = vmatpush3.bf16.msra.mxu0 %v13438_v54  ;;  %12024 = vmatprep.mubr.f32.mxu0 %v16832_v10 }
0x1200   :  { %13447 = vmatprep.subr.bf16.mxu0 %v16798_v35  ;;  %v7701_v41 = vand.u32 4294901760, %v7700_v61 }
0x1202   :  { %12025 = vmatmul.mubr.f32.vlgmr.msra.gmra.mrb[16].mxu0 %v16830_v6  ;;  %v7702_v54 = vsub.f32 %v7700_v61, %v7701_v41 }
0x1203   :  { %12027 = vmatprep.mubr.f32.mxu0 %v16846_v8  ;;  %13449 = vmatpush3.bf16.msra.mxu0 %v16798_v35 }
0x1204   :  { %13451 = vmatprep.subr.bf16.mxu0 %v16798_v35 }
0x1206   :  { %12028 = vmatmul.mubr.f32.gmra.mrb[18].mxu0 %v16865_v13 }
0x1207   :  { %12030 = vmatprep.mubr.f32.mxu0 %v16878_v57  ;;  %13453 = vmatpush3.bf16.msra.mxu0 %v16798_v35  ;;  %v10261_v35 = vld [vmem:[%s17753_s9 + $0x40] sm:$0xff] }
0x1208   :  { %13455 = vmatprep.subr.bf16.mxu0 %v16850_v15 }
0x120a   :  { %12031 = vmatmul.mubr.f32.gmra.mrb[20].mxu0 %v16895_v50 }
0x120b   :  { %12033 = vmatprep.mubr.f32.mxu0 %v16908_v62  ;;  %13457 = vmatpush3.bf16.msra.mxu0 %v16850_v15 }
0x120c   :  { %13459 = vmatprep.subr.bf16.mxu0 %v16850_v15 }
0x120e   :  { %12034 = vmatmul.mubr.f32.gmra.mrb[22].mxu0 %v16910_v17 }
0x120f   :  { %13461 = vmatpush3.bf16.msra.mxu0 %v16850_v15  ;;  %12052 = vmatprep.mubr.f32.mxu0 %v16832_v10  ;;  %v7560_v10 = vand.u32 4294901760, %v10262_v29  ;;  %v7566_v15 = vand.u32 4294901760, %v10264_v48 }
0x1211   :  { %v7658_v34 = vsub.f32 %v10262_v29, %v7560_v10  ;;  %v7672_v47 = vsub.f32 %v10264_v48, %v7566_v15  ;;  %v7703_v29 = vand.u32 4294901760, %v7702_v54 }
0x1212   :  { %12053 = vmatmul.mubr.f32.vlgmr.msra.gmra.mrb[16].mxu0 %v16830_v6  ;;  %v7557_v6 = vand.u32 4294901760, %v10261_v35 }
0x1213   :  { %12055 = vmatprep.mubr.f32.mxu0 %v16846_v8  ;;  %v7563_v8 = vand.u32 4294901760, %v10263_v49  ;;  %v7659_v19 = vand.u32 4294901760, %v7658_v34  ;;  %v7673_v38 = vand.u32 4294901760, %v7672_v47 }
0x1214   :  { %v17016_v36 = vpack.c.bf16 %v7560_v10, %v7557_v6  ;;  %v7651_v63 = vsub.f32 %v10261_v35, %v7557_v6 }
0x1215   :  { %v17030_v43 = vpack.c.bf16 %v7566_v15, %v7563_v8  ;;  %v7660_v21 = vsub.f32 %v7658_v34, %v7659_v19  ;;  %v7674_v39 = vsub.f32 %v7672_v47, %v7673_v38 }
0x1216   :  { %12056 = vmatmul.mubr.f32.gmra.mrb[18].mxu0 %v16865_v13  ;;  %13463 = vmatprep.subr.bf16.mxu0 %v17016_v36  ;;  %v7569_v13 = vand.u32 4294901760, %v10265_v53  ;;  %v7652_v33 = vand.u32 4294901760, %v7651_v63  ;;  %v13494_v10 = vpack.c.bf16 %v7658_v34, %v7651_v63 }
0x1217   :  { %12058 = vmatprep.mubr.f32.mxu0 %v16878_v57  ;;  %13465 = vmatpush3.bf16.msra.mxu0 %v17016_v36  ;;  %v7575_v57 = vand.u32 4294901760, %v10267_v5  ;;  %v7661_v37 = vand.u32 4294901760, %v7660_v21  ;;  %v7675_v25 = vand.u32 4294901760, %v7674_v39  ;;  %v8168_v39 = vld [vmem:[#allocation11 + $0x98] sm:$0xff] }
0x1218   :  { %13467 = vmatprep.subr.bf16.mxu0 %v17030_v43  ;;  %v17042_v58 = vpack.c.bf16 %v7572_v1, %v7569_v13  ;;  %v7653_v4 = vsub.f32 %v7651_v63, %v7652_v33  ;;  %v7679_v23 = vsub.f32 %v10265_v53, %v7569_v13  ;;  %v13526_v15 = vpack.c.bf16 %v7659_v19, %v7652_v33 }
0x1219   :  { %v17054_v56 = vpack.c.bf16 %v7578_v60, %v7575_v57  ;;  %v7693_v27 = vsub.f32 %v10267_v5, %v7575_v57 }
0x121a   :  { %12059 = vmatmul.mubr.f32.gmra.mrb[20].mxu0 %v16895_v50  ;;  %v7665_v50 = vsub.f32 %v10263_v49, %v7563_v8  ;;  %v7654_v45 = vand.u32 4294901760, %v7653_v4  ;;  %v7680_v14 = vand.u32 4294901760, %v7679_v23  ;;  %v13502_v48 = vpack.c.bf16 %v7686_v30, %v7679_v23  ;;  %v8166_v30 = vld [vmem:[#allocation11 + $0x88] sm:$0xff] }
0x121b   :  { %12061 = vmatprep.mubr.f32.mxu0 %v16908_v62  ;;  %13469 = vmatpush3.bf16.msra.mxu0 %v17030_v43  ;;  %v7694_v32 = vand.u32 4294901760, %v7693_v27  ;;  %v13506_v8 = vpack.c.bf16 %v7700_v61, %v7693_v27  ;;  %v8172_v61 = vld [vmem:[#allocation11 + $0xb8] sm:$0xff] }
0x121c   :  { %13471 = vmatprep.subr.bf16.mxu0 %v17042_v58  ;;  %v7666_v59 = vand.u32 4294901760, %v7665_v50  ;;  %v13478_v62 = vpack.c.bf16 %v7661_v37, %v7654_v45  ;;  %v7681_v31 = vsub.f32 %v7679_v23, %v7680_v14  ;;  %v13498_v49 = vpack.c.bf16 %v7672_v47, %v7665_v50 }
0x121d   :  { %v7695_v22 = vsub.f32 %v7693_v27, %v7694_v32  ;;  %v13534_v51 = vpack.c.bf16 %v7687_v16, %v7680_v14  ;;  %v8165_v14 = vld [vmem:[#allocation11 + $0x80] sm:$0xff]  ;;  %v8167_v16 = vld [vmem:[#allocation11 + $0x90] sm:$0xff]  ;;  %v8170_v27 = vld [vmem:[#allocation11 + $0xa8] sm:$0xff] }
0x121e   :  { %12062 = vmatmul.mubr.f32.gmra.mrb[22].mxu0 %v16910_v17  ;;  %v7667_v17 = vsub.f32 %v7665_v50, %v7666_v59  ;;  %v7682_v18 = vand.u32 4294901760, %v7681_v31  ;;  %v13530_v53 = vpack.c.bf16 %v7673_v38, %v7666_v59 }
0x121f   :  { %13473 = vmatpush3.bf16.msra.mxu0 %v17042_v58  ;;  %v7696_v35 = vand.u32 4294901760, %v7695_v22 }
0x1220   :  { %13475 = vmatprep.subr.bf16.mxu0 %v17054_v56  ;;  %v7668_v44 = vand.u32 4294901760, %v7667_v17  ;;  %v13486_v7 = vpack.c.bf16 %v7689_v42, %v7682_v18  ;;  %v8199_v18 = vand.u32 4294901760, %v8172_v61  ;;  %v8169_v42 = vld [vmem:[#allocation11 + $0xa0] sm:$0xff] }
0x1221   :  { %v13490_v6 = vpack.c.bf16 %v7703_v29, %v7696_v35  ;;  %v8174_v35 = vld [vmem:[#allocation11 + $0xc8] sm:$0xff]  ;;  %v8176_v29 = vld [vmem:[#allocation11 + $0xd8] sm:$0xff] }
0x1222   :  { %v13482_v9 = vpack.c.bf16 %v7675_v25, %v7668_v44  ;;  %v8191_v44 = vand.u32 4294901760, %v8168_v39  ;;  %v8193_v25 = vand.u32 4294901760, %v8167_v16 }
0x1223   :  { %13477 = vmatpush3.bf16.msra.mxu0 %v17054_v56 }
0x1224   :  { %13479 = vmatprep.subr.bf16.mxu0 %v13478_v62 }
0x12e5   :  { %v17024_v52 = vpop.f32.mrb[16].mxu0 }
0x12e6   :  { %v17027_v20 = vpop.f32.mrb[17].mxu0 }
0x12e9   :  { %v12057_v12 = vpop.f32.mrb[18].mxu0 }
0x12ea   :  { %7515 = vrot.lane.b32.xlu0 %v12057_v12, %s14573_s16  ;;  %v7477_v11 = vpop.f32.mrb[19].mxu0  ;;  %v17060_v12 = vpack.c.bf16 %v7701_v41, %v7694_v32  ;;  %v8171_v32 = vld [vmem:[#allocation11 + $0xb0] sm:$0xff]  ;;  %v8197_v41 = vand.u32 4294901760, %v8169_v42 }
0x12eb   :  { %7513 = vrot.lane.b32.xlu1 %v7477_v11, %s14573_s16 }
0x12ed   :  { %v12060_v46 = vpop.f32.mrb[20].mxu0 }
0x12ee   :  { %7523 = vrot.lane.b32.xlu0 %v12060_v46, %s14579_s24  ;;  %v7489_v28 = vpop.f32.mrb[21].mxu0 }
0x12ef   :  { %7521 = vrot.lane.b32.xlu1 %v7489_v28, %s14579_s24 }
0x12f1   :  { %v12063_v24 = vpop.f32.mrb[22].mxu0 }
0x12f2   :  { %7531 = vrot.lane.b32.xlu0 %v12063_v24, %s14584_s13  ;;  %v7501_v0 = vpop.f32.mrb[23].mxu0 }
0x12f3   :  { %7529 = vrot.lane.b32.xlu1 %v7501_v0, %s14584_s13 }
0x135c   :  { %v7516_v13 = vpop.permute.xlu0 %7515 }
0x135d   :  { %v7514_v1 = vpop.permute.xlu1 %7513  ;;  %v7536_v2 = vsel %vm976_vm1, %v17024_v52, %v7516_v13  ;;  %v8180_v13 = vld [vmem:[#allocation11 + $0xf8] sm:$0xff] }
0x135e   :  { %v7535_v46 = vsel %vm976_vm1, %v17027_v20, %v7514_v1  ;;  %v8177_v1 = vld [vmem:[#allocation11 + $0xe0] sm:$0xff] }
0x1360   :  { %v7524_v11 = vpop.permute.xlu0 %7523 }
0x1361   :  { %v7522_v5 = vpop.permute.xlu1 %7521  ;;  %v7538_v63 = vsel %vm2827_vm2, %v7536_v2, %v7524_v11  ;;  %v17126_v2 = vsub.f32 %v8169_v42, %v8197_v41 }
0x1362   :  { %v7537_v57 = vsel %vm2827_vm2, %v7535_v46, %v7522_v5  ;;  %v17124_v5 = vsub.f32 %v8172_v61, %v8199_v18 }
0x1364   :  { %v7532_v34 = vpop.permute.xlu0 %7531 }
0x1365   :  { %v7540_v60 = vsel %vm2830_vm3, %v7538_v63, %v7532_v34  ;;  %v7530_v33 = vpop.permute.xlu1 %7529  ;;  %v8179_v63 = vld [vmem:[#allocation11 + $0xf0] sm:$0xff] }
0x1366   :  { %v7554_v19 = vsel %vm164_vm0, %v7540_v60, 0  ;;  %v7539_v28 = vsel %vm2830_vm3, %v7537_v57, %v7530_v33 }
0x1367   :  { %v7639_v4 = vand.u32 4294901760, %v7554_v19  ;;  %v7551_v21 = vsel %vm164_vm0, %v7539_v28, 0 }
0x1368   :  { %v7629_v50 = vand.u32 4294901760, %v7551_v21 }
0x1369   :  { %v7640_v52 = vsub.f32 %v7554_v19, %v7639_v4 }
0x136a   :  { %v7630_v47 = vsub.f32 %v7551_v21, %v7629_v50  ;;  %v8213_v21 = vand.u32 4294901760, %v8177_v1 }
0x136b   :  { %v7641_v24 = vand.u32 4294901760, %v7640_v52 }
0x136c   :  { %v7631_v20 = vand.u32 4294901760, %v7630_v47 }
0x136d   :  { %v7642_v45 = vsub.f32 %v7640_v52, %v7641_v24 }
0x136e   :  { %v7632_v37 = vsub.f32 %v7630_v47, %v7631_v20 }
0x136f   :  { %v7643_v0 = vand.u32 4294901760, %v7642_v45 }
0x1370   :  { %v7633_v59 = vand.u32 4294901760, %v7632_v37 }
0x1372   :  { %12080 = vmatprep.mubr.f32.mxu0 %v7633_v59 }
0x1373   :  { %12081 = vmatmul.mubr.f32.vlgmr.msra.gmra.mrb[24].mxu0 %v7643_v0 }
0x1374   :  { %13481 = vmatpush3.bf16.msra.mxu0 %v13478_v62  ;;  %12099 = vmatprep.mubr.f32.mxu0 %v7629_v50 }
0x1375   :  { %13483 = vmatprep.subr.bf16.mxu0 %v13482_v9 }
0x1378   :  { %13485 = vmatpush3.bf16.msra.mxu0 %v13482_v9  ;;  %v8195_v9 = vand.u32 4294901760, %v8170_v27 }
0x1379   :  { %13487 = vmatprep.subr.bf16.mxu0 %v13486_v7 }
0x137a   :  { %v17108_v22 = vpack.c.bf16 %v8199_v18, %v8195_v9  ;;  %v17122_v11 = vsub.f32 %v8170_v27, %v8195_v9 }
0x137c   :  { %13489 = vmatpush3.bf16.msra.mxu0 %v13486_v7  ;;  %v8201_v7 = vand.u32 4294901760, %v8171_v32 }
0x137d   :  { %13491 = vmatprep.subr.bf16.mxu0 %v13490_v6 }
0x137e   :  { %v17110_v54 = vpack.c.bf16 %v8201_v7, %v8197_v41  ;;  %v17128_v46 = vsub.f32 %v8171_v32, %v8201_v7 }
0x1380   :  { %13493 = vmatpush3.bf16.msra.mxu0 %v13490_v6  ;;  %v8203_v6 = vand.u32 4294901760, %v8174_v35 }
0x1381   :  { %13495 = vmatprep.subr.bf16.mxu0 %v13494_v10 }
0x1382   :  { %v17132_v57 = vsub.f32 %v8174_v35, %v8203_v6 }
0x1383   :  { %12100 = vmatmul.mubr.f32.vlgmr.msra.gmra.mrb[24].mxu0 %v7639_v4 }
0x1384   :  { %13497 = vmatpush3.bf16.msra.mxu0 %v13494_v10  ;;  %12118 = vmatprep.mubr.f32.mxu0 %v7630_v47  ;;  %v8207_v10 = vand.u32 4294901760, %v8176_v29  ;;  %v8340_v35 = vand.u32 4294901760, %v17132_v57 }
0x1385   :  { %13499 = vmatprep.subr.bf16.mxu0 %v13498_v49 }
0x1386   :  { %v17130_v34 = vpack.c.bf16 %v8207_v10, %v8203_v6  ;;  %v17134_v60 = vsub.f32 %v8176_v29, %v8207_v10 }
0x1388   :  { %13501 = vmatpush3.bf16.msra.mxu0 %v13498_v49  ;;  %v8173_v49 = vld [vmem:[#allocation11 + $0xc0] sm:$0xff] }
0x1389   :  { %13503 = vmatprep.subr.bf16.mxu0 %v13502_v48  ;;  %v8205_v33 = vand.u32 4294901760, %v8173_v49 }
0x138c   :  { %13505 = vmatpush3.bf16.msra.mxu0 %v13502_v48  ;;  %v8175_v48 = vld [vmem:[#allocation11 + $0xd0] sm:$0xff] }
0x138d   :  { %13507 = vmatprep.subr.bf16.mxu0 %v13506_v8  ;;  %v8209_v19 = vand.u32 4294901760, %v8175_v48 }
0x138f   :  { %v17143_v45 = vsub.f32 %v8175_v48, %v8209_v19 }
0x1390   :  { %13509 = vmatpush3.bf16.msra.mxu0 %v13506_v8 }
0x1391   :  { %13511 = vmatprep.subr.bf16.mxu0 %v17016_v36 }
0x1393   :  { %12119 = vmatmul.mubr.f32.vlgmr.msra.gmra.mrb[24].mxu0 %v7640_v52  ;;  %v8217_v52 = vand.u32 4294901760, %v8179_v63 }
0x1394   :  { %13513 = vmatpush3.bf16.msra.mxu0 %v17016_v36  ;;  %12137 = vmatprep.mubr.f32.mxu0 %v7631_v20  ;;  %v17141_v20 = vpack.c.bf16 %v8209_v19, %v8205_v33  ;;  %v8358_v19 = vand.u32 4294901760, %v17143_v45 }
0x1395   :  { %13515 = vmatprep.subr.bf16.mxu0 %v17030_v43 }
0x1398   :  { %13517 = vmatpush3.bf16.msra.mxu0 %v17030_v43 }
0x1399   :  { %13519 = vmatprep.subr.bf16.mxu0 %v17042_v58 }
0x139c   :  { %13521 = vmatpush3.bf16.msra.mxu0 %v17042_v58 }
0x139d   :  { %13523 = vmatprep.subr.bf16.mxu0 %v17054_v56 }
0x13a0   :  { %13525 = vmatpush3.bf16.msra.mxu0 %v17054_v56 }
0x13a1   :  { %13527 = vmatprep.subr.bf16.mxu0 %v13526_v15 }
0x13a3   :  { %12138 = vmatmul.mubr.f32.vlgmr.msra.gmra.mrb[24].mxu0 %v7641_v24 }
0x13a4   :  { %13529 = vmatpush3.bf16.msra.mxu0 %v13526_v15  ;;  %12156 = vmatprep.mubr.f32.mxu0 %v7629_v50  ;;  %v17115_v15 = vsub.f32 %v8168_v39, %v8191_v44  ;;  %v8316_v39 = vand.u32 4294901760, %v17122_v11 }
0x13a5   :  { %13531 = vmatprep.subr.bf16.mxu0 %v13530_v53 }
0x13a6   :  { %v8304_v24 = vand.u32 4294901760, %v17115_v15  ;;  %v8317_v61 = vsub.f32 %v17122_v11, %v8316_v39 }
0x13a8   :  { %13533 = vmatpush3.bf16.msra.mxu0 %v13530_v53  ;;  %v8318_v29 = vand.u32 4294901760, %v8317_v61 }
0x13a9   :  { %13535 = vmatprep.subr.bf16.mxu0 %v13534_v51 }
0x13ac   :  { %13537 = vmatpush3.bf16.msra.mxu0 %v13534_v51  ;;  %v17119_v51 = vsub.f32 %v8167_v16, %v8193_v25 }
0x13ad   :  { %13539 = vmatprep.subr.bf16.mxu0 %v17060_v12 }
0x13b0   :  { %13541 = vmatpush3.bf16.msra.mxu0 %v17060_v12  ;;  %v8178_v12 = vld [vmem:[#allocation11 + $0xe8] sm:$0xff] }
0x13b1   :  { %13543 = vmatprep.subr.bf16.mxu0 %v17016_v36  ;;  %v8211_v28 = vand.u32 4294901760, %v8178_v12 }
0x13b3   :  { %12157 = vmatmul.mubr.f32.vlgmr.msra.gmra.mrb[24].mxu0 %v7639_v4  ;;  %v17147_v59 = vsub.f32 %v8178_v12, %v8211_v28  ;;  %v8341_v12 = vsub.f32 %v17132_v57, %v8340_v35 }
0x13b4   :  { %13545 = vmatpush3.bf16.msra.mxu0 %v17016_v36  ;;  %12175 = vmatprep.mubr.f32.mxu0 %v7629_v50  ;;  %v17137_v50 = vsub.f32 %v8173_v49, %v8205_v33 }
0x13b5   :  { %13547 = vmatprep.subr.bf16.mxu0 %v17030_v43 }
0x13b8   :  { %13549 = vmatpush3.bf16.msra.mxu0 %v17030_v43 }
0x13b9   :  { %13551 = vmatprep.subr.bf16.mxu0 %v17042_v58 }
0x13bc   :  { %13553 = vmatpush3.bf16.msra.mxu0 %v17042_v58 }
0x13bd   :  { %13555 = vmatprep.subr.bf16.mxu0 %v17054_v56 }
0x13c0   :  { %13557 = vmatpush3.bf16.msra.mxu0 %v17054_v56 }
0x13c3   :  { %12176 = vmatmul.mubr.f32.vlgmr.msra.gmra.mrb[24].mxu0 %v7639_v4  ;;  %v8215_v4 = vand.u32 4294901760, %v8180_v13 }
0x13c5   :  { %v17145_v37 = vpack.c.bf16 %v8215_v4, %v8211_v28  ;;  %v17149_v0 = vsub.f32 %v8180_v13, %v8215_v4  ;;  %v8352_v13 = vand.u32 4294901760, %v17134_v60  ;;  %v8342_v28 = vand.u32 4294901760, %v8341_v12 }
0x13c7   :  { %v8353_v4 = vsub.f32 %v17134_v60, %v8352_v13 }
0x1496   :  { %v12177_v38 = vpop.f32.mrb[24].mxu0 }
0x1497   :  { %v17091_v62 = vadd.f32 %v12177_v38, %v16284_v3  ;;  %v8126_v17 = vpop.f32.mrb[25].mxu0  ;;  %v8187_v3 = vand.u32 4294901760, %v8166_v30  ;;  %v17151_v38 = vpack.c.bf16 %v8217_v52, %v8213_v21 }
0x1498   :  { %v17094_v36 = vadd.f32 %v8126_v17, %v16287_v26  ;;  %v8189_v26 = vand.u32 4294901760, %v8165_v14  ;;  %v17153_v17 = vsub.f32 %v8177_v1, %v8213_v21  ;;  %v8346_v1 = vand.u32 4294901760, %v17137_v50 }
0x1499   :  { %v8141_v43 = vmul.f32 %v17091_v62, %v17091_v62  ;;  %v17102_v31 = vpack.c.bf16 %v8191_v44, %v8187_v3  ;;  %v17113_v8 = vsub.f32 %v8166_v30, %v8187_v3  ;;  %v17777_v30 = vand.u32 4294901760, %v17119_v51 }
0x149a   :  { %v8140_v23 = vmul.f32 %v17094_v36, %v17094_v36  ;;  %v17104_v40 = vpack.c.bf16 %v8193_v25, %v8189_v26  ;;  %v17117_v53 = vsub.f32 %v8165_v14, %v8189_v26  ;;  %v8328_v3 = vand.u32 4294901760, %v17124_v5 }
0x149b   :  { %v8145_v58 = vsel %vm164_vm0, %v8141_v43, 0.0  ;;  %13559 = vmatprep.subr.bf16.mxu1 %v17102_v31  ;;  %v8292_v47 = vand.u32 4294901760, %v17113_v8  ;;  %v17155_v43 = vsub.f32 %v8179_v63, %v8217_v52  ;;  %v8322_v44 = vand.u32 4294901760, %v17126_v2 }
0x149c   :  { %8146 = vadd.xlane.f32.xlu0 %v8145_v58  ;;  %v8142_v56 = vsel %vm164_vm0, %v8140_v23, 0.0  ;;  %13561 = vmatpush1.bf16.msra.mxu1 %v17104_v40  ;;  %v8305_v58 = vsub.f32 %v17115_v15, %v8304_v24  ;;  %v8334_v14 = vand.u32 4294901760, %v17128_v46  ;;  %v8311_v27 = vsub.f32 %v17119_v51, %v17777_v30 }
0x149d   :  { %8143 = vadd.xlane.f32.xlu1 %v8142_v56  ;;  %13563 = vmatprep.subr.bf16.mxu1 %v17108_v22  ;;  %v8293_v23 = vsub.f32 %v17113_v8, %v8292_v47  ;;  %v17778_v56 = vand.u32 4294901760, %v17117_v53  ;;  %v8329_v9 = vsub.f32 %v17124_v5, %v8328_v3  ;;  %v8323_v18 = vsub.f32 %v17126_v2, %v8322_v44 }
0x149e   :  { %v8306_v26 = vand.u32 4294901760, %v8305_v58  ;;  %v8335_v42 = vsub.f32 %v17128_v46, %v8334_v14  ;;  %v8312_v7 = vand.u32 4294901760, %v8311_v27  ;;  %v8347_v21 = vsub.f32 %v17137_v50, %v8346_v1 }
0x149f   :  { %v8294_v16 = vand.u32 4294901760, %v8293_v23  ;;  %v8299_v25 = vsub.f32 %v17117_v53, %v17778_v56  ;;  %v8330_v6 = vand.u32 4294901760, %v8329_v9  ;;  %v8324_v10 = vand.u32 4294901760, %v8323_v18 }
0x14a0   :  { %13565 = vmatpush1.bf16.msra.mxu1 %v17110_v54  ;;  %v8336_v49 = vand.u32 4294901760, %v8335_v42  ;;  %v8364_v52 = vand.u32 4294901760, %v17147_v59  ;;  %v8359_v23 = vsub.f32 %v17143_v45, %v8358_v19  ;;  %v8376_v58 = vand.u32 4294901760, %v17149_v0 }
0x14a1   :  { %13567 = vmatprep.subr.bf16.mxu1 %v17130_v34  ;;  %v13574_v32 = vpack.c.bf16 %v8306_v26, %v8294_v16  ;;  %v8300_v41 = vand.u32 4294901760, %v8299_v25  ;;  %v17188_v63 = vpack.c.bf16 %v8330_v6, %v8318_v29  ;;  %v8370_v16 = vand.u32 4294901760, %v17153_v17 }
0x14a2   :  { %v17190_v33 = vpack.c.bf16 %v8336_v49, %v8324_v10  ;;  %v8382_v26 = vand.u32 4294901760, %v17155_v43  ;;  %v8354_v25 = vand.u32 4294901760, %v8353_v4  ;;  %v8348_v27 = vand.u32 4294901760, %v8347_v21 }
0x14a3   :  { %v17183_v48 = vpack.c.bf16 %v8312_v7, %v8300_v41  ;;  %v8365_v61 = vsub.f32 %v17147_v59, %v8364_v52  ;;  %v8360_v9 = vand.u32 4294901760, %v8359_v23  ;;  %v8377_v18 = vsub.f32 %v17149_v0, %v8376_v58 }
0x14a4   :  { %13569 = vmatpush1.bf16.msra.mxu1 %v17141_v20  ;;  %v8371_v42 = vsub.f32 %v17153_v17, %v8370_v16  ;;  %v13582_v41 = vpack.c.bf16 %v8354_v25, %v8342_v28  ;;  %v13590_v4 = vpack.c.bf16 %v17115_v15, %v17113_v8  ;;  %v13592_v21 = vpack.c.bf16 %v17119_v51, %v17117_v53 }
0x14a5   :  { %13571 = vmatprep.subr.bf16.mxu1 %v17145_v37  ;;  %v8366_v7 = vand.u32 4294901760, %v8365_v61  ;;  %v13584_v29 = vpack.c.bf16 %v8360_v9, %v8348_v27  ;;  %v8378_v6 = vand.u32 4294901760, %v8377_v18  ;;  %v13594_v23 = vpack.c.bf16 %v17124_v5, %v17122_v11 }
0x14a6   :  { %v8372_v10 = vand.u32 4294901760, %v8371_v42  ;;  %v13596_v56 = vpack.c.bf16 %v17128_v46, %v17126_v2  ;;  %v13598_v28 = vpack.c.bf16 %v17134_v60, %v17132_v57  ;;  %v13600_v25 = vpack.c.bf16 %v17143_v45, %v17137_v50 }
0x14a7   :  { %v13586_v12 = vpack.c.bf16 %v8378_v6, %v8366_v7  ;;  %v13602_v27 = vpack.c.bf16 %v17149_v0, %v17147_v59  ;;  %v13604_v61 = vpack.c.bf16 %v17155_v43, %v17153_v17  ;;  %v17224_v11 = vpack.c.bf16 %v8304_v24, %v8292_v47  ;;  %v10278_v6 = vld [vmem:[%s17755_s11 + $0xb8] sm:$0xff] }
0x14a8   :  { %13573 = vmatpush1.bf16.msra.mxu1 %v17151_v38  ;;  %v17810_v5 = vand.u32 4294901760, %v17117_v53  ;;  %v17811_v2 = vand.u32 4294901760, %v17119_v51  ;;  %v17232_v57 = vpack.c.bf16 %v8328_v3, %v8316_v39  ;;  %v17234_v60 = vpack.c.bf16 %v8334_v14, %v8322_v44 }
0x14a9   :  { %13575 = vmatprep.subr.bf16.mxu1 %v13574_v32  ;;  %v8383_v32 = vsub.f32 %v17155_v43, %v8382_v26  ;;  %v17236_v50 = vpack.c.bf16 %v8352_v13, %v8340_v35  ;;  %v17238_v45 = vpack.c.bf16 %v8358_v19, %v8346_v1  ;;  %v17240_v59 = vpack.c.bf16 %v8376_v58, %v8364_v52  ;;  %v10270_v43 = vld [vmem:[%s17751_s7 + $0x1] ss:$0 sm:$0xff] }
0x14aa   :  { %v17230_v46 = vpack.c.bf16 %v17811_v2, %v17810_v5  ;;  %v17242_v8 = vpack.c.bf16 %v8382_v26, %v8370_v16 }
0x14ab   :  { %v8384_v49 = vand.u32 4294901760, %v8383_v32 }
0x14ad   :  { %v13588_v30 = vpack.c.bf16 %v8384_v49, %v8372_v10  ;;  %v8936_v49 = vand.u32 4294901760, %v10278_v6 }
0x1529   :  { %v8147_v15 = vpop.xlane.xlu0 %8146 }
0x152a   :  { %v8149_v47 = vmul.f32 0.015625, %v8147_v15  ;;  %v8144_v24 = vpop.xlane.xlu1 %8143  ;;  %v17398_v15 = vld [vmem:[%s17755_s11 + $0xf0] sm:$0xff] }
0x152b   :  { %v8148_v53 = vmul.f32 0.015625, %v8144_v24  ;;  %v8957_v24 = vand.u32 4294901760, %v17398_v15 }
0x152c   :  { %v8151_v0 = vadd.f32 1e-05, %v8149_v47  ;;  %v17403_v47 = vld [vmem:[%s17755_s11 + $0xf8] sm:$0xff] }
0x152d   :  { %v8150_v51 = vadd.f32 1e-05, %v8148_v53  ;;  %v8960_v53 = vand.u32 4294901760, %v17403_v47 }
0x152e   :  { %14351 = vrsqrt.f32 %v8151_v0 }
0x152f   :  { %14353 = vrsqrt.f32 %v8150_v51 }
0x1538   :  { %v14352_v17 = vpop.eup %14351 }
0x1539   :  { %v14354_v39 = vpop.eup %14353  ;;  %v8155_v3 = vmul.f32 %v14352_v17, %v17091_v62  ;;  %v17415_v17 = vpack.c.bf16 %v8960_v53, %v8957_v24 }
0x153a   :  { %v8154_v44 = vmul.f32 %v14354_v39, %v17094_v36 }
0x153b   :  { %v8163_v14 = vmul.f32 %v10270_v43, %v8155_v3 }
0x153c   :  { %v8162_v35 = vmul.f32 %v10270_v43, %v8154_v44 }
0x153d   :  { %v8185_v13 = vsel %vm164_vm0, %v8163_v14, 0 }
0x153e   :  { %v8182_v1 = vsel %vm164_vm0, %v8162_v35, 0  ;;  %v17251_v19 = vand.u32 4294901760, %v8185_v13 }
0x153f   :  { %v17253_v52 = vand.u32 4294901760, %v8182_v1 }
0x1540   :  { %v8280_v58 = vsub.f32 %v8185_v13, %v17251_v19 }
0x1541   :  { %v8269_v16 = vsub.f32 %v8182_v1, %v17253_v52 }
0x1542   :  { %v8281_v9 = vand.u32 4294901760, %v8280_v58 }
0x1543   :  { %v8270_v26 = vand.u32 4294901760, %v8269_v16 }
0x1544   :  { %v8282_v32 = vsub.f32 %v8280_v58, %v8281_v9 }
0x1545   :  { %v8271_v18 = vsub.f32 %v8269_v16, %v8270_v26 }
0x1546   :  { %v8283_v7 = vand.u32 4294901760, %v8282_v32 }
0x1547   :  { %v8272_v42 = vand.u32 4294901760, %v8271_v18 }
0x1549   :  { %8273 = vmatmul.mubr.f32.vlgmr.msra.gmra.mrb[30].mxu1 %v8272_v42 }
0x154a   :  { %13577 = vmatpush1.bf16.msra.mxu1 %v17183_v48  ;;  %8278 = vmatprep.mubr.f32.mxu1 %v17797_v55  ;;  %v10276_v48 = vld [vmem:[%s17755_s11 + $0xa8] sm:$0xff] }
0x154b   :  { %13579 = vmatprep.subr.bf16.mxu1 %v17188_v63 }
0x154d   :  { %8284 = vmatmul.mubr.f32.gmra.mrb[32].mxu1 %v8283_v7 }
0x154e   :  { %13581 = vmatpush1.bf16.msra.mxu1 %v17190_v33  ;;  %8434 = vmatprep.mubr.f32.mxu1 %v17797_v55  ;;  %v8930_v33 = vand.u32 4294901760, %v10276_v48 }
0x154f   :  { %13583 = vmatprep.subr.bf16.mxu1 %v13582_v41 }
0x1552   :  { %13585 = vmatpush1.bf16.msra.mxu1 %v13584_v29  ;;  %v10277_v29 = vld [vmem:[%s17755_s11 + $0xb0] sm:$0xff] }
0x1553   :  { %13587 = vmatprep.subr.bf16.mxu1 %v13586_v12  ;;  %v8933_v10 = vand.u32 4294901760, %v10277_v29 }
0x1555   :  { %v17337_v12 = vpack.c.bf16 %v8936_v49, %v8933_v10 }
0x1556   :  { %13589 = vmatpush1.bf16.msra.mxu1 %v13588_v30  ;;  %v10275_v30 = vld [vmem:[%s17755_s11 + $0xa0] sm:$0xff] }
0x1557   :  { %13591 = vmatprep.subr.bf16.mxu1 %v13590_v4  ;;  %v8927_v63 = vand.u32 4294901760, %v10275_v30  ;;  %v17342_v4 = vld [vmem:[%s17755_s11 + $0xc0] sm:$0xff] }
0x1559   :  { %8436 = vmatmul.mubr.f32.vlgmr.msra.gmra.mrb[30].mxu1 %v17253_v52  ;;  %v17327_v41 = vpack.c.bf16 %v8930_v33, %v8927_v63 }
0x155a   :  { %13593 = vmatpush1.bf16.msra.mxu1 %v13592_v21  ;;  %8441 = vmatprep.mubr.f32.mxu1 %v17797_v55  ;;  %v17347_v21 = vld [vmem:[%s17755_s11 + $0xc8] sm:$0xff] }
0x155b   :  { %13595 = vmatprep.subr.bf16.mxu1 %v13594_v23  ;;  %v8939_v23 = vand.u32 4294901760, %v17342_v4 }
0x155d   :  { %8443 = vmatmul.mubr.f32.gmra.mrb[32].mxu1 %v17251_v19 }
0x155e   :  { %13597 = vmatpush1.bf16.msra.mxu1 %v13596_v56  ;;  %8545 = vmatprep.mubr.f32.mxu1 %v17797_v55 }
0x155f   :  { %13599 = vmatprep.subr.bf16.mxu1 %v13598_v28  ;;  %v8942_v28 = vand.u32 4294901760, %v17347_v21 }
0x1562   :  { %13601 = vmatpush1.bf16.msra.mxu1 %v13600_v25  ;;  %v17353_v25 = vpack.c.bf16 %v8942_v28, %v8939_v23 }
0x1563   :  { %13603 = vmatprep.subr.bf16.mxu1 %v13602_v27  ;;  %v17358_v27 = vld [vmem:[%s17755_s11 + $0xd0] sm:$0xff] }
0x1566   :  { %13605 = vmatpush1.bf16.msra.mxu1 %v13604_v61  ;;  %v17363_v61 = vld [vmem:[%s17755_s11 + $0xd8] sm:$0xff] }
0x1567   :  { %13607 = vmatprep.subr.bf16.mxu1 %v17102_v31  ;;  %v8948_v5 = vand.u32 4294901760, %v17363_v61 }
0x1569   :  { %8548 = vmatmul.mubr.f32.vlgmr.msra.gmra.mrb[30].mxu1 %v8269_v16  ;;  %v17438_v16 = vsub.f32 %v10276_v48, %v8930_v33  ;;  %v17469_v33 = vsub.f32 %v17342_v4, %v8939_v23  ;;  %v17485_v4 = vsub.f32 %v17363_v61, %v8948_v5 }
0x156a   :  { %13609 = vmatpush1.bf16.msra.mxu1 %v17104_v40  ;;  %8553 = vmatprep.mubr.f32.mxu1 %v17797_v55 }
0x156b   :  { %13611 = vmatprep.subr.bf16.mxu1 %v17108_v22  ;;  %v17789_v42 = vand.u32 4294901760, %v17438_v16 }
0x156d   :  { %8556 = vmatmul.mubr.f32.gmra.mrb[32].mxu1 %v8280_v58  ;;  %v17436_v58 = vsub.f32 %v10275_v30, %v8927_v63 }
0x156e   :  { %13613 = vmatpush1.bf16.msra.mxu1 %v17110_v54  ;;  %8642 = vmatprep.mubr.f32.mxu1 %v17797_v55 }
0x156f   :  { %13615 = vmatprep.subr.bf16.mxu1 %v17130_v34  ;;  %v17790_v18 = vand.u32 4294901760, %v17436_v58 }
0x1571   :  { %v9047_v7 = vsub.f32 %v17436_v58, %v17790_v18 }
0x1572   :  { %13617 = vmatpush1.bf16.msra.mxu1 %v17141_v20 }
0x1573   :  { %13619 = vmatprep.subr.bf16.mxu1 %v17145_v37 }
0x1576   :  { %13621 = vmatpush1.bf16.msra.mxu1 %v17151_v38 }
0x1577   :  { %13623 = vmatprep.subr.bf16.mxu1 %v17224_v11  ;;  %v8945_v11 = vand.u32 4294901760, %v17358_v27 }
0x1579   :  { %8646 = vmatmul.mubr.f32.vlgmr.msra.gmra.mrb[30].mxu1 %v8270_v26  ;;  %v17369_v2 = vpack.c.bf16 %v8948_v5, %v8945_v11 }
0x157a   :  { %13625 = vmatpush1.bf16.msra.mxu1 %v17230_v46  ;;  %8651 = vmatprep.mubr.f32.mxu1 %v17797_v55  ;;  %v17374_v46 = vld [vmem:[%s17755_s11 + $0xe0] sm:$0xff] }
0x157b   :  { %13627 = vmatprep.subr.bf16.mxu1 %v17232_v57  ;;  %v17379_v57 = vld [vmem:[%s17755_s11 + $0xe8] sm:$0xff] }
0x157d   :  { %8655 = vmatmul.mubr.f32.gmra.mrb[32].mxu1 %v8281_v9 }
0x157e   :  { %13629 = vmatpush1.bf16.msra.mxu1 %v17234_v60  ;;  %8773 = vmatprep.mubr.f32.mxu1 %v17797_v55  ;;  %v8951_v60 = vand.u32 4294901760, %v17374_v46 }
0x157f   :  { %13631 = vmatprep.subr.bf16.mxu1 %v17236_v50  ;;  %v8954_v50 = vand.u32 4294901760, %v17379_v57 }
0x1580   :  { %v17501_v61 = vsub.f32 %v17374_v46, %v8951_v60 }
0x1582   :  { %13633 = vmatpush1.bf16.msra.mxu1 %v17238_v45  ;;  %v17389_v45 = vpack.c.bf16 %v8954_v50, %v8951_v60 }
0x1583   :  { %13635 = vmatprep.subr.bf16.mxu1 %v17240_v59 }
0x1586   :  { %13637 = vmatpush1.bf16.msra.mxu1 %v17242_v8 }
0x1587   :  { %13639 = vmatprep.subr.bf16.mxu1 %v17102_v31  ;;  %v10271_v31 = vld [vmem:[%s17755_s11 + $0x80] sm:$0xff] }
0x1589   :  { %8775 = vmatmul.mubr.f32.vlgmr.msra.gmra.mrb[30].mxu1 %v17253_v52 }
0x158a   :  { %13641 = vmatpush1.bf16.msra.mxu1 %v17104_v40  ;;  %8780 = vmatprep.mubr.f32.mxu1 %v17797_v55  ;;  %v10272_v40 = vld [vmem:[%s17755_s11 + $0x88] sm:$0xff] }
0x158b   :  { %13643 = vmatprep.subr.bf16.mxu1 %v17108_v22  ;;  %v8915_v22 = vand.u32 4294901760, %v10271_v31 }
0x158d   :  { %8782 = vmatmul.mubr.f32.gmra.mrb[32].mxu1 %v17251_v19  ;;  %v17391_v59 = vsub.f32 %v10271_v31, %v8915_v22  ;;  %v9054_v31 = vsub.f32 %v17438_v16, %v17789_v42 }
0x158e   :  { %13645 = vmatpush1.bf16.msra.mxu1 %v17110_v54  ;;  %8868 = vmatprep.mubr.f32.mxu1 %v17797_v55  ;;  %v8918_v54 = vand.u32 4294901760, %v10272_v40 }
0x158f   :  { %13647 = vmatprep.subr.bf16.mxu1 %v17130_v34  ;;  %v9018_v0 = vand.u32 4294901760, %v17391_v59 }
0x1590   :  { %v17307_v34 = vpack.c.bf16 %v8918_v54, %v8915_v22  ;;  %v17393_v8 = vsub.f32 %v10272_v40, %v8918_v54  ;;  %v17452_v40 = vsub.f32 %v10277_v29, %v8933_v10  ;;  %v17454_v22 = vsub.f32 %v10278_v6, %v8936_v49 }
0x1591   :  { %v9019_v43 = vsub.f32 %v17391_v59, %v9018_v0  ;;  %v17472_v29 = vsub.f32 %v17347_v21, %v8942_v28  ;;  %v17786_v49 = vand.u32 4294901760, %v17469_v33 }
0x1592   :  { %13649 = vmatpush1.bf16.msra.mxu1 %v17141_v20  ;;  %v10273_v20 = vld [vmem:[%s17755_s11 + $0x90] sm:$0xff]  ;;  %13655 = vmatprep.subr.bf16.mxu0 %v17307_v34  ;;  %v9025_v51 = vand.u32 4294901760, %v17393_v8 }
0x1593   :  { %13651 = vmatprep.subr.bf16.mxu1 %v17145_v37  ;;  %v8921_v37 = vand.u32 4294901760, %v10273_v20  ;;  %13657 = vmatpush3.bf16.msra.mxu0 %v17307_v34  ;;  %v9020_v14 = vand.u32 4294901760, %v9019_v43  ;;  %v17785_v43 = vand.u32 4294901760, %v17472_v29 }
0x1594   :  { %v9026_v39 = vsub.f32 %v17393_v8, %v9025_v51 }
0x1595   :  { %v17423_v3 = vsub.f32 %v10273_v20, %v8921_v37  ;;  %v9048_v20 = vand.u32 4294901760, %v9047_v7  ;;  %v9082_v21 = vsub.f32 %v17472_v29, %v17785_v43 }
0x1596   :  { %13653 = vmatpush1.bf16.msra.mxu1 %v17151_v38  ;;  %v9027_v35 = vand.u32 4294901760, %v9026_v39 }
0x1597   :  { %v9032_v13 = vand.u32 4294901760, %v17423_v3 }
0x1599   :  { %8870 = vmatmul.mubr.f32.vlgmr.msra.gmra.mrb[30].mxu1 %v17253_v52  ;;  %v9033_v52 = vsub.f32 %v17423_v3, %v9032_v13 }
0x159a   :  { %8875 = vmatprep.mubr.f32.mxu1 %v17797_v55  ;;  %v10274_v55 = vld [vmem:[%s17755_s11 + $0x98] sm:$0xff] }
0x159b   :  { %v8924_v38 = vand.u32 4294901760, %v10274_v55  ;;  %v9034_v9 = vand.u32 4294901760, %v9033_v52  ;;  %v17783_v52 = vand.u32 4294901760, %v17485_v4 }
0x159d   :  { %8877 = vmatmul.mubr.f32.gmra.mrb[32].mxu1 %v17251_v19  ;;  %v17317_v56 = vpack.c.bf16 %v8924_v38, %v8921_v37  ;;  %v17425_v44 = vsub.f32 %v10274_v55, %v8924_v38  ;;  %v17431_v19 = vpack.c.bf16 %v9027_v35, %v9020_v14  ;;  %v9055_v55 = vand.u32 4294901760, %v9054_v31 }
0x159e   :  { %v17788_v37 = vand.u32 4294901760, %v17452_v40  ;;  %v17787_v38 = vand.u32 4294901760, %v17454_v22  ;;  %v9075_v14 = vsub.f32 %v17469_v33, %v17786_v49  ;;  %v17482_v35 = vsub.f32 %v17358_v27, %v8945_v11 }
0x159f   :  { %13659 = vmatprep.subr.bf16.mxu0 %v17317_v56  ;;  %v17791_v1 = vand.u32 4294901760, %v17425_v44  ;;  %v17460_v30 = vpack.c.bf16 %v9055_v55, %v9048_v20  ;;  %v9096_v27 = vsub.f32 %v17485_v4, %v17783_v52  ;;  %v17506_v11 = vsub.f32 %v17379_v57, %v8954_v50 }
0x15a0   :  { %13661 = vmatpush3.bf16.msra.mxu0 %v17317_v56  ;;  %v9061_v48 = vsub.f32 %v17452_v40, %v17788_v37  ;;  %v9068_v63 = vsub.f32 %v17454_v22, %v17787_v38  ;;  %v9076_v23 = vand.u32 4294901760, %v9075_v14  ;;  %v17784_v28 = vand.u32 4294901760, %v17482_v35 }
0x15a1   :  { %13663 = vmatprep.subr.bf16.mxu0 %v17327_v41  ;;  %v9040_v26 = vsub.f32 %v17425_v44, %v17791_v1  ;;  %v9097_v7 = vand.u32 4294901760, %v9096_v27  ;;  %v17782_v31 = vand.u32 4294901760, %v17501_v61  ;;  %v17781_v20 = vand.u32 4294901760, %v17506_v11 }
0x15a2   :  { %v9062_v6 = vand.u32 4294901760, %v9061_v48  ;;  %v9069_v10 = vand.u32 4294901760, %v9068_v63  ;;  %v17523_v57 = vsub.f32 %v17398_v15, %v8957_v24  ;;  %v17528_v50 = vsub.f32 %v17403_v47, %v8960_v53 }
0x15a3   :  { %v9041_v32 = vand.u32 4294901760, %v9040_v26  ;;  %v9083_v26 = vand.u32 4294901760, %v9082_v21  ;;  %v9103_v46 = vsub.f32 %v17501_v61, %v17782_v31  ;;  %v9110_v60 = vsub.f32 %v17506_v11, %v17781_v20 }
0x15a4   :  { %13665 = vmatpush3.bf16.msra.mxu0 %v17327_v41  ;;  %v17476_v39 = vpack.c.bf16 %v9069_v10, %v9062_v6  ;;  %v17780_v6 = vand.u32 4294901760, %v17523_v57  ;;  %v17779_v10 = vand.u32 4294901760, %v17528_v50  ;;  %v13718_v47 = vpack.c.bf16 %v17393_v8, %v17391_v59 }
0x15a5   :  { %13667 = vmatprep.subr.bf16.mxu0 %v17337_v12  ;;  %v17456_v54 = vpack.c.bf16 %v9041_v32, %v9034_v9  ;;  %v9089_v9 = vsub.f32 %v17482_v35, %v17784_v28  ;;  %v17508_v5 = vpack.c.bf16 %v9083_v26, %v9076_v23  ;;  %v9104_v48 = vand.u32 4294901760, %v9103_v46 }
0x15a6   :  { %v9111_v63 = vand.u32 4294901760, %v9110_v60  ;;  %v9117_v21 = vsub.f32 %v17523_v57, %v17780_v6  ;;  %v9124_v15 = vsub.f32 %v17528_v50, %v17779_v10  ;;  %v13722_v53 = vpack.c.bf16 %v17425_v44, %v17423_v3 }
0x15a7   :  { %v9090_v32 = vand.u32 4294901760, %v9089_v9  ;;  %v13726_v9 = vpack.c.bf16 %v17438_v16, %v17436_v58  ;;  %v17546_v27 = vpack.c.bf16 %v17454_v22, %v17452_v40  ;;  %v17558_v46 = vpack.c.bf16 %v17506_v11, %v17501_v61 }
0x15a8   :  { %13669 = vmatpush3.bf16.msra.mxu0 %v17337_v12  ;;  %v13710_v14 = vpack.c.bf16 %v9111_v63, %v9104_v48  ;;  %v9118_v24 = vand.u32 4294901760, %v9117_v21  ;;  %v9125_v23 = vand.u32 4294901760, %v9124_v15  ;;  %v17562_v60 = vpack.c.bf16 %v17528_v50, %v17523_v57 }
0x15a9   :  { %13671 = vmatprep.subr.bf16.mxu0 %v17353_v25  ;;  %v17512_v55 = vpack.c.bf16 %v9097_v7, %v9090_v32  ;;  %v17550_v32 = vpack.c.bf16 %v17472_v29, %v17469_v33  ;;  %v17554_v7 = vpack.c.bf16 %v17485_v4, %v17482_v35  ;;  %v17814_v59 = vand.u32 4294901760, %v17438_v16 }
0x15aa   :  { %v13714_v26 = vpack.c.bf16 %v9125_v23, %v9118_v24  ;;  %v17815_v8 = vand.u32 4294901760, %v17452_v40  ;;  %v17817_v3 = vand.u32 4294901760, %v17469_v33  ;;  %v17820_v16 = vand.u32 4294901760, %v17485_v4 }
0x15ab   :  { %v17821_v40 = vand.u32 4294901760, %v17501_v61  ;;  %v17823_v33 = vand.u32 4294901760, %v17523_v57  ;;  %v9628_v61 = vld [vmem:[#allocation13 + $0x18] sm:$0xff]  ;;  %v9630_v57 = vld [vmem:[#allocation13 + $0x28] sm:$0xff] }
0x15ac   :  { %13673 = vmatpush3.bf16.msra.mxu0 %v17353_v25 }
0x15ad   :  { %13675 = vmatprep.subr.bf16.mxu0 %v17369_v2 }
0x15b0   :  { %13677 = vmatpush3.bf16.msra.mxu0 %v17369_v2 }
0x15b1   :  { %13679 = vmatprep.subr.bf16.mxu0 %v17389_v45 }
0x15b4   :  { %13681 = vmatpush3.bf16.msra.mxu0 %v17389_v45 }
0x15b5   :  { %13683 = vmatprep.subr.bf16.mxu0 %v17415_v17 }
0x15b8   :  { %13685 = vmatpush3.bf16.msra.mxu0 %v17415_v17 }
0x15b9   :  { %13687 = vmatprep.subr.bf16.mxu0 %v17431_v19 }
0x166c   :  { %v8871_v48 = vpop.f32.mrb[30].mxu1 }
0x166d   :  { %v8883_v63 = vsub.f32 0.0, %v8871_v48  ;;  %v8873_v21 = vpop.f32.mrb[31].mxu1 }
0x166f   :  { %v8885_v15 = vmul.f32 1.442695, %v8883_v63 }
0x1670   :  { %v8878_v24 = vpop.f32.mrb[32].mxu1 }
0x1671   :  { %14355 = vpow2.f32 %v8885_v15  ;;  %v8884_v23 = vsub.f32 0.0, %v8878_v24  ;;  %v8880_v10 = vpop.f32.mrb[33].mxu1 }
0x1673   :  { %v8887_v6 = vmul.f32 1.442695, %v8884_v23 }
0x1675   :  { %14357 = vpow2.f32 %v8887_v6 }
0x167b   :  { %v14356_v20 = vpop.eup %14355 }
0x167c   :  { %v8889_v31 = vadd.f32 1.0, %v14356_v20  ;;  %v9649_v20 = vand.u32 4294901760, %v9628_v61 }
0x167e   :  { %14359 = vrcp.f32 %v8889_v31 }
0x167f   :  { %v14358_v52 = vpop.eup %14357 }
0x1680   :  { %v8890_v28 = vadd.f32 1.0, %v14358_v52 }
0x1682   :  { %14361 = vrcp.f32 %v8890_v28 }
0x1688   :  { %v14360_v43 = vpop.eup %14359 }
0x1689   :  { %v8892_v49 = vmul.f32 %v14360_v43, %v8871_v48 }
0x168b   :  { %v8895_v38 = vmul.f32 %v8892_v49, %v8873_v21 }
0x168c   :  { %v14362_v37 = vpop.eup %14361 }
0x168d   :  { %v17564_v42 = vand.u32 4294901760, %v8895_v38  ;;  %v8894_v18 = vmul.f32 %v14362_v37, %v8878_v24  ;;  %v17813_v37 = vand.u32 4294901760, %v17436_v58  ;;  %v17819_v58 = vand.u32 4294901760, %v17482_v35 }
0x168f   :  { %v8996_v63 = vsub.f32 %v8895_v38, %v17564_v42  ;;  %v8896_v15 = vmul.f32 %v8894_v18, %v8880_v10  ;;  %v17812_v18 = vand.u32 4294901760, %v17425_v44  ;;  %v13790_v38 = vpack.c.bf16 %v17814_v59, %v17813_v37 }
0x1690   :  { %v17818_v44 = vand.u32 4294901760, %v17472_v29  ;;  %v17824_v29 = vand.u32 4294901760, %v17528_v50  ;;  %v9631_v50 = vld [vmem:[#allocation13 + $0x30] sm:$0xff] }
0x1691   :  { %v17567_v1 = vand.u32 4294901760, %v8896_v15  ;;  %v8997_v23 = vand.u32 4294901760, %v8996_v63 }
0x1693   :  { %v17570_v6 = vsub.f32 %v8896_v15, %v17567_v1  ;;  %v8998_v31 = vsub.f32 %v8996_v63, %v8997_v23  ;;  %v9755_v15 = vsub.f32 %v9628_v61, %v9649_v20 }
0x1695   :  { %v9007_v52 = vand.u32 4294901760, %v17570_v6  ;;  %v8999_v28 = vand.u32 4294901760, %v8998_v31 }
0x1697   :  { %v9008_v43 = vsub.f32 %v17570_v6, %v9007_v52  ;;  %12210 = vmatprep.mubr.f32.mxu0 %v8999_v28 }
0x1699   :  { %v9009_v49 = vand.u32 4294901760, %v9008_v43 }
0x169b   :  { %12211 = vmatmul.mubr.f32.vlgmr.msra.gmra.mrb[26].mxu0 %v9009_v49 }
0x169c   :  { %13689 = vmatpush3.bf16.msra.mxu0 %v17431_v19  ;;  %12245 = vmatprep.mubr.f32.mxu0 %v17564_v42  ;;  %v13782_v19 = vpack.c.bf16 %v9025_v51, %v9018_v0  ;;  %v17816_v0 = vand.u32 4294901760, %v17454_v22  ;;  %v17822_v22 = vand.u32 4294901760, %v17506_v11 }
0x169d   :  { %13691 = vmatprep.subr.bf16.mxu0 %v17456_v54 }
0x169e   :  { %v13794_v51 = vpack.c.bf16 %v17816_v0, %v17815_v8 }
0x16a0   :  { %13693 = vmatpush3.bf16.msra.mxu0 %v17456_v54  ;;  %v13786_v54 = vpack.c.bf16 %v17812_v18, %v9032_v13  ;;  %v13798_v13 = vpack.c.bf16 %v17818_v44, %v17817_v3 }
0x16a1   :  { %13695 = vmatprep.subr.bf16.mxu0 %v17460_v30 }
0x16a4   :  { %13697 = vmatpush3.bf16.msra.mxu0 %v17460_v30  ;;  %v13802_v30 = vpack.c.bf16 %v17820_v16, %v17819_v58 }
0x16a5   :  { %13699 = vmatprep.subr.bf16.mxu0 %v17476_v39 }
0x16a8   :  { %13701 = vmatpush3.bf16.msra.mxu0 %v17476_v39  ;;  %v13806_v39 = vpack.c.bf16 %v17822_v22, %v17821_v40 }
0x16a9   :  { %13703 = vmatprep.subr.bf16.mxu0 %v17508_v5 }
0x16ac   :  { %13705 = vmatpush3.bf16.msra.mxu0 %v17508_v5  ;;  %v13810_v5 = vpack.c.bf16 %v17824_v29, %v17823_v33 }
0x16ad   :  { %13707 = vmatprep.subr.bf16.mxu0 %v17512_v55 }
0x16b0   :  { %13709 = vmatpush3.bf16.msra.mxu0 %v17512_v55  ;;  %v9629_v55 = vld [vmem:[#allocation13 + $0x20] sm:$0xff] }
0x16b1   :  { %13711 = vmatprep.subr.bf16.mxu0 %v13710_v14 }
0x16b4   :  { %13713 = vmatpush3.bf16.msra.mxu0 %v13710_v14  ;;  %v9652_v14 = vand.u32 4294901760, %v9629_v55 }
0x16b5   :  { %13715 = vmatprep.subr.bf16.mxu0 %v13714_v26 }
0x16b8   :  { %13717 = vmatpush3.bf16.msra.mxu0 %v13714_v26  ;;  %v9655_v26 = vand.u32 4294901760, %v9630_v57 }
0x16b9   :  { %13719 = vmatprep.subr.bf16.mxu0 %v13718_v47 }
0x16ba   :  { %v9769_v18 = vsub.f32 %v9630_v57, %v9655_v26  ;;  %v10287_v57 = vld [vmem:[%s17756_s12] ss:$0 sm:$0xff]  ;;  %s14585_s12 = smov [#allocation14]  }
0x16bb   :  { %12246 = vmatmul.mubr.f32.vlgmr.msra.gmra.mrb[26].mxu0 %v17567_v1  ;;  %s10226_s18 = sshll.u32 %s14585_s12, 4  ;;  %s10227_s18 = int_to_ptr.vmem [resolvable:$true] %s10226_s18 }
0x16bc   :  { %13721 = vmatpush3.bf16.msra.mxu0 %v13718_v47  ;;  %12280 = vmatprep.mubr.f32.mxu0 %v8996_v63  ;;  %v9632_v47 = vld [vmem:[#allocation13 + $0x38] sm:$0xff]  ;;  %s14535_s6 = scalar_lea.vmem %s10227_s18, 256  ;;  %p14540_p1 = scmp.lt.s32.totalorder %s10227_s18, %s10227_s18 }
0x16bd   :  { %13723 = vmatprep.subr.bf16.mxu0 %v13722_v53  ;;  %p14536_p0 = scmp.ne.s32.totalorder %s10227_s18, %s14535_s6  ;;  %p14541_p2 = scmp.lt.s32.totalorder %s14535_s6, %s14535_s6 }
0x16bf   :  { %p14542_p3 = por %p14541_p2, %p14540_p1 }
0x16c0   :  { %13725 = vmatpush3.bf16.msra.mxu0 %v13722_v53  ;;  %v9658_v53 = vand.u32 4294901760, %v9631_v50 }
0x16c1   :  { %13727 = vmatprep.subr.bf16.mxu0 %v13726_v9  ;;  %p14543_p4 = pnand %p14542_p3, %p14536_p0 }
0x16c2   :  { %v9776_v3 = vsub.f32 %v9631_v50, %v9658_v53 }
0x16c4   :  { %13729 = vmatpush3.bf16.msra.mxu0 %v13726_v9  ;;  %v9661_v9 = vand.u32 4294901760, %v9632_v47  ;;  %v9777_v16 = vand.u32 4294901760, %v9776_v3 }
0x16c5   :  { %13731 = vmatprep.subr.bf16.mxu0 %v17546_v27 }
0x16c6   :  { %v9783_v44 = vsub.f32 %v9632_v47, %v9661_v9  ;;  %v9778_v22 = vsub.f32 %v9776_v3, %v9777_v16 }
0x16c8   :  { %13733 = vmatpush3.bf16.msra.mxu0 %v17546_v27  ;;  %v17685_v27 = vpack.c.bf16 %v9655_v26, %v9652_v14  ;;  %v9779_v33 = vand.u32 4294901760, %v9778_v22 }
0x16c9   :  { %13735 = vmatprep.subr.bf16.mxu0 %v17550_v32 }
0x16cc   :  { %13737 = vmatpush3.bf16.msra.mxu0 %v17550_v32  ;;  %v17689_v32 = vpack.c.bf16 %v9661_v9, %v9658_v53 }
0x16cd   :  { %13739 = vmatprep.subr.bf16.mxu0 %v17554_v7 }
0x16d0   :  { %13741 = vmatpush3.bf16.msra.mxu0 %v17554_v7 }
0x16d1   :  { %13743 = vmatprep.subr.bf16.mxu0 %v17558_v46 }
0x16d4   :  { %13745 = vmatpush3.bf16.msra.mxu0 %v17558_v46 }
0x16d5   :  { %13747 = vmatprep.subr.bf16.mxu0 %v17562_v60 }
0x16d8   :  { %13749 = vmatpush3.bf16.msra.mxu0 %v17562_v60 }
0x16d9   :  { %13751 = vmatprep.subr.bf16.mxu0 %v17307_v34 }
0x16db   :  { %12281 = vmatmul.mubr.f32.vlgmr.msra.gmra.mrb[26].mxu0 %v17570_v6 }
0x16dc   :  { %13753 = vmatpush3.bf16.msra.mxu0 %v17307_v34  ;;  %12315 = vmatprep.mubr.f32.mxu0 %v8997_v23 }
0x16dd   :  { %13755 = vmatprep.subr.bf16.mxu0 %v17317_v56 }
0x16e0   :  { %13757 = vmatpush3.bf16.msra.mxu0 %v17317_v56 }
0x16e1   :  { %13759 = vmatprep.subr.bf16.mxu0 %v17327_v41 }
0x16e4   :  { %13761 = vmatpush3.bf16.msra.mxu0 %v17327_v41 }
0x16e5   :  { %13763 = vmatprep.subr.bf16.mxu0 %v17337_v12 }
0x16e8   :  { %13765 = vmatpush3.bf16.msra.mxu0 %v17337_v12 }
0x16e9   :  { %13767 = vmatprep.subr.bf16.mxu0 %v17353_v25 }
0x16ec   :  { %13769 = vmatpush3.bf16.msra.mxu0 %v17353_v25 }
0x16ed   :  { %13771 = vmatprep.subr.bf16.mxu0 %v17369_v2 }
0x16f0   :  { %13773 = vmatpush3.bf16.msra.mxu0 %v17369_v2 }
0x16f1   :  { %13775 = vmatprep.subr.bf16.mxu0 %v17389_v45 }
0x16f4   :  { %13777 = vmatpush3.bf16.msra.mxu0 %v17389_v45 }
0x16f5   :  { %13779 = vmatprep.subr.bf16.mxu0 %v17415_v17 }
0x16f8   :  { %13781 = vmatpush3.bf16.msra.mxu0 %v17415_v17 }
0x16f9   :  { %13783 = vmatprep.subr.bf16.mxu0 %v13782_v19 }
0x16fb   :  { %12316 = vmatmul.mubr.f32.vlgmr.msra.gmra.mrb[26].mxu0 %v9007_v52  ;;  %v9756_v52 = vand.u32 4294901760, %v9755_v15 }
0x16fc   :  { %13785 = vmatpush3.bf16.msra.mxu0 %v13782_v19  ;;  %12350 = vmatprep.mubr.f32.mxu0 %v17564_v42  ;;  %v9762_v19 = vsub.f32 %v9629_v55, %v9652_v14 }
0x16fd   :  { %13787 = vmatprep.subr.bf16.mxu0 %v13786_v54  ;;  %v9757_v49 = vsub.f32 %v9755_v15, %v9756_v52 }
0x16fe   :  { %v9763_v59 = vand.u32 4294901760, %v9762_v19 }
0x16ff   :  { %v9758_v37 = vand.u32 4294901760, %v9757_v49 }
0x1700   :  { %13789 = vmatpush3.bf16.msra.mxu0 %v13786_v54  ;;  %v9764_v0 = vsub.f32 %v9762_v19, %v9763_v59 }
0x1701   :  { %13791 = vmatprep.subr.bf16.mxu0 %v13790_v38 }
0x1704   :  { %13793 = vmatpush3.bf16.msra.mxu0 %v13790_v38  ;;  %v9770_v38 = vand.u32 4294901760, %v9769_v18 }
0x1705   :  { %13795 = vmatprep.subr.bf16.mxu0 %v13794_v51 }
0x1708   :  { %13797 = vmatpush3.bf16.msra.mxu0 %v13794_v51  ;;  %v9771_v51 = vsub.f32 %v9769_v18, %v9770_v38 }
0x1709   :  { %13799 = vmatprep.subr.bf16.mxu0 %v13798_v13 }
0x170a   :  { %v9772_v58 = vand.u32 4294901760, %v9771_v51 }
0x170c   :  { %13801 = vmatpush3.bf16.msra.mxu0 %v13798_v13  ;;  %v9765_v13 = vand.u32 4294901760, %v9764_v0 }
0x170d   :  { %13803 = vmatprep.subr.bf16.mxu0 %v13802_v30 }
0x170e   :  { %v13870_v40 = vpack.c.bf16 %v9772_v58, %v9765_v13 }
0x1710   :  { %13805 = vmatpush3.bf16.msra.mxu0 %v13802_v30  ;;  %v9784_v30 = vand.u32 4294901760, %v9783_v44 }
0x1711   :  { %13807 = vmatprep.subr.bf16.mxu0 %v13806_v39 }
0x1714   :  { %13809 = vmatpush3.bf16.msra.mxu0 %v13806_v39  ;;  %v9785_v39 = vsub.f32 %v9783_v44, %v9784_v30 }
0x1715   :  { %13811 = vmatprep.subr.bf16.mxu0 %v13810_v5 }
0x1716   :  { %v9786_v29 = vand.u32 4294901760, %v9785_v39 }
0x1718   :  { %13813 = vmatpush3.bf16.msra.mxu0 %v13810_v5  ;;  %v13874_v5 = vpack.c.bf16 %v9786_v29, %v9779_v33 }
0x1719   :  { %13815 = vmatprep.subr.bf16.mxu0 %v17307_v34 }
0x171b   :  { %12351 = vmatmul.mubr.f32.vlgmr.msra.gmra.mrb[26].mxu0 %v17567_v1 }
0x171c   :  { %13817 = vmatpush3.bf16.msra.mxu0 %v17307_v34  ;;  %12385 = vmatprep.mubr.f32.mxu0 %v17564_v42  ;;  %v9626_v42 = vld [vmem:[#allocation13 + $0x8] sm:$0xff] }
0x171d   :  { %13819 = vmatprep.subr.bf16.mxu0 %v17317_v56  ;;  %v9643_v35 = vand.u32 4294901760, %v9626_v42 }
0x171f   :  { %v9741_v46 = vsub.f32 %v9626_v42, %v9643_v35  ;;  %v17698_v42 = vpack.c.bf16 %v9784_v30, %v9777_v16 }
0x1720   :  { %13821 = vmatpush3.bf16.msra.mxu0 %v17317_v56 }
0x1721   :  { %13823 = vmatprep.subr.bf16.mxu0 %v17327_v41  ;;  %v9742_v48 = vand.u32 4294901760, %v9741_v46 }
0x1723   :  { %v9743_v24 = vsub.f32 %v9741_v46, %v9742_v48 }
0x1724   :  { %13825 = vmatpush3.bf16.msra.mxu0 %v17327_v41 }
0x1725   :  { %13827 = vmatprep.subr.bf16.mxu0 %v17337_v12  ;;  %v9744_v6 = vand.u32 4294901760, %v9743_v24 }
0x1728   :  { %13829 = vmatpush3.bf16.msra.mxu0 %v17337_v12 }
0x1729   :  { %13831 = vmatprep.subr.bf16.mxu0 %v17353_v25 }
0x172c   :  { %13833 = vmatpush3.bf16.msra.mxu0 %v17353_v25 }
0x172d   :  { %13835 = vmatprep.subr.bf16.mxu0 %v17369_v2 }
0x1730   :  { %13837 = vmatpush3.bf16.msra.mxu0 %v17369_v2 }
0x1731   :  { %13839 = vmatprep.subr.bf16.mxu0 %v17389_v45 }
0x1734   :  { %13841 = vmatpush3.bf16.msra.mxu0 %v17389_v45 }
0x1735   :  { %13843 = vmatprep.subr.bf16.mxu0 %v17415_v17 }
0x1738   :  { %13845 = vmatpush3.bf16.msra.mxu0 %v17415_v17 }
0x173b   :  { %12386 = vmatmul.mubr.f32.vlgmr.msra.gmra.mrb[26].mxu0 %v17567_v1  ;;  %v9625_v1 = vld [vmem:[#allocation13] sm:$0xff] }
0x180e   :  { %v12387_v34 = vpop.f32.mrb[26].mxu0 }
0x180f   :  { %v17667_v56 = vadd.f32 %v12387_v34, %v17091_v62  ;;  %v9588_v41 = vpop.f32.mrb[27].mxu0  ;;  %v9640_v62 = vand.u32 4294901760, %v9625_v1 }
0x1810   :  { %v17670_v12 = vadd.f32 %v9588_v41, %v17094_v36  ;;  %v9627_v36 = vld [vmem:[#allocation13 + $0x10] sm:$0xff] }
0x1811   :  { %v9602_v25 = vmul.f32 %v17667_v56, %v17667_v56  ;;  %v17678_v4 = vpack.c.bf16 %v9643_v35, %v9640_v62  ;;  %v9646_v11 = vand.u32 4294901760, %v9627_v36  ;;  %v9734_v7 = vsub.f32 %v9625_v1, %v9640_v62 }
0x1812   :  { %v9601_v2 = vmul.f32 %v17670_v12, %v17670_v12  ;;  %v17696_v1 = vpack.c.bf16 %v9770_v38, %v9763_v59 }
0x1813   :  { %v9606_v45 = vsel %vm164_vm0, %v9602_v25, 0.0  ;;  %13847 = vmatprep.subr.bf16.mxu1 %v17678_v4  ;;  %v17682_v10 = vpack.c.bf16 %v9649_v20, %v9646_v11  ;;  %v9735_v60 = vand.u32 4294901760, %v9734_v7  ;;  %v9748_v63 = vsub.f32 %v9627_v36, %v9646_v11 }
0x1814   :  { %9607 = vadd.xlane.f32.xlu1 %v9606_v45  ;;  %v9603_v17 = vsel %vm164_vm0, %v9601_v2, 0.0  ;;  %13849 = vmatpush3.bf16.msra.mxu1 %v17678_v4  ;;  %v13878_v34 = vpack.c.bf16 %v9741_v46, %v9734_v7  ;;  %v13886_v25 = vpack.c.bf16 %v9769_v18, %v9762_v19  ;;  %v13890_v2 = vpack.c.bf16 %v9783_v44, %v9776_v3 }
0x1815   :  { %9604 = vadd.xlane.f32.xlu0 %v9603_v17  ;;  %13851 = vmatprep.subr.bf16.mxu1 %v17682_v10  ;;  %v9736_v21 = vsub.f32 %v9734_v7, %v9735_v60  ;;  %v9749_v31 = vand.u32 4294901760, %v9748_v63  ;;  %v13882_v41 = vpack.c.bf16 %v9755_v15, %v9748_v63  ;;  %v13910_v45 = vpack.c.bf16 %v9742_v48, %v9735_v60 }
0x1817   :  { %v9737_v23 = vand.u32 4294901760, %v9736_v21  ;;  %v9750_v43 = vsub.f32 %v9748_v63, %v9749_v31  ;;  %v17694_v17 = vpack.c.bf16 %v9756_v52, %v9749_v31 }
0x1818   :  { %13853 = vmatpush3.bf16.msra.mxu1 %v17682_v10 }
0x1819   :  { %13855 = vmatprep.subr.bf16.mxu1 %v17685_v27  ;;  %v13862_v28 = vpack.c.bf16 %v9744_v6, %v9737_v23  ;;  %v9751_v54 = vand.u32 4294901760, %v9750_v43 }
0x181b   :  { %v13866_v8 = vpack.c.bf16 %v9758_v37, %v9751_v54 }
0x181c   :  { %13857 = vmatpush3.bf16.msra.mxu1 %v17685_v27 }
0x181d   :  { %13859 = vmatprep.subr.bf16.mxu1 %v17689_v32 }
0x1820   :  { %13861 = vmatpush3.bf16.msra.mxu1 %v17689_v32 }
0x1821   :  { %13863 = vmatprep.subr.bf16.mxu1 %v13862_v28 }
0x18a1   :  { %v9608_v62 = vpop.xlane.xlu1 %9607 }
0x18a2   :  { %v9610_v35 = vmul.f32 0.015625, %v9608_v62  ;;  %v9605_v36 = vpop.xlane.xlu0 %9604 }
0x18a3   :  { %v9609_v61 = vmul.f32 0.015625, %v9605_v36 }
0x18a4   :  { %v9612_v11 = vadd.f32 1e-05, %v9610_v35 }
0x18a5   :  { %v9611_v20 = vadd.f32 1e-05, %v9609_v61 }
0x18a6   :  { %14363 = vrsqrt.f32 %v9612_v11 }
0x18a7   :  { %14365 = vrsqrt.f32 %v9611_v20 }
0x18b0   :  { %v14364_v55 = vpop.eup %14363 }
0x18b1   :  { %v14366_v50 = vpop.eup %14365  ;;  %v9616_v14 = vmul.f32 %v14364_v55, %v17667_v56 }
0x18b2   :  { %v9615_v26 = vmul.f32 %v14366_v50, %v17670_v12 }
0x18b3   :  { %v9624_v47 = vmul.f32 %v10287_v57, %v9616_v14 }
0x18b4   :  { %v9623_v53 = vmul.f32 %v10287_v57, %v9615_v26 }
0x18b5   :  { %v9637_v9 = vsel %vm164_vm0, %v9624_v47, 0 }
0x18b6   :  { %v9634_v7 = vsel %vm164_vm0, %v9623_v53, 0  ;;  %v9722_v46 = vand.u32 4294901760, %v9637_v9 }
0x18b7   :  { %v9712_v60 = vand.u32 4294901760, %v9634_v7 }
0x18b8   :  { %v9723_v48 = vsub.f32 %v9637_v9, %v9722_v46 }
0x18b9   :  { %v9713_v21 = vsub.f32 %v9634_v7, %v9712_v60 }
0x18ba   :  { %v9724_v24 = vand.u32 4294901760, %v9723_v48 }
0x18bb   :  { %v9714_v63 = vand.u32 4294901760, %v9713_v21 }
0x18bc   :  { %v9725_v15 = vsub.f32 %v9723_v48, %v9724_v24 }
0x18bd   :  { %v9715_v23 = vsub.f32 %v9713_v21, %v9714_v63 }
0x18be   :  { %v9726_v31 = vand.u32 4294901760, %v9725_v15 }
0x18bf   :  { %v9716_v6 = vand.u32 4294901760, %v9715_v23 }
0x18c1   :  { %12404 = vmatprep.mubr.f32.mxu1 %v9716_v6 }
0x18c2   :  { %12405 = vmatmul.mubr.f32.vlgmr.msra.gmra.mrb[34].mxu1 %v9726_v31 }
0x18c3   :  { %13865 = vmatpush3.bf16.msra.mxu1 %v13862_v28  ;;  %12423 = vmatprep.mubr.f32.mxu1 %v9712_v60 }
0x18c4   :  { %13867 = vmatprep.subr.bf16.mxu1 %v13866_v8 }
0x18c7   :  { %13869 = vmatpush3.bf16.msra.mxu1 %v13866_v8 }
0x18c8   :  { %13871 = vmatprep.subr.bf16.mxu1 %v13870_v40 }
0x18cb   :  { %13873 = vmatpush3.bf16.msra.mxu1 %v13870_v40 }
0x18cc   :  { %13875 = vmatprep.subr.bf16.mxu1 %v13874_v5 }
0x18cf   :  { %13877 = vmatpush3.bf16.msra.mxu1 %v13874_v5 }
0x18d0   :  { %13879 = vmatprep.subr.bf16.mxu1 %v13878_v34 }
0x18d2   :  { %12424 = vmatmul.mubr.f32.vlgmr.msra.gmra.mrb[34].mxu1 %v9722_v46 }
0x18d3   :  { %13881 = vmatpush3.bf16.msra.mxu1 %v13878_v34  ;;  %12442 = vmatprep.mubr.f32.mxu1 %v9713_v21 }
0x18d4   :  { %13883 = vmatprep.subr.bf16.mxu1 %v13882_v41 }
0x18d7   :  { %13885 = vmatpush3.bf16.msra.mxu1 %v13882_v41 }
0x18d8   :  { %13887 = vmatprep.subr.bf16.mxu1 %v13886_v25 }
0x18db   :  { %13889 = vmatpush3.bf16.msra.mxu1 %v13886_v25 }
0x18dc   :  { %13891 = vmatprep.subr.bf16.mxu1 %v13890_v2 }
0x18df   :  { %13893 = vmatpush3.bf16.msra.mxu1 %v13890_v2 }
0x18e0   :  { %13895 = vmatprep.subr.bf16.mxu1 %v17678_v4 }
0x18e2   :  { %12443 = vmatmul.mubr.f32.vlgmr.msra.gmra.mrb[34].mxu1 %v9723_v48 }
0x18e3   :  { %13897 = vmatpush3.bf16.msra.mxu1 %v17678_v4  ;;  %12461 = vmatprep.mubr.f32.mxu1 %v9714_v63 }
0x18e4   :  { %13899 = vmatprep.subr.bf16.mxu1 %v17682_v10 }
0x18e7   :  { %13901 = vmatpush3.bf16.msra.mxu1 %v17682_v10 }
0x18e8   :  { %13903 = vmatprep.subr.bf16.mxu1 %v17685_v27 }
0x18eb   :  { %13905 = vmatpush3.bf16.msra.mxu1 %v17685_v27 }
0x18ec   :  { %13907 = vmatprep.subr.bf16.mxu1 %v17689_v32 }
0x18ef   :  { %13909 = vmatpush3.bf16.msra.mxu1 %v17689_v32 }
0x18f0   :  { %13911 = vmatprep.subr.bf16.mxu1 %v13910_v45 }
0x18f2   :  { %12462 = vmatmul.mubr.f32.vlgmr.msra.gmra.mrb[34].mxu1 %v9724_v24 }
0x18f3   :  { %13913 = vmatpush3.bf16.msra.mxu1 %v13910_v45  ;;  %12480 = vmatprep.mubr.f32.mxu1 %v9712_v60 }
0x18f4   :  { %13915 = vmatprep.subr.bf16.mxu1 %v17694_v17 }
0x18f7   :  { %13917 = vmatpush3.bf16.msra.mxu1 %v17694_v17 }
0x18f8   :  { %13919 = vmatprep.subr.bf16.mxu1 %v17696_v1 }
0x18fb   :  { %13921 = vmatpush3.bf16.msra.mxu1 %v17696_v1 }
0x18fc   :  { %13923 = vmatprep.subr.bf16.mxu1 %v17698_v42 }
0x18ff   :  { %13925 = vmatpush3.bf16.msra.mxu1 %v17698_v42 }
0x1900   :  { %13927 = vmatprep.subr.bf16.mxu1 %v17678_v4 }
0x1902   :  { %12481 = vmatmul.mubr.f32.vlgmr.msra.gmra.mrb[34].mxu1 %v9722_v46 }
0x1903   :  { %13929 = vmatpush3.bf16.msra.mxu1 %v17678_v4  ;;  %12499 = vmatprep.mubr.f32.mxu1 %v9712_v60 }
0x1904   :  { %13931 = vmatprep.subr.bf16.mxu1 %v17682_v10 }
0x1907   :  { %13933 = vmatpush3.bf16.msra.mxu1 %v17682_v10 }
0x1908   :  { %13935 = vmatprep.subr.bf16.mxu1 %v17685_v27 }
0x190b   :  { %13937 = vmatpush3.bf16.msra.mxu1 %v17685_v27 }
0x190c   :  { %13939 = vmatprep.subr.bf16.mxu1 %v17689_v32 }
0x190f   :  { %13941 = vmatpush3.bf16.msra.mxu1 %v17689_v32 }
0x1912   :  { %12500 = vmatmul.mubr.f32.vlgmr.msra.gmra.mrb[34].mxu1 %v9722_v46 }
0x19e5   :  { %v12501_v56 = vpop.f32.mrb[34].mxu1 }
0x19e6   :  { %10220 = vst [vmem:[#allocation14 + $0x8] sm:$0xff] %v12501_v56  ;;  %v10209_v12 = vpop.f32.mrb[35].mxu1 }
0x19e7   :  { %10219 = vst [vmem:[#allocation14] sm:$0xff] %v10209_v12 }
0x19e8   :  { %14546 = shalt.err (!%p14543_p4)
}
0x19e9   :  { %s14547_s22 = scalar_lea.hbm %s17758_s14, 256 }
0x19ea   :  { %p14548_p5 = scmp.ne.s32.totalorder %s17758_s14, %s14547_s22  ;;  %p14551_p6 = scmp.lt.u32.totalorder %s14547_s22, %s17758_s14 }
0x19ec   :  { %p14553_p7 = pnand %p14551_p6, %p14548_p5 }
0x19ee   :  { %14556 = shalt.err (!%p14553_p7)
}
0x19ef   :  { %10232 = dma.vmem_to_hbm [thread:$0]  %s10227_s18, 256, %s17758_s14, [#allocation4], %s14569_s25, %s14569_s25, %s14570_s26  }
0x19f0   :  { %14565 = dma.done.wait [#allocation4], 256  }
0x19f1   :  { %14566 = vsyncadd [#allocation4], 4294967040 }
0x19f2   :  { %10236 = vsyncpa [#allocation3], 1 }
0x19f3   :  { %10237 = vsyncpa [#allocation6], 1 }
0x19f4   :  { %10238 = vsyncpa [#allocation9], 1 }
0x19f5   :  { %10239 = vsyncpa [#allocation12], 1 }
0x19f6   :  { %10240 = vsyncpa [#allocation4], 1 }

</bundles_post_ra>
